<compile_context>
chip_gen: v6e
topology: v6e:2x2x1
jax: 0.10.0
libtpu: 0.0.40
codegen_flags: <defaults>
</compile_context>

<pallas_src>
import jax
import jax.numpy as jnp
import numpy as np
from jax.experimental import pallas as pl
from jax.experimental.pallas import tpu as pltpu

NUM_CAPS = 10
CAPS_DIM = 16
L1_IN, L1_OUT, L2_OUT, L3_OUT = 160, 512, 1024, 784   # 160 = 10*16, 784 = 28*28


def decoder_kernel(seg_ref, cap_ref,
                   xf_ref, w1_ref, b1_ref, w2_ref, b2_ref, w3_ref, b3_ref,
                   out_ref, idx_ref):
    xf = xf_ref[...]                                          # (TB, 160) f32

    # capsule "length": torch.sqrt(x**2).sum(2) == sum(|x|) per 16-dim capsule.
    # group-sum expressed as a matmul against a precomputed indicator (no reshape).
    norms = jnp.dot(jnp.abs(xf), seg_ref[...],
                    preferred_element_type=jnp.float32)       # (TB, 10)

    # softmax is monotone and its value is never used -> argmax of norms directly
    # (first index wins on ties, matching torch / jnp.argmax).
    tb = norms.shape[0]
    cols = jax.lax.broadcasted_iota(jnp.int32, (tb, NUM_CAPS), 1)
    mmax = jnp.max(norms, axis=1, keepdims=True)
    cand = jnp.where(norms == mmax, cols, NUM_CAPS)
    idx = jnp.min(cand, axis=1, keepdims=True)                # (TB, 1) int32
    idx_ref[...] = idx                                        # tiny 4 B/row writeback

    # masked_x = x * mask[:, :, None, None] applied on the flat (TB, 160) layout,
    # cast once to bf16 for the MXU.
    h = (xf * (cap_ref[...] == idx).astype(jnp.float32)).astype(jnp.bfloat16)

    # 3-layer MLP: bf16 operands feed the MXU, f32 accumulation; hidden bias+ReLU in bf16.
    h1 = jnp.maximum(
        jnp.dot(h, w1_ref[...],
                preferred_element_type=jnp.float32).astype(jnp.bfloat16) + b1_ref[...],
        0)                                                    # (TB, 512) bf16
    h2 = jnp.maximum(
        jnp.dot(h1, w2_ref[...],
                preferred_element_type=jnp.float32).astype(jnp.bfloat16) + b2_ref[...],
        0)                                                    # (TB, 1024) bf16
    z3 = jnp.dot(h2, w3_ref[...],
                 preferred_element_type=jnp.float32) + b3_ref[...]   # (TB, 784) f32

    # sigmoid via tanh identity: one EUP op, exact (no approx reciprocal).
    out_ref[...] = 0.5 * jnp.tanh(0.5 * z3) + 0.5


def _choose_batch_tile(b_pad):
    """b_pad is a multiple of 8. Largest tile (<=512) that keeps >=2 grid steps."""
    if b_pad <= 8:
        return b_pad
    for tb in (512, 256, 128, 64, 32, 16, 8):
        if b_pad % tb == 0 and b_pad // tb >= 2:
            return tb
    return 8


def prepare_params(params):
    """One-time preprocessing: bf16 weights/biases + grid-invariant constants."""
    w1, b1, w2, b2, w3, b3 = params
    seg = (jnp.arange(L1_IN, dtype=jnp.int32)[:, None] // CAPS_DIM ==
           jnp.arange(NUM_CAPS, dtype=jnp.int32)[None, :]).astype(jnp.float32)  # (160,10)
    cap_ids = (jnp.arange(L1_IN, dtype=jnp.int32) // CAPS_DIM)[None, :]          # (1,160)
    return (seg, cap_ids,
            w1.astype(jnp.bfloat16), b1.astype(jnp.bfloat16),
            w2.astype(jnp.bfloat16), b2.astype(jnp.bfloat16),
            w3.astype(jnp.bfloat16), b3.astype(jnp.float32))


def decoder_layer(x, prepared):
    """x: (B, 10, 16, 1) float32 -> (recon (B, 1, 28, 28) f32, mask (B, 10) f32)"""
    seg, cap_ids, w1b, b1b, w2b, b2b, w3b, b3 = prepared
    B = x.shape[0]
    xf = x.reshape(B, L1_IN).astype(jnp.float32)

    # pad tiny / odd batches to a multiple of 8 (sublane granularity, canonical layouts)
    b_pad = max(8, ((B + 7) // 8) * 8)
    if b_pad != B:
        xf = jnp.pad(xf, ((0, b_pad - B), (0, 0)))

    TB = _choose_batch_tile(b_pad)
    grid = (b_pad // TB,)

    const = lambda i: (0, 0)      # weights / constants: same block every step (VMEM-resident)
    batch = lambda i: (i, 0)      # batch-tiled arrays

    in_specs = [
        pl.BlockSpec((L1_IN, NUM_CAPS), const),   # seg
        pl.BlockSpec((1, L1_IN), const),          # cap_ids
        pl.BlockSpec((TB, L1_IN), batch),         # xf
        pl.BlockSpec((L1_IN, L1_OUT), const),     # w1 (bf16)
        pl.BlockSpec((1, L1_OUT), const),         # b1 (bf16)
        pl.BlockSpec((L1_OUT, L2_OUT), const),    # w2 (bf16)
        pl.BlockSpec((1, L2_OUT), const),         # b2 (bf16)
        pl.BlockSpec((L2_OUT, L3_OUT), const),    # w3 (bf16)
        pl.BlockSpec((1, L3_OUT), const),         # b3 (f32)
    ]
    out_specs = (
        pl.BlockSpec((TB, L3_OUT), batch),        # reconstruction, no padding / no slice copy
        pl.BlockSpec((TB, 1), batch),             # argmax capsule index
    )
    out_shape = (
        jax.ShapeDtypeStruct((b_pad, L3_OUT), jnp.float32),
        jax.ShapeDtypeStruct((b_pad, 1), jnp.int32),
    )

    out, idx = pl.pallas_call(
        decoder_kernel,
        grid=grid,
        in_specs=in_specs,
        out_specs=out_specs,
        out_shape=out_shape,
        compiler_params=pltpu.CompilerParams(
            dimension_semantics=("parallel",),   # independent batch tiles -> dual-TC shard
            vmem_limit_bytes=32 << 20,
        ),
    )(seg, cap_ids, xf, w1b, b1b, w2b, b2b, w3b, b3)

    if b_pad != B:
        out = out[:B]
        idx = idx[:B]

    recon = out.reshape(B, 1, 28, 28)
    mask = jnp.eye(NUM_CAPS, dtype=jnp.float32)[idx[:, 0]]    # (B, 10) one-hot
    return recon, mask


def init_params(key):
    """Deterministic init mimicking torch.nn.Linear (uniform +/- 1/sqrt(fan_in))."""
    ks = jax.random.split(key, 6)

    def lin(kw, kb, fan_in, fan_out):
        bound = 1.0 / np.sqrt(fan_in)
        w = jax.random.uniform(kw, (fan_in, fan_out), jnp.float32, -bound, bound)
        b = jax.random.uniform(kb, (1, fan_out), jnp.float32, -bound, bound)
        return w, b

    w1, b1 = lin(ks[0], ks[1], L1_IN, L1_OUT)
    w2, b2 = lin(ks[2], ks[3], L1_OUT, L2_OUT)
    w3, b3 = lin(ks[4], ks[5], L2_OUT, L3_OUT)
    return (w1, b1, w2, b2, w3, b3)


def reference(x, params):
    """Pure-JAX f32 reference of the exact PyTorch forward (true f32 numerics)."""
    w1, b1, w2, b2, w3, b3 = params
    B = x.shape[0]
    norms = jnp.sqrt(x ** 2).sum(2)                       # (B, 10, 1)
    sm = jax.nn.softmax(norms, axis=1)
    idx = jnp.argmax(sm, axis=1)[:, 0]                    # (B,)
    mask = jnp.eye(NUM_CAPS, dtype=x.dtype)[idx]          # (B, 10)
    masked = (x * mask[:, :, None, None]).reshape(B, -1)
    h1 = jax.nn.relu(masked @ w1 + b1)
    h2 = jax.nn.relu(h1 @ w2 + b2)
    out = jax.nn.sigmoid(h2 @ w3 + b3)
    return out.reshape(-1, 1, 28, 28), mask


if __name__ == "__main__":
    key = jax.random.PRNGKey(0)
    kx, kp = jax.random.split(key)
    B = 2
    x = jax.random.normal(kx, (B, NUM_CAPS, CAPS_DIM, 1), dtype=jnp.float32)
    params = init_params(kp)
    prepared = prepare_params(params)   # one-time cast / constant build (hoisted per review)

    recon, mask = decoder_layer(x, prepared)
    recon = jax.block_until_ready(recon)
    mask = jax.block_until_ready(mask)

    ref_recon, ref_mask = reference(x, params)
    assert recon.shape == (B, 1, 28, 28) and mask.shape == (B, NUM_CAPS)
    np.testing.assert_allclose(np.asarray(mask), np.asarray(ref_mask), atol=1e-6)
    # bf16 matmul operands vs. the true-f32 reference: error is well inside 1e-2.
    np.testing.assert_allclose(np.asarray(recon), np.asarray(ref_recon),
                               rtol=1e-2, atol=1e-2)
    print("KERNEL_OK")
</pallas_src>

<mosaic_0001>
module attributes {stable_mosaic.version = 11 : i64} {
  func.func @decoder_kernel(%arg0: i32, %arg1: memref<160x10xf32, #tpu.memory_space<vmem>>, %arg2: memref<1x160xi32, #tpu.memory_space<vmem>>, %arg3: memref<8x160xf32, #tpu.memory_space<vmem>>, %arg4: memref<160x512xbf16, #tpu.memory_space<vmem>>, %arg5: memref<1x512xbf16, #tpu.memory_space<vmem>>, %arg6: memref<512x1024xbf16, #tpu.memory_space<vmem>>, %arg7: memref<1x1024xbf16, #tpu.memory_space<vmem>>, %arg8: memref<1024x784xbf16, #tpu.memory_space<vmem>>, %arg9: memref<1x784xf32, #tpu.memory_space<vmem>>, %arg10: memref<8x784xf32, #tpu.memory_space<vmem>>, %arg11: memref<8x1xi32, #tpu.memory_space<vmem>>) attributes {dimension_semantics = [#tpu.dimension_semantics<parallel>], iteration_bounds = array<i64: 1>, scalar_prefetch = 0 : i64, scratch_operands = 0 : i64, tpu.core_type = #tpu.core_type<tc>, window_params = [{pipeline_mode = #tpu.pipeline_mode<synchronous>, transform_indices = @transform_0, window_bounds = array<i64: 160, 10>}, {pipeline_mode = #tpu.pipeline_mode<synchronous>, transform_indices = @transform_1, window_bounds = array<i64: 1, 160>}, {transform_indices = @transform_2, window_bounds = array<i64: 8, 160>}, {pipeline_mode = #tpu.pipeline_mode<synchronous>, transform_indices = @transform_3, window_bounds = array<i64: 160, 512>}, {pipeline_mode = #tpu.pipeline_mode<synchronous>, transform_indices = @transform_4, window_bounds = array<i64: 1, 512>}, {pipeline_mode = #tpu.pipeline_mode<synchronous>, transform_indices = @transform_5, window_bounds = array<i64: 512, 1024>}, {pipeline_mode = #tpu.pipeline_mode<synchronous>, transform_indices = @transform_6, window_bounds = array<i64: 1, 1024>}, {pipeline_mode = #tpu.pipeline_mode<synchronous>, transform_indices = @transform_7, window_bounds = array<i64: 1024, 784>}, {pipeline_mode = #tpu.pipeline_mode<synchronous>, transform_indices = @transform_8, window_bounds = array<i64: 1, 784>}, {transform_indices = @transform_9, window_bounds = array<i64: 8, 784>}, {transform_indices = @transform_10, window_bounds = array<i64: 8, 1>}]} {
    %c0 = arith.constant 0 : index
    %c0_0 = arith.constant 0 : index
    %0 = vector.load %arg3[%c0, %c0_0] : memref<8x160xf32, #tpu.memory_space<vmem>>, vector<8x160xf32>
    %1 = math.absf %0 : vector<8x160xf32>
    %c0_1 = arith.constant 0 : index
    %c0_2 = arith.constant 0 : index
    %2 = vector.load %arg1[%c0_1, %c0_2] : memref<160x10xf32, #tpu.memory_space<vmem>>, vector<160x10xf32>
    %cst = arith.constant dense<0.000000e+00> : vector<8x10xf32>
    %3 = tpu.matmul %1, %2, %cst {dimension_numbers = #tpu.dot_dimension_numbers<[1], [0], [0], [1], [0, 0, 1, 1], [], []>} : vector<8x160xf32>, vector<160x10xf32>, vector<8x10xf32> -> vector<8x10xf32>
    %4 = tpu.iota {dimensions = array<i32: 1>} : vector<8x10xi32>
    %cst_3 = arith.constant dense<0xFF800000> : vector<8xf32>
    %5 = vector.multi_reduction <maximumf>, %3, %cst_3 [1] : vector<8x10xf32> to vector<8xf32>
    %6 = vector.shape_cast %5 : vector<8xf32> to vector<8x1xf32>
    %7 = vector.broadcast %6 : vector<8x1xf32> to vector<8x10xf32>
    %8 = arith.cmpf oeq, %3, %7 : vector<8x10xf32>
    %c10_i32 = arith.constant 10 : i32
    %9 = vector.broadcast %c10_i32 : i32 to vector<8x10xi32>
    %10 = arith.select %8, %4, %9 : vector<8x10xi1>, vector<8x10xi32>
    %cst_4 = arith.constant dense<2147483647> : vector<8xi32>
    %11 = vector.multi_reduction <minsi>, %10, %cst_4 [1] : vector<8x10xi32> to vector<8xi32>
    %12 = vector.shape_cast %11 : vector<8xi32> to vector<8x1xi32>
    %c0_5 = arith.constant 0 : index
    %c0_6 = arith.constant 0 : index
    %13 = vector.load %arg11[%c0_5, %c0_6] : memref<8x1xi32, #tpu.memory_space<vmem>>, vector<8x1xi32>
    tpu.vector_store %arg11[%c0_5, %c0_6], %12 {strides = array<i32>} : memref<8x1xi32, #tpu.memory_space<vmem>>, vector<8x1xi32>,
    %c0_7 = arith.constant 0 : index
    %c0_8 = arith.constant 0 : index
    %14 = vector.load %arg2[%c0_7, %c0_8] : memref<1x160xi32, #tpu.memory_space<vmem>>, vector<1x160xi32>
    %15 = vector.broadcast %14 : vector<1x160xi32> to vector<8x160xi32>
    %16 = vector.broadcast %12 : vector<8x1xi32> to vector<8x160xi32>
    %17 = arith.cmpi eq, %15, %16 : vector<8x160xi32>
    %18 = arith.extui %17 : vector<8x160xi1> to vector<8x160xi32>
    %19 = arith.sitofp %18 : vector<8x160xi32> to vector<8x160xf32>
    %20 = arith.mulf %0, %19 : vector<8x160xf32>
    %21 = arith.truncf %20 : vector<8x160xf32> to vector<8x160xbf16>
    %c0_9 = arith.constant 0 : index
    %c0_10 = arith.constant 0 : index
    %22 = vector.load %arg4[%c0_9, %c0_10] : memref<160x512xbf16, #tpu.memory_space<vmem>>, vector<160x512xbf16>
    %cst_11 = arith.constant dense<0.000000e+00> : vector<8x512xf32>
    %23 = tpu.matmul %21, %22, %cst_11 {dimension_numbers = #tpu.dot_dimension_numbers<[1], [0], [0], [1], [0, 0, 1, 1], [], []>} : vector<8x160xbf16>, vector<160x512xbf16>, vector<8x512xf32> -> vector<8x512xf32>
    %24 = arith.truncf %23 : vector<8x512xf32> to vector<8x512xbf16>
    %c0_12 = arith.constant 0 : index
    %c0_13 = arith.constant 0 : index
    %25 = vector.load %arg5[%c0_12, %c0_13] : memref<1x512xbf16, #tpu.memory_space<vmem>>, vector<1x512xbf16>
    %26 = vector.broadcast %25 : vector<1x512xbf16> to vector<8x512xbf16>
    %27 = arith.addf %24, %26 : vector<8x512xbf16>
    %cst_14 = arith.constant 0.000000e+00 : bf16
    %28 = vector.broadcast %cst_14 : bf16 to vector<8x512xbf16>
    %29 = arith.maximumf %27, %28 : vector<8x512xbf16>
    %c0_15 = arith.constant 0 : index
    %c0_16 = arith.constant 0 : index
    %30 = vector.load %arg6[%c0_15, %c0_16] : memref<512x1024xbf16, #tpu.memory_space<vmem>>, vector<512x1024xbf16>
    %cst_17 = arith.constant dense<0.000000e+00> : vector<8x1024xf32>
    %31 = tpu.matmul %29, %30, %cst_17 {dimension_numbers = #tpu.dot_dimension_numbers<[1], [0], [0], [1], [0, 0, 1, 1], [], []>} : vector<8x512xbf16>, vector<512x1024xbf16>, vector<8x1024xf32> -> vector<8x1024xf32>
    %32 = arith.truncf %31 : vector<8x1024xf32> to vector<8x1024xbf16>
    %c0_18 = arith.constant 0 : index
    %c0_19 = arith.constant 0 : index
    %33 = vector.load %arg7[%c0_18, %c0_19] : memref<1x1024xbf16, #tpu.memory_space<vmem>>, vector<1x1024xbf16>
    %34 = vector.broadcast %33 : vector<1x1024xbf16> to vector<8x1024xbf16>
    %35 = arith.addf %32, %34 : vector<8x1024xbf16>
    %cst_20 = arith.constant 0.000000e+00 : bf16
    %36 = vector.broadcast %cst_20 : bf16 to vector<8x1024xbf16>
    %37 = arith.maximumf %35, %36 : vector<8x1024xbf16>
    %c0_21 = arith.constant 0 : index
    %c0_22 = arith.constant 0 : index
    %38 = vector.load %arg8[%c0_21, %c0_22] : memref<1024x784xbf16, #tpu.memory_space<vmem>>, vector<1024x784xbf16>
    %cst_23 = arith.constant dense<0.000000e+00> : vector<8x784xf32>
    %39 = tpu.matmul %37, %38, %cst_23 {dimension_numbers = #tpu.dot_dimension_numbers<[1], [0], [0], [1], [0, 0, 1, 1], [], []>} : vector<8x1024xbf16>, vector<1024x784xbf16>, vector<8x784xf32> -> vector<8x784xf32>
    %c0_24 = arith.constant 0 : index
    %c0_25 = arith.constant 0 : index
    %40 = vector.load %arg9[%c0_24, %c0_25] : memref<1x784xf32, #tpu.memory_space<vmem>>, vector<1x784xf32>
    %41 = vector.broadcast %40 : vector<1x784xf32> to vector<8x784xf32>
    %42 = arith.addf %39, %41 : vector<8x784xf32>
    %cst_26 = arith.constant 5.000000e-01 : f32
    %43 = vector.broadcast %cst_26 : f32 to vector<8x784xf32>
    %44 = arith.mulf %43, %42 : vector<8x784xf32>
    %45 = math.tanh %44 : vector<8x784xf32>
    %cst_27 = arith.constant 5.000000e-01 : f32
    %46 = vector.broadcast %cst_27 : f32 to vector<8x784xf32>
    %47 = arith.mulf %46, %45 : vector<8x784xf32>
    %cst_28 = arith.constant 5.000000e-01 : f32
    %48 = vector.broadcast %cst_28 : f32 to vector<8x784xf32>
    %49 = arith.addf %47, %48 : vector<8x784xf32>
    %c0_29 = arith.constant 0 : index
    %c0_30 = arith.constant 0 : index
    %50 = vector.load %arg10[%c0_29, %c0_30] : memref<8x784xf32, #tpu.memory_space<vmem>>, vector<8x784xf32>
    tpu.vector_store %arg10[%c0_29, %c0_30], %49 {strides = array<i32>} : memref<8x784xf32, #tpu.memory_space<vmem>>, vector<8x784xf32>,
    return
  }
  func.func @transform_0(%arg0: i32) -> (i32, i32) {
    %c0_i32 = arith.constant 0 : i32
    %c0_i32_0 = arith.constant 0 : i32
    %c0_i32_1 = arith.constant 0 : i32
    return %c0_i32, %c0_i32_0 : i32, i32
  }
  func.func @transform_1(%arg0: i32) -> (i32, i32) {
    %c0_i32 = arith.constant 0 : i32
    %c0_i32_0 = arith.constant 0 : i32
    %c0_i32_1 = arith.constant 0 : i32
    return %c0_i32, %c0_i32_0 : i32, i32
  }
  func.func @transform_2(%arg0: i32) -> (i32, i32) {
    %c0_i32 = arith.constant 0 : i32
    %c0_i32_0 = arith.constant 0 : i32
    return %arg0, %c0_i32 : i32, i32
  }
  func.func @transform_3(%arg0: i32) -> (i32, i32) {
    %c0_i32 = arith.constant 0 : i32
    %c0_i32_0 = arith.constant 0 : i32
    %c0_i32_1 = arith.constant 0 : i32
    return %c0_i32, %c0_i32_0 : i32, i32
  }
  func.func @transform_4(%arg0: i32) -> (i32, i32) {
    %c0_i32 = arith.constant 0 : i32
    %c0_i32_0 = arith.constant 0 : i32
    %c0_i32_1 = arith.constant 0 : i32
    return %c0_i32, %c0_i32_0 : i32, i32
  }
  func.func @transform_5(%arg0: i32) -> (i32, i32) {
    %c0_i32 = arith.constant 0 : i32
    %c0_i32_0 = arith.constant 0 : i32
    %c0_i32_1 = arith.constant 0 : i32
    return %c0_i32, %c0_i32_0 : i32, i32
  }
  func.func @transform_6(%arg0: i32) -> (i32, i32) {
    %c0_i32 = arith.constant 0 : i32
    %c0_i32_0 = arith.constant 0 : i32
    %c0_i32_1 = arith.constant 0 : i32
    return %c0_i32, %c0_i32_0 : i32, i32
  }
  func.func @transform_7(%arg0: i32) -> (i32, i32) {
    %c0_i32 = arith.constant 0 : i32
    %c0_i32_0 = arith.constant 0 : i32
    %c0_i32_1 = arith.constant 0 : i32
    return %c0_i32, %c0_i32_0 : i32, i32
  }
  func.func @transform_8(%arg0: i32) -> (i32, i32) {
    %c0_i32 = arith.constant 0 : i32
    %c0_i32_0 = arith.constant 0 : i32
    %c0_i32_1 = arith.constant 0 : i32
    return %c0_i32, %c0_i32_0 : i32, i32
  }
  func.func @transform_9(%arg0: i32) -> (i32, i32) {
    %c0_i32 = arith.constant 0 : i32
    %c0_i32_0 = arith.constant 0 : i32
    return %arg0, %c0_i32 : i32, i32
  }
  func.func @transform_10(%arg0: i32) -> (i32, i32) {
    %c0_i32 = arith.constant 0 : i32
    %c0_i32_0 = arith.constant 0 : i32
    return %arg0, %c0_i32 : i32, i32
  }
}

</mosaic_0001>

<bundles_post_ra>
// kernel: tpu_custom_call.1
= control target key start
LH: loop header
LB: loop body
LE: loop exit
PB: predicated region body
PF: predicated region fallthrough
CT: control target
= control target key end

     0   :  { %v7704_v1 = vmov 0.0   ;;  %vm60_vm0 = vcmask 261120   ;;  %s10333_s0 = inlined_call_operand.vmem [shape: f32[160,10], index: 0, kind: input, shape index: {}]   ;;  %s10334_s1 = inlined_call_operand.vmem [shape: s32[1,160], index: 1, kind: input, shape index: {}]   ;;  %s10335_s2 = inlined_call_operand.vmem [shape: f32[8,160], index: 2, kind: input, shape index: {}]   ;;  %s10336_s3 = inlined_call_operand.vmem [shape: bf16[160,512], index: 3, kind: input, shape index: {}]   ;;  %s10337_s4 = inlined_call_operand.vmem [shape: bf16[1,512], index: 4, kind: input, shape index: {}]   ;;  %s10338_s5 = inlined_call_operand.vmem [shape: bf16[512,1024], index: 5, kind: input, shape index: {}]   ;;  %s10339_s6 = inlined_call_operand.vmem [shape: bf16[1,1024], index: 6, kind: input, shape index: {}]   ;;  %s10340_s7 = inlined_call_operand.vmem [shape: bf16[1024,784], index: 7, kind: input, shape index: {}]   ;;  %s10341_s8 = inlined_call_operand.vmem [shape: f32[1,784], index: 8, kind: input, shape index: {}]   ;;  %s10342_s9 = inlined_call_operand.hbm [shape: f32[8,784], index: 9, kind: output, shape index: {0}]   ;;  %s10343_s10 = inlined_call_operand.vmem [shape: s32[8,1], index: 10, kind: output, shape index: {1}]  }
   0x1   :  { %v55_v0 = vld [vmem:[%s10333_s0 + $0x78] sm:$0xff]  ;;  %64 = vmatprep.subr.mxu0 %v7704_v1  ;;  %v54_v2 = vld [vmem:[%s10333_s0 + $0x70] sm:$0xff]  ;;  %v53_v3 = vld [vmem:[%s10333_s0 + $0x68] sm:$0xff] }
   0x2   :  { %65 = vmatpush1.msra.mxu0 %v55_v0  ;;  %v52_v4 = vld [vmem:[%s10333_s0 + $0x60] sm:$0xff]  ;;  %v51_v5 = vld [vmem:[%s10333_s0 + $0x58] sm:$0xff]  ;;  %v37_v6 = vld [vmem:[%s10335_s2 + $0x8] sm:$0xff] }
   0x3   :  { %66 = vmatprep.subr.mxu0 %v7704_v1  ;;  %v50_v7 = vld [vmem:[%s10333_s0 + $0x50] sm:$0xff]  ;;  %v39_v8 = vand.u32 2147483647, %v37_v6  ;;  %v49_v9 = vld [vmem:[%s10333_s0 + $0x48] sm:$0xff]  ;;  %v48_v10 = vld [vmem:[%s10333_s0 + $0x40] sm:$0xff] }
   0x4   :  { %67 = vmatpush1.msra.mxu0 %v54_v2  ;;  %v47_v11 = vld [vmem:[%s10333_s0 + $0x38] sm:$0xff]  ;;  %v46_v12 = vld [vmem:[%s10333_s0 + $0x30] sm:$0xff]  ;;  %v45_v13 = vld [vmem:[%s10333_s0 + $0x28] sm:$0xff] }
   0x5   :  { %68 = vmatprep.subr.mxu0 %v7704_v1  ;;  %6123 = vmatprep.mubr.msk.f32.mxu0 %vm60_vm0, %v39_v8  ;;  %v44_v14 = vld [vmem:[%s10333_s0 + $0x20] sm:$0xff]  ;;  %v43_v15 = vld [vmem:[%s10333_s0 + $0x18] sm:$0xff]  ;;  %v42_v16 = vld [vmem:[%s10333_s0 + $0x10] sm:$0xff] }
   0x6   :  { %69 = vmatpush1.msra.mxu0 %v53_v3  ;;  %v41_v17 = vld [vmem:[%s10333_s0 + $0x8] sm:$0xff]  ;;  %v40_v18 = vld [vmem:[%s10333_s0] sm:$0xff]  ;;  %v59_v19 = vld [vmem:[%s10333_s0 + $0x98] sm:$0xff] }
   0x7   :  { %70 = vmatprep.subr.mxu0 %v7704_v1  ;;  %v58_v20 = vld [vmem:[%s10333_s0 + $0x90] sm:$0xff]  ;;  %v36_v21 = vld [vmem:[%s10335_s2] sm:$0xff]  ;;  %v57_v22 = vld [vmem:[%s10333_s0 + $0x88] sm:$0xff] }
   0x8   :  { %71 = vmatpush1.msra.mxu0 %v52_v4  ;;  %v56_v23 = vld [vmem:[%s10333_s0 + $0x80] sm:$0xff]  ;;  %v38_v24 = vand.u32 2147483647, %v36_v21 }
   0x9   :  { %72 = vmatprep.subr.mxu0 %v7704_v1 }
   0xa   :  { %73 = vmatpush1.msra.mxu0 %v51_v5 }
   0xb   :  { %74 = vmatprep.subr.mxu0 %v7704_v1 }
   0xc   :  { %75 = vmatpush1.msra.mxu0 %v50_v7 }
   0xd   :  { %76 = vmatprep.subr.mxu0 %v7704_v1 }
   0xe   :  { %77 = vmatpush1.msra.mxu0 %v49_v9 }
   0xf   :  { %78 = vmatprep.subr.mxu0 %v7704_v1 }
  0x10   :  { %79 = vmatpush1.msra.mxu0 %v48_v10 }
  0x11   :  { %80 = vmatprep.subr.mxu0 %v7704_v1 }
  0x12   :  { %81 = vmatpush1.msra.mxu0 %v47_v11 }
  0x13   :  { %82 = vmatprep.subr.mxu0 %v7704_v1 }
  0x14   :  { %83 = vmatpush1.msra.mxu0 %v46_v12 }
  0x15   :  { %84 = vmatprep.subr.mxu0 %v7704_v1 }
  0x16   :  { %85 = vmatpush1.msra.mxu0 %v45_v13 }
  0x17   :  { %86 = vmatprep.subr.mxu0 %v7704_v1 }
  0x18   :  { %87 = vmatpush1.msra.mxu0 %v44_v14 }
  0x19   :  { %88 = vmatprep.subr.mxu0 %v7704_v1 }
  0x1a   :  { %89 = vmatpush1.msra.mxu0 %v43_v15 }
  0x1b   :  { %90 = vmatprep.subr.mxu0 %v7704_v1 }
  0x1c   :  { %91 = vmatpush1.msra.mxu0 %v42_v16 }
  0x1d   :  { %92 = vmatprep.subr.mxu0 %v7704_v1 }
  0x1e   :  { %93 = vmatpush1.msra.mxu0 %v41_v17 }
  0x1f   :  { %94 = vmatprep.subr.mxu0 %v7704_v1 }
  0x20   :  { %95 = vmatpush1.msra.mxu0 %v40_v18 }
  0x21   :  { %120 = vmatprep.subr.mxu0 %v7704_v1 }
  0x22   :  { %121 = vmatpush2.msra.mxu0 %v59_v19 }
  0x23   :  { %122 = vmatprep.subr.mxu0 %v7704_v1 }
  0x24   :  { %123 = vmatpush2.msra.mxu0 %v58_v20 }
  0x25   :  { %124 = vmatprep.subr.mxu0 %v7704_v1 }
  0x26   :  { %125 = vmatpush2.msra.mxu0 %v57_v22 }
  0x27   :  { %126 = vmatprep.subr.mxu0 %v7704_v1 }
  0x28   :  { %127 = vmatpush2.msra.mxu0 %v56_v23 }
  0x29   :  { %129 = vmatmul.mubr.f32.vlgmr.msra.gmra.mxu0 %v38_v24 }
  0x2a   :  { %16 = vsyncpa [#allocation3], 0  ;;  %vm136_vm1 = vcmask 80896   ;;  %v134_v28 = vlaneseq  ;;  %v6965_v35 = vld [vmem:[%s10336_s3 + $0xe4] ss:$16 sps:$4 sm:$0xff]   ;;  %vm157_vm4 = vcmask 7168  }
  0x2b   :  { %v6967_v36 = vld [vmem:[%s10336_s3 + $0xe8] ss:$16 sps:$4 sm:$0xff]   ;;  %v6969_v37 = vld [vmem:[%s10336_s3 + $0xec] ss:$16 sps:$4 sm:$0xff]   ;;  %v6970_v38 = vld [vmem:[%s10336_s3 + $0xe0] ss:$16 sps:$4 sm:$0xff]   ;;  %421 = vmatprep.subr.bf16.mxu1 %v6965_v35 }
  0x2c   :  { %v135_v29 = vand.u32 127, %v134_v28  ;;  %v6971_v39 = vld [vmem:[%s10336_s3 + $0xc4] ss:$16 sps:$4 sm:$0xff]   ;;  %462 = vmatprep.subr.bf16.mxu0 %v6969_v37  ;;  %v6975_v40 = vld [vmem:[%s10336_s3 + $0xcc] ss:$16 sps:$4 sm:$0xff]   ;;  %422 = vmatpush1.bf16.msra.mxu1 %v6970_v38  ;;  %vm6103_vm7 = vcmask 130048  }
  0x2d   :  { %463 = vmatpush1.bf16.msra.mxu0 %v6967_v36  ;;  %v6973_v41 = vld [vmem:[%s10336_s3 + $0xc8] ss:$16 sps:$4 sm:$0xff]   ;;  %v6976_v42 = vld [vmem:[%s10336_s3 + $0xc0] ss:$16 sps:$4 sm:$0xff]   ;;  %423 = vmatprep.subr.bf16.mxu1 %v6971_v39  ;;  %v6977_v43 = vld [vmem:[%s10336_s3 + $0xa4] ss:$16 sps:$4 sm:$0xff]  }
  0x2e   :  { %464 = vmatprep.subr.bf16.mxu0 %v6975_v40  ;;  %v6981_v44 = vld [vmem:[%s10336_s3 + $0xac] ss:$16 sps:$4 sm:$0xff]   ;;  %v6979_v45 = vld [vmem:[%s10336_s3 + $0xa8] ss:$16 sps:$4 sm:$0xff]   ;;  %v6982_v46 = vld [vmem:[%s10336_s3 + $0xa0] ss:$16 sps:$4 sm:$0xff]  }
  0x2f   :  { %v6983_v47 = vld [vmem:[%s10336_s3 + $0x84] ss:$16 sps:$4 sm:$0xff]   ;;  %v6987_v48 = vld [vmem:[%s10336_s3 + $0x8c] ss:$16 sps:$4 sm:$0xff]   ;;  %v6985_v49 = vld [vmem:[%s10336_s3 + $0x88] ss:$16 sps:$4 sm:$0xff]  }
  0x30   :  { %424 = vmatpush1.bf16.msra.mxu1 %v6976_v42  ;;  %v6988_v50 = vld [vmem:[%s10336_s3 + $0x80] ss:$16 sps:$4 sm:$0xff]   ;;  %v6989_v51 = vld [vmem:[%s10336_s3 + $0x64] ss:$16 sps:$4 sm:$0xff]   ;;  %v6993_v52 = vld [vmem:[%s10336_s3 + $0x6c] ss:$16 sps:$4 sm:$0xff]  }
  0x31   :  { %465 = vmatpush1.bf16.msra.mxu0 %v6973_v41  ;;  %425 = vmatprep.subr.bf16.mxu1 %v6977_v43  ;;  %v6991_v53 = vld [vmem:[%s10336_s3 + $0x68] ss:$16 sps:$4 sm:$0xff]   ;;  %v6994_v54 = vld [vmem:[%s10336_s3 + $0x60] ss:$16 sps:$4 sm:$0xff]   ;;  %v6995_v55 = vld [vmem:[%s10336_s3 + $0x44] ss:$16 sps:$4 sm:$0xff]  }
  0x32   :  { %466 = vmatprep.subr.bf16.mxu0 %v6981_v44  ;;  %v6999_v56 = vld [vmem:[%s10336_s3 + $0x4c] ss:$16 sps:$4 sm:$0xff]   ;;  %v6997_v57 = vld [vmem:[%s10336_s3 + $0x48] ss:$16 sps:$4 sm:$0xff]   ;;  %v7000_v58 = vld [vmem:[%s10336_s3 + $0x40] ss:$16 sps:$4 sm:$0xff]  }
  0x33   :  { %v7001_v59 = vld [vmem:[%s10336_s3 + $0x24] ss:$16 sps:$4 sm:$0xff]   ;;  %v7005_v60 = vld [vmem:[%s10336_s3 + $0x2c] ss:$16 sps:$4 sm:$0xff]   ;;  %v7003_v61 = vld [vmem:[%s10336_s3 + $0x28] ss:$16 sps:$4 sm:$0xff]  }
  0x34   :  { %426 = vmatpush1.bf16.msra.mxu1 %v6982_v46  ;;  %v7006_v62 = vld [vmem:[%s10336_s3 + $0x20] ss:$16 sps:$4 sm:$0xff]   ;;  %v7007_v63 = vld [vmem:[%s10336_s3 + $0x4] ss:$16 sps:$4 sm:$0xff]   ;;  %v7011_v0 = vld [vmem:[%s10336_s3 + $0xc] ss:$16 sps:$4 sm:$0xff]  }
  0x35   :  { %467 = vmatpush1.bf16.msra.mxu0 %v6979_v45  ;;  %427 = vmatprep.subr.bf16.mxu1 %v6983_v47  ;;  %v7009_v2 = vld [vmem:[%s10336_s3 + $0x8] ss:$16 sps:$4 sm:$0xff]   ;;  %v178_v7 = vld [vmem:[%s10336_s3] sm:$0xff]  ;;  %v180_v8 = vld [vmem:[%s10336_s3 + $0x10] sm:$0xff] }
  0x36   :  { %468 = vmatprep.subr.bf16.mxu0 %v6987_v48  ;;  %v6126_v9 = vcombine.low %v178_v7, %v180_v8  ;;  %v7012_v10 = vld [vmem:[%s10336_s3 + $0x124] ss:$16 sps:$4 sm:$0xff]   ;;  %v7016_v11 = vld [vmem:[%s10336_s3 + $0x12c] ss:$16 sps:$4 sm:$0xff]   ;;  %v7014_v12 = vld [vmem:[%s10336_s3 + $0x128] ss:$16 sps:$4 sm:$0xff]  }
  0x37   :  { %v7017_v13 = vld [vmem:[%s10336_s3 + $0x120] ss:$16 sps:$4 sm:$0xff]   ;;  %v7018_v14 = vld [vmem:[%s10336_s3 + $0x104] ss:$16 sps:$4 sm:$0xff]   ;;  %v7020_v15 = vld [vmem:[%s10336_s3 + $0x108] ss:$16 sps:$4 sm:$0xff]  }
  0x38   :  { %428 = vmatpush1.bf16.msra.mxu1 %v6988_v50  ;;  %v7022_v16 = vld [vmem:[%s10336_s3 + $0x10c] ss:$16 sps:$4 sm:$0xff]   ;;  %v7023_v17 = vld [vmem:[%s10336_s3 + $0x100] ss:$16 sps:$4 sm:$0xff]  }
  0x39   :  { %469 = vmatpush1.bf16.msra.mxu0 %v6985_v49  ;;  %429 = vmatprep.subr.bf16.mxu1 %v6989_v51  ;;  %v625_v18 = vld [vmem:[%s10338_s5 + $0x1c0] sm:$0xff]  ;;  %v7679_v40 = vld [vmem:[%s10335_s2 + $0x8] sm:$0xff] }
  0x3a   :  { %470 = vmatprep.subr.bf16.mxu0 %v6993_v52  ;;  %v629_v19 = vld [vmem:[%s10338_s5 + $0x1e0] sm:$0xff] }
  0x3b   :  { %v753_v20 = vld [vmem:[%s10338_s5 + $0x5c0] sm:$0xff]  ;;  %v6225_v21 = vcombine.low %v625_v18, %v629_v19  ;;  %v6226_v22 = vcombine.high %v625_v18, %v629_v19 }
  0x3c   :  { %430 = vmatpush1.bf16.msra.mxu1 %v6994_v54  ;;  %v757_v23 = vld [vmem:[%s10338_s5 + $0x5e0] sm:$0xff] }
  0x3d   :  { %471 = vmatpush1.bf16.msra.mxu0 %v6991_v53  ;;  %431 = vmatprep.subr.bf16.mxu1 %v6995_v55  ;;  %v6353_v24 = vcombine.low %v753_v20, %v757_v23  ;;  %v617_v39 = vld [vmem:[%s10338_s5 + $0x180] sm:$0xff] }
  0x3e   :  { %472 = vmatprep.subr.bf16.mxu0 %v6999_v56  ;;  %v7680_v42 = vld [vmem:[%s10335_s2] sm:$0xff] }
  0x3f   :  { %v621_v44 = vld [vmem:[%s10338_s5 + $0x1a0] sm:$0xff] }
  0x40   :  { %432 = vmatpush1.bf16.msra.mxu1 %v7000_v58  ;;  %v749_v45 = vld [vmem:[%s10338_s5 + $0x5a0] sm:$0xff]  ;;  %v6218_v48 = vcombine.high %v617_v39, %v621_v44  ;;  %v6217_v54 = vcombine.low %v617_v39, %v621_v44 }
  0x41   :  { %473 = vmatpush1.bf16.msra.mxu0 %v6997_v57  ;;  %433 = vmatprep.subr.bf16.mxu1 %v7001_v59  ;;  %v609_v50 = vld [vmem:[%s10338_s5 + $0x140] sm:$0xff] }
  0x42   :  { %474 = vmatprep.subr.bf16.mxu0 %v7005_v60  ;;  %v613_v51 = vld [vmem:[%s10338_s5 + $0x160] sm:$0xff] }
  0x43   :  { %v737_v52 = vld [vmem:[%s10338_s5 + $0x540] sm:$0xff]  ;;  %v6210_v56 = vcombine.high %v609_v50, %v613_v51 }
  0x44   :  { %434 = vmatpush1.bf16.msra.mxu1 %v7006_v62  ;;  %v741_v53 = vld [vmem:[%s10338_s5 + $0x560] sm:$0xff]  ;;  %v6209_v62 = vcombine.low %v609_v50, %v613_v51 }
  0x45   :  { %475 = vmatpush1.bf16.msra.mxu0 %v7003_v61  ;;  %435 = vmatprep.subr.bf16.mxu1 %v7007_v63  ;;  %v6338_v57 = vcombine.high %v737_v52, %v741_v53  ;;  %v601_v58 = vld [vmem:[%s10338_s5 + $0x100] sm:$0xff]  ;;  %v6337_v63 = vcombine.low %v737_v52, %v741_v53 }
  0x46   :  { %476 = vmatprep.subr.bf16.mxu0 %v7011_v0  ;;  %v605_v59 = vld [vmem:[%s10338_s5 + $0x120] sm:$0xff] }
  0x47   :  { %v729_v60 = vld [vmem:[%s10338_s5 + $0x500] sm:$0xff]  ;;  %v6202_v0 = vcombine.high %v601_v58, %v605_v59  ;;  %v6201_v7 = vcombine.low %v601_v58, %v605_v59 }
  0x48   :  { %436 = vmatpush1.bf16.msra.mxu1 %v6126_v9  ;;  %v733_v61 = vld [vmem:[%s10338_s5 + $0x520] sm:$0xff] }
  0x49   :  { %477 = vmatpush1.bf16.msra.mxu0 %v7009_v2  ;;  %449 = vmatprep.subr.bf16.mxu1 %v7012_v10  ;;  %v6330_v2 = vcombine.high %v729_v60, %v733_v61  ;;  %v6329_v8 = vcombine.low %v729_v60, %v733_v61  ;;  %v577_v19 = vld [vmem:[%s10338_s5 + $0x40] sm:$0xff] }
  0x4a   :  { %490 = vmatprep.subr.bf16.mxu0 %v7016_v11  ;;  %v585_v11 = vld [vmem:[%s10338_s5 + $0x80] sm:$0xff] }
  0x4b   :  { %v693_v39 = vld [vmem:[%s10338_s5 + $0x3e0] sm:$0xff] }
  0x4c   :  { %450 = vmatpush2.bf16.msra.mxu1 %v7017_v13  ;;  %v713_v13 = vld [vmem:[%s10338_s5 + $0x480] sm:$0xff] }
  0x4d   :  { %491 = vmatpush2.bf16.msra.mxu0 %v7014_v12  ;;  %451 = vmatprep.subr.bf16.mxu1 %v7018_v14  ;;  %v589_v12 = vld [vmem:[%s10338_s5 + $0xa0] sm:$0xff] }
  0x4e   :  { %492 = vmatprep.subr.bf16.mxu0 %v7022_v16  ;;  %v717_v14 = vld [vmem:[%s10338_s5 + $0x4a0] sm:$0xff] }
  0x4f   :  { %v6314_v18 = vcombine.high %v713_v13, %v717_v14  ;;  %v673_v53 = vld [vmem:[%s10338_s5 + $0x340] sm:$0xff] }
  0x50   :  { %452 = vmatpush2.bf16.msra.mxu1 %v7023_v17  ;;  %v6186_v17 = vcombine.high %v585_v11, %v589_v12  ;;  %v665_v61 = vld [vmem:[%s10338_s5 + $0x300] sm:$0xff] }
  0x51   :  { %493 = vmatpush2.bf16.msra.mxu0 %v7020_v15  ;;  %2105 = vmatprep.subr.bf16.mxu1 %v6226_v22  ;;  %v709_v22 = vld [vmem:[%s10338_s5 + $0x460] sm:$0xff] }
  0xe9   :  { %v130_v25 = vpop.f32.mrf.mxu0 }
  0xea   :  { %v137_v26 = vsel %vm136_vm1, %v130_v25, -inf }
  0xeb   :  { %138 = vmax.xlane.f32.xlu0 %v137_v26  ;;  %v132_v27 = vpop.f32.mrf.mxu0  ;;  %v7995_v26 = vshrl.u32 %v134_v28, 7 }
  0xed   :  { %v7998_v27 = vsub.s32 0, %v7995_v26 }
 0x174   :  { %v139_v30 = vpop.xlane.xlu0 %138 }
 0x175   :  { %vm140_vm2 = vcmp.eq.f32.partialorder %v130_v25, %v139_v30  ;;  %v6354_v25 = vcombine.high %v753_v20, %v757_v23  ;;  %v166_v30 = vsub.s32 1, %v7995_v26  ;;  %v581_v20 = vld [vmem:[%s10338_s5 + $0x60] sm:$0xff]  ;;  %v6185_v23 = vcombine.low %v585_v11, %v589_v12 }
 0x176   :  { %v141_v31 = vsel %vm140_vm2, %v135_v29, 10 }
 0x177   :  { %v7851_v32 = vsel %vm136_vm1, %v141_v31, 2147483647  ;;  %2146 = vmatprep.subr.bf16.mxu0 %v6354_v25  ;;  %v159_v31 = vld [vmem:[%s10334_s1] sm:$0x3]  ;;  %v6178_v25 = vcombine.high %v577_v19, %v581_v20 }
 0x178   :  { %v144_v33 = vshra.s32 %v7851_v32, 16  ;;  %v143_v3 = vand.u32 65535, %v7851_v32  ;;  %v167_v36 = vrot.slane %v159_v31, %v166_v30 }
 0x17a   :  { %v7854_v34 = vcvt.s32.f32 %v144_v33  ;;  %v145_v5 = vcvt.s32.f32 %v143_v3  ;;  %v593_v3 = vld [vmem:[%s10338_s5 + $0xc0] sm:$0xff] }
 0x17c   :  { %147 = vmin.xlane.f32.xlu0 %v7854_v34 }
 0x205   :  { %v148_v4 = vpop.xlane.xlu0 %147 }
 0x206   :  { %vm149_vm3 = vcmp.eq.f32.partialorder %v7854_v34, %v148_v4  ;;  %v154_v29 = vcvt.f32.s32 %v148_v4  ;;  %v163_v34 = vrot.slane %v159_v31, %v7998_v27  ;;  %v597_v4 = vld [vmem:[%s10338_s5 + $0xe0] sm:$0xff] }
 0x207   :  { %v150_v6 = vsel %vm149_vm3, %v145_v5, inf  ;;  %v721_v5 = vld [vmem:[%s10338_s5 + $0x4c0] sm:$0xff]  ;;  %v6194_v9 = vcombine.high %v593_v3, %v597_v4  ;;  %v6193_v15 = vcombine.low %v593_v3, %v597_v4 }
 0x208   :  { %151 = vmin.xlane.f32.xlu1 %v150_v6  ;;  %v155_v33 = vshll.u32 %v154_v29, 16  ;;  %v725_v6 = vld [vmem:[%s10338_s5 + $0x4e0] sm:$0xff] }
 0x209   :  { %v6322_v10 = vcombine.high %v721_v5, %v725_v6  ;;  %v6321_v16 = vcombine.low %v721_v5, %v725_v6  ;;  %v569_v31 = vld [vmem:[%s10338_s5] sm:$0xff] }
 0x20a   :  { %v657_v6 = vld [vmem:[%s10338_s5 + $0x2c0] sm:$0xff] }
 0x291   :  { %v152_v32 = vpop.xlane.xlu1 %151 }
 0x292   :  { %v153_v35 = vcvt.f32.s32 %v152_v32  ;;  %v573_v32 = vld [vmem:[%s10338_s5 + $0x20] sm:$0xff] }
 0x294   :  { %v156_v28 = vadd.s32 %v155_v33, %v153_v35  ;;  %v697_v33 = vld [vmem:[%s10338_s5 + $0x400] sm:$0xff]  ;;  %v6177_v35 = vcombine.low %v577_v19, %v581_v20 }
 0x296   :  { %158 = vst.msk [vmem:[%s10343_s10] sm:$0xff] %vm157_vm4, %v156_v28  ;;  %vm168_vm5 = vcmp.eq.s32.totalorder %v163_v34, %v156_v28  ;;  %vm169_vm6 = vcmp.eq.s32.totalorder %v167_v36, %v156_v28  ;;  %v701_v34 = vld [vmem:[%s10338_s5 + $0x420] sm:$0xff]  ;;  %v6170_v28 = vcombine.high %v569_v31, %v573_v32 }
 0x297   :  { %v6125_v37 = vsel %vm169_vm6, 1.0, %v7704_v1  ;;  %v6124_v38 = vsel %vm168_vm5, 1.0, %v7704_v1  ;;  %v745_v1 = vld [vmem:[%s10338_s5 + $0x580] sm:$0xff] }
 0x298   :  { %v175_v41 = vmul.f32 %v7679_v40, %v6125_v37  ;;  %v174_v43 = vmul.f32 %v7680_v42, %v6124_v38  ;;  %v6346_v49 = vcombine.high %v745_v1, %v749_v45  ;;  %v6345_v55 = vcombine.low %v745_v1, %v749_v45  ;;  %v689_v38 = vld [vmem:[%s10338_s5 + $0x3c0] sm:$0xff] }
 0x299   :  { %v6298_v37 = vcombine.high %v697_v33, %v701_v34  ;;  %v817_v40 = vld [vmem:[%s10338_s5 + $0x7c0] sm:$0xff]  ;;  %v6169_v42 = vcombine.low %v569_v31, %v573_v32  ;;  %v6290_v44 = vcombine.high %v689_v38, %v693_v39 }
 0x29a   :  { %v177_v46 = vpack.c.bf16 %v175_v41, %v175_v41  ;;  %v176_v47 = vpack.c.bf16 %v174_v43, %v174_v43  ;;  %v821_v41 = vld [vmem:[%s10338_s5 + $0x7e0] sm:$0xff]  ;;  %v6297_v43 = vcombine.low %v697_v33, %v701_v34 }
 0x29b   :  { %v6418_v1 = vcombine.high %v817_v40, %v821_v41  ;;  %v681_v45 = vld [vmem:[%s10338_s5 + $0x380] sm:$0xff]  ;;  %v6417_v50 = vcombine.low %v817_v40, %v821_v41 }
 0x29c   :  { %6166 = vmatprep.mubr.msk.bf16.mxu1 %vm60_vm0, %v177_v46  ;;  %6167 = vmatprep.mubr.msk.bf16.mxu0 %vm60_vm0, %v177_v46  ;;  %v685_v46 = vld [vmem:[%s10338_s5 + $0x3a0] sm:$0xff] }
 0x29d   :  { %454 = vmatmul.mubr.bf16.vlgmr.msra.gmra.mxu1 %v176_v47  ;;  %495 = vmatmul.mubr.bf16.vlgmr.msra.gmra.mxu0 %v176_v47  ;;  %v809_v47 = vld [vmem:[%s10338_s5 + $0x780] sm:$0xff]  ;;  %v6282_v51 = vcombine.high %v681_v45, %v685_v46 }
 0x29e   :  { %2106 = vmatpush1.bf16.msra.mxu1 %v6225_v21  ;;  %2147 = vmatpush1.bf16.msra.mxu0 %v6353_v24  ;;  %v705_v21 = vld [vmem:[%s10338_s5 + $0x440] sm:$0xff]  ;;  %v6313_v24 = vcombine.low %v713_v13, %v717_v14 }
 0x29f   :  { %2107 = vmatprep.subr.bf16.mxu1 %v6218_v48  ;;  %2148 = vmatprep.subr.bf16.mxu0 %v6346_v49  ;;  %v6306_v29 = vcombine.high %v705_v21, %v709_v22  ;;  %v6305_v36 = vcombine.low %v705_v21, %v709_v22  ;;  %v813_v48 = vld [vmem:[%s10338_s5 + $0x7a0] sm:$0xff]  ;;  %v6289_v49 = vcombine.low %v689_v38, %v693_v39 }
 0x2a0   :  { %v6410_v52 = vcombine.high %v809_v47, %v813_v48  ;;  %v6409_v58 = vcombine.low %v809_v47, %v813_v48  ;;  %v649_v14 = vld [vmem:[%s10338_s5 + $0x280] sm:$0xff] }
 0x2a1   :  { %v773_v32 = vld [vmem:[%s10338_s5 + $0x660] sm:$0xff] }
 0x2a2   :  { %2108 = vmatpush1.bf16.msra.mxu1 %v6217_v54  ;;  %2149 = vmatpush1.bf16.msra.mxu0 %v6345_v55  ;;  %v677_v54 = vld [vmem:[%s10338_s5 + $0x360] sm:$0xff] }
 0x2a3   :  { %2109 = vmatprep.subr.bf16.mxu1 %v6210_v56  ;;  %2150 = vmatprep.subr.bf16.mxu0 %v6338_v57  ;;  %v801_v55 = vld [vmem:[%s10338_s5 + $0x740] sm:$0xff]  ;;  %v6281_v57 = vcombine.low %v681_v45, %v685_v46  ;;  %v6274_v59 = vcombine.high %v673_v53, %v677_v54  ;;  %v758_v46 = vld [vmem:[%s10338_s5 + $0x5e8] sm:$0xff] }
 0x2a4   :  { %v805_v56 = vld [vmem:[%s10338_s5 + $0x760] sm:$0xff] }
 0x2a5   :  { %v6402_v60 = vcombine.high %v801_v55, %v805_v56  ;;  %v6401_v3 = vcombine.low %v801_v55, %v805_v56  ;;  %v765_v39 = vld [vmem:[%s10338_s5 + $0x620] sm:$0xff] }
 0x2a6   :  { %2110 = vmatpush1.bf16.msra.mxu1 %v6209_v62  ;;  %2151 = vmatpush1.bf16.msra.mxu0 %v6337_v63  ;;  %v669_v62 = vld [vmem:[%s10338_s5 + $0x320] sm:$0xff] }
 0x2a7   :  { %2111 = vmatprep.subr.bf16.mxu1 %v6202_v0  ;;  %2152 = vmatprep.subr.bf16.mxu0 %v6330_v2  ;;  %v793_v63 = vld [vmem:[%s10338_s5 + $0x700] sm:$0xff]  ;;  %v6273_v2 = vcombine.low %v673_v53, %v677_v54  ;;  %v6266_v4 = vcombine.high %v665_v61, %v669_v62 }
 0x2a8   :  { %v797_v0 = vld [vmem:[%s10338_s5 + $0x720] sm:$0xff] }
 0x2a9   :  { %v6394_v5 = vcombine.high %v793_v63, %v797_v0  ;;  %v6393_v11 = vcombine.low %v793_v63, %v797_v0  ;;  %v6168_v53 = vld.sshfl [vmem:[%s10337_s4] sm:$0x33 pattern:$0x75316420] }
 0x2aa   :  { %2112 = vmatpush1.bf16.msra.mxu1 %v6201_v7  ;;  %2153 = vmatpush1.bf16.msra.mxu0 %v6329_v8  ;;  %v661_v7 = vld [vmem:[%s10338_s5 + $0x2e0] sm:$0xff]  ;;  %v516_v55 = vcombine.high %v6168_v53, %v6168_v53 }
 0x2ab   :  { %2113 = vmatprep.subr.bf16.mxu1 %v6194_v9  ;;  %2154 = vmatprep.subr.bf16.mxu0 %v6322_v10  ;;  %v785_v8 = vld [vmem:[%s10338_s5 + $0x6c0] sm:$0xff]  ;;  %v6265_v10 = vcombine.low %v665_v61, %v669_v62  ;;  %v6258_v12 = vcombine.high %v657_v6, %v661_v7 }
 0x2ac   :  { %v789_v9 = vld [vmem:[%s10338_s5 + $0x6e0] sm:$0xff] }
 0x2ad   :  { %v6386_v13 = vcombine.high %v785_v8, %v789_v9  ;;  %v6385_v19 = vcombine.low %v785_v8, %v789_v9 }
 0x2ae   :  { %2114 = vmatpush1.bf16.msra.mxu1 %v6193_v15  ;;  %2155 = vmatpush1.bf16.msra.mxu0 %v6321_v16  ;;  %v653_v15 = vld [vmem:[%s10338_s5 + $0x2a0] sm:$0xff] }
 0x2af   :  { %2115 = vmatprep.subr.bf16.mxu1 %v6186_v17  ;;  %2156 = vmatprep.subr.bf16.mxu0 %v6314_v18  ;;  %v777_v16 = vld [vmem:[%s10338_s5 + $0x680] sm:$0xff]  ;;  %v6257_v18 = vcombine.low %v657_v6, %v661_v7  ;;  %v6250_v20 = vcombine.high %v649_v14, %v653_v15  ;;  %v6249_v22 = vcombine.low %v649_v14, %v653_v15 }
 0x2b0   :  { %v781_v17 = vld [vmem:[%s10338_s5 + $0x6a0] sm:$0xff] }
 0x2b1   :  { %v6378_v21 = vcombine.high %v777_v16, %v781_v17 }
 0x2b2   :  { %2116 = vmatpush1.bf16.msra.mxu1 %v6185_v23  ;;  %2157 = vmatpush1.bf16.msra.mxu0 %v6313_v24  ;;  %v6377_v23 = vcombine.low %v777_v16, %v781_v17  ;;  %v641_v24 = vld [vmem:[%s10338_s5 + $0x240] sm:$0xff] }
 0x2b3   :  { %2117 = vmatprep.subr.bf16.mxu1 %v6178_v25  ;;  %2158 = vmatprep.subr.bf16.mxu0 %v6306_v29  ;;  %v645_v25 = vld [vmem:[%s10338_s5 + $0x260] sm:$0xff] }
 0x2b4   :  { %v769_v29 = vld [vmem:[%s10338_s5 + $0x640] sm:$0xff]  ;;  %v6242_v31 = vcombine.high %v641_v24, %v645_v25  ;;  %v6241_v33 = vcombine.low %v641_v24, %v645_v25  ;;  %v750_v24 = vld [vmem:[%s10338_s5 + $0x5a8] sm:$0xff]  ;;  %v7706_v25 = vmov 0  }
 0x2b5   :  { %v6369_v34 = vcombine.low %v769_v29, %v773_v32 }
 0x2b6   :  { %2118 = vmatpush1.bf16.msra.mxu1 %v6177_v35  ;;  %2159 = vmatpush1.bf16.msra.mxu0 %v6305_v36  ;;  %v6370_v35 = vcombine.high %v769_v29, %v773_v32  ;;  %v633_v36 = vld [vmem:[%s10338_s5 + $0x200] sm:$0xff] }
 0x2b7   :  { %2119 = vmatprep.subr.bf16.mxu1 %v6170_v28  ;;  %2160 = vmatprep.subr.bf16.mxu0 %v6298_v37  ;;  %v637_v28 = vld [vmem:[%s10338_s5 + $0x220] sm:$0xff] }
 0x2b8   :  { %v761_v37 = vld [vmem:[%s10338_s5 + $0x600] sm:$0xff]  ;;  %v6234_v38 = vcombine.high %v633_v36, %v637_v28  ;;  %v6233_v40 = vcombine.low %v633_v36, %v637_v28  ;;  %v614_v28 = vld [vmem:[%s10338_s5 + $0x168] sm:$0xff] }
 0x2b9   :  { %v6361_v41 = vcombine.low %v761_v37, %v765_v39 }
 0x2ba   :  { %2120 = vmatpush1.bf16.msra.mxu1 %v6169_v42  ;;  %2161 = vmatpush1.bf16.msra.mxu0 %v6297_v43  ;;  %v6362_v42 = vcombine.high %v761_v37, %v765_v39  ;;  %v8203_v43 = vld [vmem:[%s10338_s5 + $0x1c8] sm:$0xff] }
 0x2bb   :  { %2121 = vmatprep.subr.bf16.mxu1 %v6290_v44  ;;  %2162 = vmatprep.subr.bf16.mxu0 %v6418_v1  ;;  %v8208_v44 = vld [vmem:[%s10338_s5 + $0x1e8] sm:$0xff] }
 0x2bc   :  { %v8213_v1 = vld [vmem:[%s10338_s5 + $0x5c8] sm:$0xff]  ;;  %v6228_v45 = vcombine.high %v8203_v43, %v8208_v44  ;;  %v6227_v47 = vcombine.low %v8203_v43, %v8208_v44 }
 0x2bd   :  { %v6355_v48 = vcombine.low %v8213_v1, %v758_v46  ;;  %v738_v37 = vld [vmem:[%s10338_s5 + $0x548] sm:$0xff] }
 0x2be   :  { %2122 = vmatpush2.bf16.msra.mxu1 %v6289_v49  ;;  %2163 = vmatpush2.bf16.msra.mxu0 %v6417_v50  ;;  %v6356_v49 = vcombine.high %v8213_v1, %v758_v46  ;;  %v7705_v50 = vmov 1966171168   ;;  %v602_v43 = vld [vmem:[%s10338_s5 + $0x108] sm:$0xff] }
 0x2bf   :  { %2123 = vmatprep.subr.bf16.mxu1 %v6282_v51  ;;  %2164 = vmatprep.subr.bf16.mxu0 %v6410_v52  ;;  %v518_v51 = vunpack.c.l.s4 %v7705_v50  ;;  %v606_v44 = vld [vmem:[%s10338_s5 + $0x128] sm:$0xff] }
 0x2c0   :  { %v730_v1 = vld [vmem:[%s10338_s5 + $0x508] sm:$0xff] }
 0x2c1   :  { %v519_v52 = vunpack.c.0.s8 %v518_v51  ;;  %v594_v50 = vld [vmem:[%s10338_s5 + $0xc8] sm:$0xff] }
 0x2c2   :  { %2124 = vmatpush2.bf16.msra.mxu1 %v6281_v57  ;;  %2165 = vmatpush2.bf16.msra.mxu0 %v6409_v58  ;;  %v598_v51 = vld [vmem:[%s10338_s5 + $0xe8] sm:$0xff] }
 0x2c3   :  { %2125 = vmatprep.subr.bf16.mxu1 %v6274_v59  ;;  %2166 = vmatprep.subr.bf16.mxu0 %v6402_v60  ;;  %v8228_v54 = vsub.s32 %v519_v52, %v7995_v26  ;;  %v722_v52 = vld [vmem:[%s10338_s5 + $0x4c8] sm:$0xff] }
 0x2c5   :  { %v523_v56 = vrot.slane %v6168_v53, %v8228_v54  ;;  %v530_v57 = vrot.slane %v516_v55, %v8228_v54  ;;  %v726_v53 = vld [vmem:[%s10338_s5 + $0x4e8] sm:$0xff]  ;;  %v6203_v55 = vcombine.low %v602_v43, %v606_v44 }
 0x2c6   :  { %2126 = vmatpush2.bf16.msra.mxu1 %v6273_v2  ;;  %2167 = vmatpush2.bf16.msra.mxu0 %v6401_v3 }
 0x2c7   :  { %2127 = vmatprep.subr.bf16.mxu1 %v6266_v4  ;;  %2168 = vmatprep.subr.bf16.mxu0 %v6394_v5  ;;  %v531_v58 = vcombine.high %v523_v56, %v523_v56  ;;  %v532_v59 = vcombine.high %v530_v57, %v530_v57  ;;  %v534_v60 = vpack.i.b16 %v523_v56, %v523_v56 }
 0x2c8   :  { %v541_v62 = vpack.i.b16 %v530_v57, %v530_v57  ;;  %v6196_v57 = vcombine.high %v594_v50, %v598_v51 }
 0x2c9   :  { %v548_v61 = vpack.i.b16 %v531_v58, %v531_v58  ;;  %v555_v63 = vpack.i.b16 %v532_v59, %v532_v59  ;;  %v539_v2 = vrot.slane %v534_v60, %v7998_v27  ;;  %v6324_v58 = vcombine.high %v722_v52, %v726_v53  ;;  %v586_v59 = vld [vmem:[%s10338_s5 + $0x88] sm:$0xff] }
 0x2ca   :  { %2128 = vmatpush2.bf16.msra.mxu1 %v6265_v10  ;;  %2169 = vmatpush2.bf16.msra.mxu0 %v6393_v11  ;;  %v546_v7 = vrot.slane %v541_v62, %v7998_v27  ;;  %v590_v60 = vld [vmem:[%s10338_s5 + $0xa8] sm:$0xff] }
 0x2cb   :  { %2129 = vmatprep.subr.bf16.mxu1 %v6258_v12  ;;  %2170 = vmatprep.subr.bf16.mxu0 %v6386_v13  ;;  %v553_v4 = vrot.slane %v548_v61, %v7998_v27  ;;  %v560_v8 = vrot.slane %v555_v63, %v7998_v27  ;;  %v714_v61 = vld [vmem:[%s10338_s5 + $0x488] sm:$0xff]  ;;  %v6195_v63 = vcombine.low %v594_v50, %v598_v51 }
 0x2cc   :  { %v718_v62 = vld [vmem:[%s10338_s5 + $0x4a8] sm:$0xff] }
 0x2cd   :  { %v666_v51 = vld [vmem:[%s10338_s5 + $0x308] sm:$0xff] }
 0x2ce   :  { %2130 = vmatpush2.bf16.msra.mxu1 %v6257_v18  ;;  %2171 = vmatpush2.bf16.msra.mxu0 %v6385_v19  ;;  %v618_v19 = vld [vmem:[%s10338_s5 + $0x188] sm:$0xff] }
 0x2cf   :  { %2131 = vmatprep.subr.bf16.mxu1 %v6250_v20  ;;  %2172 = vmatprep.subr.bf16.mxu0 %v6378_v21 }
 0x2d2   :  { %2132 = vmatpush2.bf16.msra.mxu1 %v6249_v22  ;;  %2173 = vmatpush2.bf16.msra.mxu0 %v6377_v23  ;;  %v622_v22 = vld [vmem:[%s10338_s5 + $0x1a8] sm:$0xff] }
 0x2d3   :  { %2133 = vmatprep.subr.bf16.mxu1 %v6242_v31  ;;  %2174 = vmatprep.subr.bf16.mxu0 %v6370_v35  ;;  %v746_v23 = vld [vmem:[%s10338_s5 + $0x588] sm:$0xff]  ;;  %v6220_v35 = vcombine.high %v618_v19, %v622_v22  ;;  %v6219_v39 = vcombine.low %v618_v19, %v622_v22 }
 0x2d4   :  { %v6348_v36 = vcombine.high %v746_v23, %v750_v24  ;;  %v818_v22 = vld [vmem:[%s10338_s5 + $0x7c8] sm:$0xff] }
 0x2d6   :  { %2134 = vmatpush2.bf16.msra.mxu1 %v6241_v33  ;;  %2175 = vmatpush2.bf16.msra.mxu0 %v6369_v34  ;;  %v610_v34 = vld [vmem:[%s10338_s5 + $0x148] sm:$0xff] }
 0x2d7   :  { %2135 = vmatprep.subr.bf16.mxu1 %v6234_v38  ;;  %2176 = vmatprep.subr.bf16.mxu0 %v6362_v42  ;;  %v742_v38 = vld [vmem:[%s10338_s5 + $0x568] sm:$0xff]  ;;  %v6211_v46 = vcombine.low %v610_v34, %v614_v28 }
 0x2d8   :  { %v6340_v42 = vcombine.high %v738_v37, %v742_v38 }
 0x2da   :  { %2136 = vmatpush2.bf16.msra.mxu1 %v6233_v40  ;;  %2177 = vmatpush2.bf16.msra.mxu0 %v6361_v41  ;;  %v6347_v40 = vcombine.low %v746_v23, %v750_v24  ;;  %v6212_v41 = vcombine.high %v610_v34, %v614_v28  ;;  %v822_v23 = vld [vmem:[%s10338_s5 + $0x7e8] sm:$0xff] }
 0x2db   :  { %2187 = vmatprep.subr.bf16.mxu1 %v6228_v45  ;;  %2228 = vmatprep.subr.bf16.mxu0 %v6356_v49  ;;  %v734_v45 = vld [vmem:[%s10338_s5 + $0x528] sm:$0xff] }
 0x2dc   :  { %v6332_v49 = vcombine.high %v730_v1, %v734_v45  ;;  %v6331_v56 = vcombine.low %v730_v1, %v734_v45  ;;  %v682_v28 = vld [vmem:[%s10338_s5 + $0x388] sm:$0xff] }
 0x2dd   :  { %v678_v1 = vld [vmem:[%s10338_s5 + $0x368] sm:$0xff] }
 0x2de   :  { %v802_v45 = vld [vmem:[%s10338_s5 + $0x748] sm:$0xff] }
 0x35d   :  { %v455_v0 = vpop.f32.mrf.mxu1  ;;  %v496_v3 = vpop.f32.mrf.mxu0 }
 0x35e   :  { %v503_v5 = vpack.c.bf16 %v455_v0, %v455_v0  ;;  %v505_v6 = vpack.c.bf16 %v496_v3, %v496_v3  ;;  %v6323_v0 = vcombine.low %v722_v52, %v726_v53  ;;  %v6316_v3 = vcombine.high %v714_v61, %v718_v62  ;;  %v670_v52 = vld [vmem:[%s10338_s5 + $0x328] sm:$0xff] }
 0x35f   :  { %v457_v9 = vpop.f32.mrf.mxu1  ;;  %v498_v10 = vpop.f32.mrf.mxu0  ;;  %v794_v53 = vld [vmem:[%s10338_s5 + $0x708] sm:$0xff] }
 0x360   :  { %v504_v11 = vpack.c.bf16 %v457_v9, %v457_v9  ;;  %v506_v12 = vpack.c.bf16 %v498_v10, %v498_v10  ;;  %v561_v13 = vadd.bf16 %v539_v2, %v503_v5  ;;  %v563_v14 = vadd.bf16 %v553_v4, %v505_v6  ;;  %v578_v4 = vld [vmem:[%s10338_s5 + $0x48] sm:$0xff] }
 0x361   :  { %v459_v15 = vpop.f32.mrf.mxu1  ;;  %v500_v16 = vpop.f32.mrf.mxu0  ;;  %v6188_v2 = vcombine.high %v586_v59, %v590_v60  ;;  %v582_v5 = vld [vmem:[%s10338_s5 + $0x68] sm:$0xff]  ;;  %v6315_v9 = vcombine.low %v714_v61, %v718_v62 }
 0x362   :  { %v562_v17 = vadd.bf16 %v546_v7, %v504_v11  ;;  %v564_v18 = vadd.bf16 %v560_v8, %v506_v12  ;;  %v8255_v32 = vmax.bf16 %v7706_v25, %v561_v13  ;;  %v8258_v33 = vmax.bf16 %v7706_v25, %v563_v14  ;;  %v706_v6 = vld [vmem:[%s10338_s5 + $0x448] sm:$0xff] }
 0x363   :  { %v460_v20 = vpop.f32.mrf.mxu1  ;;  %v501_v21 = vpop.f32.mrf.mxu0  ;;  %v710_v7 = vld [vmem:[%s10338_s5 + $0x468] sm:$0xff]  ;;  %v6187_v8 = vcombine.low %v586_v59, %v590_v60  ;;  %v6180_v10 = vcombine.high %v578_v4, %v582_v5  ;;  %v6179_v16 = vcombine.low %v578_v4, %v582_v5 }
 0x364   :  { %v8249_v29 = vmax.bf16 %v7706_v25, %v562_v17  ;;  %v8252_v31 = vmax.bf16 %v7706_v25, %v564_v18  ;;  %v6308_v11 = vcombine.high %v706_v6, %v710_v7  ;;  %v570_v12 = vld [vmem:[%s10338_s5 + $0x8] sm:$0xff]  ;;  %v6307_v17 = vcombine.low %v706_v6, %v710_v7 }
 0x365   :  { %v574_v13 = vld [vmem:[%s10338_s5 + $0x28] sm:$0xff] }
 0x366   :  { %2137 = vmatprep.mubr.bf16.mxu1 %v8249_v29  ;;  %2178 = vmatprep.mubr.bf16.mxu0 %v8252_v31  ;;  %v698_v14 = vld [vmem:[%s10338_s5 + $0x408] sm:$0xff]  ;;  %v6172_v18 = vcombine.high %v570_v12, %v574_v13  ;;  %v6171_v24 = vcombine.low %v570_v12, %v574_v13 }
 0x367   :  { %2138 = vmatmul.mubr.bf16.vlgmr.msra.gmra.mxu1 %v8255_v32  ;;  %2179 = vmatmul.mubr.bf16.vlgmr.msra.gmra.mxu0 %v8258_v33  ;;  %v702_v15 = vld [vmem:[%s10338_s5 + $0x428] sm:$0xff] }
 0x368   :  { %2188 = vmatpush1.bf16.msra.mxu1 %v6227_v47  ;;  %2229 = vmatpush1.bf16.msra.mxu0 %v6355_v48  ;;  %v6339_v47 = vcombine.low %v738_v37, %v742_v38  ;;  %v6204_v48 = vcombine.high %v602_v43, %v606_v44  ;;  %v6300_v19 = vcombine.high %v698_v14, %v702_v15  ;;  %v690_v20 = vld [vmem:[%s10338_s5 + $0x3c8] sm:$0xff] }
 0x369   :  { %2219 = vmatprep.mubr.bf16.mxu1 %v8249_v29  ;;  %2260 = vmatprep.mubr.bf16.mxu0 %v8252_v31  ;;  %v694_v21 = vld [vmem:[%s10338_s5 + $0x3e8] sm:$0xff]  ;;  %v6299_v34 = vcombine.low %v698_v14, %v702_v15 }
 0x36a   :  { %2189 = vmatprep.subr.bf16.mxu1 %v6220_v35  ;;  %2230 = vmatprep.subr.bf16.mxu0 %v6348_v36  ;;  %v6292_v35 = vcombine.high %v690_v20, %v694_v21  ;;  %v6420_v36 = vcombine.high %v818_v22, %v822_v23  ;;  %v686_v37 = vld [vmem:[%s10338_s5 + $0x3a8] sm:$0xff] }
 0x36b   :  { %v810_v38 = vld [vmem:[%s10338_s5 + $0x788] sm:$0xff] }
 0x36c   :  { %2190 = vmatpush1.bf16.msra.mxu1 %v6219_v39  ;;  %2231 = vmatpush1.bf16.msra.mxu0 %v6347_v40  ;;  %v814_v39 = vld [vmem:[%s10338_s5 + $0x7a8] sm:$0xff]  ;;  %v6291_v40 = vcombine.low %v690_v20, %v694_v21 }
 0x36d   :  { %2191 = vmatprep.subr.bf16.mxu1 %v6212_v41  ;;  %2232 = vmatprep.subr.bf16.mxu0 %v6340_v42  ;;  %v6419_v41 = vcombine.low %v818_v22, %v822_v23  ;;  %v6284_v42 = vcombine.high %v682_v28, %v686_v37  ;;  %v6412_v43 = vcombine.high %v810_v38, %v814_v39  ;;  %v674_v44 = vld [vmem:[%s10338_s5 + $0x348] sm:$0xff] }
 0x36e   :  { %v658_v60 = vld [vmem:[%s10338_s5 + $0x2c8] sm:$0xff] }
 0x36f   :  { %v662_v61 = vld [vmem:[%s10338_s5 + $0x2e8] sm:$0xff] }
 0x370   :  { %2192 = vmatpush1.bf16.msra.mxu1 %v6211_v46  ;;  %2233 = vmatpush1.bf16.msra.mxu0 %v6339_v47  ;;  %v806_v46 = vld [vmem:[%s10338_s5 + $0x768] sm:$0xff]  ;;  %v6283_v47 = vcombine.low %v682_v28, %v686_v37  ;;  %v627_v37 = vld [vmem:[%s10338_s5 + $0x1d0] sm:$0xff] }
 0x371   :  { %2193 = vmatprep.subr.bf16.mxu1 %v6204_v48  ;;  %2234 = vmatprep.subr.bf16.mxu0 %v6332_v49  ;;  %v6411_v48 = vcombine.low %v810_v38, %v814_v39  ;;  %v6276_v49 = vcombine.high %v674_v44, %v678_v1  ;;  %v6404_v50 = vcombine.high %v802_v45, %v806_v46  ;;  %v786_v62 = vld [vmem:[%s10338_s5 + $0x6c8] sm:$0xff]  ;;  %v631_v38 = vld [vmem:[%s10338_s5 + $0x1f0] sm:$0xff] }
 0x372   :  { %v650_v5 = vld [vmem:[%s10338_s5 + $0x288] sm:$0xff]  ;;  %v755_v39 = vld [vmem:[%s10338_s5 + $0x5d0] sm:$0xff] }
 0x373   :  { %v654_v6 = vld [vmem:[%s10338_s5 + $0x2a8] sm:$0xff] }
 0x374   :  { %2194 = vmatpush1.bf16.msra.mxu1 %v6203_v55  ;;  %2235 = vmatpush1.bf16.msra.mxu0 %v6331_v56  ;;  %v798_v55 = vld [vmem:[%s10338_s5 + $0x728] sm:$0xff]  ;;  %v6275_v56 = vcombine.low %v674_v44, %v678_v1  ;;  %v619_v1 = vld [vmem:[%s10338_s5 + $0x190] sm:$0xff] }
 0x375   :  { %2195 = vmatprep.subr.bf16.mxu1 %v6196_v57  ;;  %2236 = vmatprep.subr.bf16.mxu0 %v6324_v58  ;;  %v6403_v57 = vcombine.low %v802_v45, %v806_v46  ;;  %v6268_v58 = vcombine.high %v666_v51, %v670_v52  ;;  %v6396_v59 = vcombine.high %v794_v53, %v798_v55  ;;  %v778_v7 = vld [vmem:[%s10338_s5 + $0x688] sm:$0xff]  ;;  %v623_v45 = vld [vmem:[%s10338_s5 + $0x1b0] sm:$0xff] }
 0x376   :  { %v642_v13 = vld [vmem:[%s10338_s5 + $0x248] sm:$0xff]  ;;  %v747_v46 = vld [vmem:[%s10338_s5 + $0x590] sm:$0xff] }
 0x377   :  { %v646_v14 = vld [vmem:[%s10338_s5 + $0x268] sm:$0xff] }
 0x378   :  { %2196 = vmatpush1.bf16.msra.mxu1 %v6195_v63  ;;  %2237 = vmatpush1.bf16.msra.mxu0 %v6323_v0  ;;  %v790_v63 = vld [vmem:[%s10338_s5 + $0x6e8] sm:$0xff]  ;;  %v6267_v0 = vcombine.low %v666_v51, %v670_v52  ;;  %v611_v52 = vld [vmem:[%s10338_s5 + $0x150] sm:$0xff] }
 0x379   :  { %2197 = vmatprep.subr.bf16.mxu1 %v6188_v2  ;;  %2238 = vmatprep.subr.bf16.mxu0 %v6316_v3  ;;  %v6395_v2 = vcombine.low %v794_v53, %v798_v55  ;;  %v6260_v3 = vcombine.high %v658_v60, %v662_v61  ;;  %v6388_v4 = vcombine.high %v786_v62, %v790_v63  ;;  %v770_v15 = vld [vmem:[%s10338_s5 + $0x648] sm:$0xff]  ;;  %v615_v53 = vld [vmem:[%s10338_s5 + $0x170] sm:$0xff] }
 0x37a   :  { %v634_v21 = vld [vmem:[%s10338_s5 + $0x208] sm:$0xff]  ;;  %v739_v55 = vld [vmem:[%s10338_s5 + $0x550] sm:$0xff] }
 0x37b   :  { %v638_v22 = vld [vmem:[%s10338_s5 + $0x228] sm:$0xff] }
 0x37c   :  { %2198 = vmatpush1.bf16.msra.mxu1 %v6187_v8  ;;  %2239 = vmatpush1.bf16.msra.mxu0 %v6315_v9  ;;  %v782_v8 = vld [vmem:[%s10338_s5 + $0x6a8] sm:$0xff]  ;;  %v6259_v9 = vcombine.low %v658_v60, %v662_v61  ;;  %v603_v61 = vld [vmem:[%s10338_s5 + $0x110] sm:$0xff] }
 0x37d   :  { %2199 = vmatprep.subr.bf16.mxu1 %v6180_v10  ;;  %2240 = vmatprep.subr.bf16.mxu0 %v6308_v11  ;;  %v6387_v10 = vcombine.low %v786_v62, %v790_v63  ;;  %v6252_v11 = vcombine.high %v650_v5, %v654_v6  ;;  %v6380_v12 = vcombine.high %v778_v7, %v782_v8  ;;  %v762_v23 = vld [vmem:[%s10338_s5 + $0x608] sm:$0xff]  ;;  %v607_v62 = vld [vmem:[%s10338_s5 + $0x130] sm:$0xff] }
 0x37e   :  { %v731_v63 = vld [vmem:[%s10338_s5 + $0x510] sm:$0xff] }
 0x380   :  { %2200 = vmatpush1.bf16.msra.mxu1 %v6179_v16  ;;  %2241 = vmatpush1.bf16.msra.mxu0 %v6307_v17  ;;  %v774_v16 = vld [vmem:[%s10338_s5 + $0x668] sm:$0xff]  ;;  %v6251_v17 = vcombine.low %v650_v5, %v654_v6  ;;  %v595_v6 = vld [vmem:[%s10338_s5 + $0xd0] sm:$0xff] }
 0x381   :  { %2201 = vmatprep.subr.bf16.mxu1 %v6172_v18  ;;  %2242 = vmatprep.subr.bf16.mxu0 %v6300_v19  ;;  %v6379_v18 = vcombine.low %v778_v7, %v782_v8  ;;  %v6244_v19 = vcombine.high %v642_v13, %v646_v14  ;;  %v6372_v20 = vcombine.high %v770_v15, %v774_v16  ;;  %v599_v7 = vld [vmem:[%s10338_s5 + $0xf0] sm:$0xff] }
 0x382   :  { %v723_v8 = vld [vmem:[%s10338_s5 + $0x4d0] sm:$0xff] }
 0x384   :  { %2202 = vmatpush1.bf16.msra.mxu1 %v6171_v24  ;;  %2243 = vmatpush1.bf16.msra.mxu0 %v6299_v34  ;;  %v766_v24 = vld [vmem:[%s10338_s5 + $0x628] sm:$0xff]  ;;  %v6243_v34 = vcombine.low %v642_v13, %v646_v14  ;;  %v587_v14 = vld [vmem:[%s10338_s5 + $0x90] sm:$0xff] }
 0x385   :  { %2203 = vmatprep.subr.bf16.mxu1 %v6292_v35  ;;  %2244 = vmatprep.subr.bf16.mxu0 %v6420_v36  ;;  %v6371_v35 = vcombine.low %v770_v15, %v774_v16  ;;  %v6236_v36 = vcombine.high %v634_v21, %v638_v22  ;;  %v6364_v28 = vcombine.high %v762_v23, %v766_v24  ;;  %v591_v15 = vld [vmem:[%s10338_s5 + $0xb0] sm:$0xff] }
 0x386   :  { %v715_v16 = vld [vmem:[%s10338_s5 + $0x490] sm:$0xff] }
 0x388   :  { %2204 = vmatpush2.bf16.msra.mxu1 %v6291_v40  ;;  %2245 = vmatpush2.bf16.msra.mxu0 %v6419_v41  ;;  %v759_v40 = vld [vmem:[%s10338_s5 + $0x5f0] sm:$0xff]  ;;  %v6235_v41 = vcombine.low %v634_v21, %v638_v22 }
 0x389   :  { %2205 = vmatprep.subr.bf16.mxu1 %v6284_v42  ;;  %2246 = vmatprep.subr.bf16.mxu0 %v6412_v43  ;;  %v6363_v42 = vcombine.low %v762_v23, %v766_v24  ;;  %v6230_v43 = vcombine.high %v627_v37, %v631_v38  ;;  %v6358_v44 = vcombine.high %v755_v39, %v759_v40  ;;  %v579_v22 = vld [vmem:[%s10338_s5 + $0x50] sm:$0xff] }
 0x38a   :  { %v583_v23 = vld [vmem:[%s10338_s5 + $0x70] sm:$0xff] }
 0x38b   :  { %v707_v24 = vld [vmem:[%s10338_s5 + $0x450] sm:$0xff] }
 0x38c   :  { %2206 = vmatpush2.bf16.msra.mxu1 %v6283_v47  ;;  %2247 = vmatpush2.bf16.msra.mxu0 %v6411_v48  ;;  %v751_v47 = vld [vmem:[%s10338_s5 + $0x5b0] sm:$0xff]  ;;  %v6229_v48 = vcombine.low %v627_v37, %v631_v38 }
 0x38d   :  { %2207 = vmatprep.subr.bf16.mxu1 %v6276_v49  ;;  %2248 = vmatprep.subr.bf16.mxu0 %v6404_v50  ;;  %v6357_v49 = vcombine.low %v755_v39, %v759_v40  ;;  %v6222_v50 = vcombine.high %v619_v1, %v623_v45  ;;  %v6350_v51 = vcombine.high %v747_v46, %v751_v47  ;;  %v571_v38 = vld [vmem:[%s10338_s5 + $0x10] sm:$0xff] }
 0x38e   :  { %v575_v39 = vld [vmem:[%s10338_s5 + $0x30] sm:$0xff] }
 0x38f   :  { %v699_v40 = vld [vmem:[%s10338_s5 + $0x410] sm:$0xff] }
 0x390   :  { %2208 = vmatpush2.bf16.msra.mxu1 %v6275_v56  ;;  %2249 = vmatpush2.bf16.msra.mxu0 %v6403_v57  ;;  %v743_v56 = vld [vmem:[%s10338_s5 + $0x570] sm:$0xff]  ;;  %v6221_v57 = vcombine.low %v619_v1, %v623_v45 }
 0x391   :  { %2209 = vmatprep.subr.bf16.mxu1 %v6268_v58  ;;  %2250 = vmatprep.subr.bf16.mxu0 %v6396_v59  ;;  %v6349_v58 = vcombine.low %v747_v46, %v751_v47  ;;  %v6214_v59 = vcombine.high %v611_v52, %v615_v53  ;;  %v6342_v60 = vcombine.high %v739_v55, %v743_v56  ;;  %v691_v45 = vld [vmem:[%s10338_s5 + $0x3d0] sm:$0xff] }
 0x392   :  { %v695_v46 = vld [vmem:[%s10338_s5 + $0x3f0] sm:$0xff] }
 0x393   :  { %v819_v47 = vld [vmem:[%s10338_s5 + $0x7d0] sm:$0xff] }
 0x394   :  { %2210 = vmatpush2.bf16.msra.mxu1 %v6267_v0  ;;  %2251 = vmatpush2.bf16.msra.mxu0 %v6395_v2  ;;  %v735_v0 = vld [vmem:[%s10338_s5 + $0x530] sm:$0xff]  ;;  %v6213_v2 = vcombine.low %v611_v52, %v615_v53 }
 0x395   :  { %2211 = vmatprep.subr.bf16.mxu1 %v6260_v3  ;;  %2252 = vmatprep.subr.bf16.mxu0 %v6388_v4  ;;  %v6341_v3 = vcombine.low %v739_v55, %v743_v56  ;;  %v6206_v4 = vcombine.high %v603_v61, %v607_v62  ;;  %v6334_v5 = vcombine.high %v731_v63, %v735_v0  ;;  %v683_v53 = vld [vmem:[%s10338_s5 + $0x390] sm:$0xff] }
 0x396   :  { %v687_v55 = vld [vmem:[%s10338_s5 + $0x3b0] sm:$0xff] }
 0x397   :  { %v811_v56 = vld [vmem:[%s10338_s5 + $0x790] sm:$0xff] }
 0x398   :  { %2212 = vmatpush2.bf16.msra.mxu1 %v6259_v9  ;;  %2253 = vmatpush2.bf16.msra.mxu0 %v6387_v10  ;;  %v727_v9 = vld [vmem:[%s10338_s5 + $0x4f0] sm:$0xff]  ;;  %v6205_v10 = vcombine.low %v603_v61, %v607_v62 }
 0x399   :  { %2213 = vmatprep.subr.bf16.mxu1 %v6252_v11  ;;  %2254 = vmatprep.subr.bf16.mxu0 %v6380_v12  ;;  %v6333_v11 = vcombine.low %v731_v63, %v735_v0  ;;  %v6198_v12 = vcombine.high %v595_v6, %v599_v7  ;;  %v6326_v13 = vcombine.high %v723_v8, %v727_v9  ;;  %v675_v62 = vld [vmem:[%s10338_s5 + $0x350] sm:$0xff] }
 0x39a   :  { %v679_v63 = vld [vmem:[%s10338_s5 + $0x370] sm:$0xff] }
 0x39b   :  { %v803_v0 = vld [vmem:[%s10338_s5 + $0x750] sm:$0xff] }
 0x39c   :  { %2214 = vmatpush2.bf16.msra.mxu1 %v6251_v17  ;;  %2255 = vmatpush2.bf16.msra.mxu0 %v6379_v18  ;;  %v719_v17 = vld [vmem:[%s10338_s5 + $0x4b0] sm:$0xff]  ;;  %v6197_v18 = vcombine.low %v595_v6, %v599_v7 }
 0x39d   :  { %2215 = vmatprep.subr.bf16.mxu1 %v6244_v19  ;;  %2256 = vmatprep.subr.bf16.mxu0 %v6372_v20  ;;  %v6325_v19 = vcombine.low %v723_v8, %v727_v9  ;;  %v6190_v20 = vcombine.high %v587_v14, %v591_v15  ;;  %v6318_v21 = vcombine.high %v715_v16, %v719_v17  ;;  %v667_v7 = vld [vmem:[%s10338_s5 + $0x310] sm:$0xff] }
 0x39e   :  { %v671_v8 = vld [vmem:[%s10338_s5 + $0x330] sm:$0xff] }
 0x39f   :  { %v795_v9 = vld [vmem:[%s10338_s5 + $0x710] sm:$0xff] }
 0x3a0   :  { %2216 = vmatpush2.bf16.msra.mxu1 %v6243_v34  ;;  %2257 = vmatpush2.bf16.msra.mxu0 %v6371_v35  ;;  %v711_v34 = vld [vmem:[%s10338_s5 + $0x470] sm:$0xff]  ;;  %v6189_v35 = vcombine.low %v587_v14, %v591_v15 }
 0x3a1   :  { %2217 = vmatprep.subr.bf16.mxu1 %v6236_v36  ;;  %2258 = vmatprep.subr.bf16.mxu0 %v6364_v28  ;;  %v6317_v36 = vcombine.low %v715_v16, %v719_v17  ;;  %v6182_v28 = vcombine.high %v579_v22, %v583_v23  ;;  %v6310_v37 = vcombine.high %v707_v24, %v711_v34  ;;  %v659_v15 = vld [vmem:[%s10338_s5 + $0x2d0] sm:$0xff] }
 0x3a2   :  { %v663_v16 = vld [vmem:[%s10338_s5 + $0x2f0] sm:$0xff] }
 0x3a3   :  { %v787_v17 = vld [vmem:[%s10338_s5 + $0x6d0] sm:$0xff] }
 0x3a4   :  { %2218 = vmatpush2.bf16.msra.mxu1 %v6235_v41  ;;  %2259 = vmatpush2.bf16.msra.mxu0 %v6363_v42  ;;  %v703_v41 = vld [vmem:[%s10338_s5 + $0x430] sm:$0xff]  ;;  %v6181_v42 = vcombine.low %v579_v22, %v583_v23 }
 0x3a5   :  { %2269 = vmatprep.subr.bf16.mxu1 %v6230_v43  ;;  %2310 = vmatprep.subr.bf16.mxu0 %v6358_v44  ;;  %v6309_v43 = vcombine.low %v707_v24, %v711_v34  ;;  %v6174_v44 = vcombine.high %v571_v38, %v575_v39  ;;  %v6302_v1 = vcombine.high %v699_v40, %v703_v41  ;;  %v651_v23 = vld [vmem:[%s10338_s5 + $0x290] sm:$0xff] }
 0x3a6   :  { %v655_v24 = vld [vmem:[%s10338_s5 + $0x2b0] sm:$0xff] }
 0x3a7   :  { %2220 = vmatmul.mubr.bf16.vlgmr.msra.gmra.mxu1 %v8255_v32  ;;  %2261 = vmatmul.mubr.bf16.vlgmr.msra.gmra.mxu0 %v8258_v33  ;;  %v779_v34 = vld [vmem:[%s10338_s5 + $0x690] sm:$0xff] }
 0x3a8   :  { %2270 = vmatpush1.bf16.msra.mxu1 %v6229_v48  ;;  %2301 = vmatprep.mubr.bf16.mxu1 %v8249_v29  ;;  %v823_v48 = vld [vmem:[%s10338_s5 + $0x7f0] sm:$0xff] }
 0x3a9   :  { %2311 = vmatpush1.bf16.msra.mxu0 %v6357_v49  ;;  %2342 = vmatprep.mubr.bf16.mxu0 %v8252_v31  ;;  %v6173_v49 = vcombine.low %v571_v38, %v575_v39  ;;  %v6422_v52 = vcombine.high %v819_v47, %v823_v48  ;;  %v643_v39 = vld [vmem:[%s10338_s5 + $0x250] sm:$0xff] }
 0x3aa   :  { %2271 = vmatprep.subr.bf16.mxu1 %v6222_v50  ;;  %2312 = vmatprep.subr.bf16.mxu0 %v6350_v51  ;;  %v6301_v50 = vcombine.low %v699_v40, %v703_v41  ;;  %v6294_v51 = vcombine.high %v691_v45, %v695_v46  ;;  %v647_v40 = vld [vmem:[%s10338_s5 + $0x270] sm:$0xff] }
 0x3ab   :  { %v771_v41 = vld [vmem:[%s10338_s5 + $0x650] sm:$0xff] }
 0x3ac   :  { %2272 = vmatpush1.bf16.msra.mxu1 %v6221_v57  ;;  %v815_v57 = vld [vmem:[%s10338_s5 + $0x7b0] sm:$0xff] }
 0x3ad   :  { %2313 = vmatpush1.bf16.msra.mxu0 %v6349_v58  ;;  %2273 = vmatprep.subr.bf16.mxu1 %v6214_v59  ;;  %v6293_v58 = vcombine.low %v691_v45, %v695_v46  ;;  %v6421_v59 = vcombine.low %v819_v47, %v823_v48  ;;  %v6414_v61 = vcombine.high %v811_v56, %v815_v57  ;;  %v635_v46 = vld [vmem:[%s10338_s5 + $0x210] sm:$0xff] }
 0x3ae   :  { %2314 = vmatprep.subr.bf16.mxu0 %v6342_v60  ;;  %v6286_v60 = vcombine.high %v683_v53, %v687_v55  ;;  %v639_v47 = vld [vmem:[%s10338_s5 + $0x230] sm:$0xff] }
 0x3af   :  { %v763_v48 = vld [vmem:[%s10338_s5 + $0x610] sm:$0xff] }
 0x3b0   :  { %2274 = vmatpush1.bf16.msra.mxu1 %v6213_v2  ;;  %v807_v2 = vld [vmem:[%s10338_s5 + $0x770] sm:$0xff] }
 0x3b1   :  { %2315 = vmatpush1.bf16.msra.mxu0 %v6341_v3  ;;  %2275 = vmatprep.subr.bf16.mxu1 %v6206_v4  ;;  %v6285_v3 = vcombine.low %v683_v53, %v687_v55  ;;  %v6413_v4 = vcombine.low %v811_v56, %v815_v57  ;;  %v6406_v6 = vcombine.high %v803_v0, %v807_v2  ;;  %v628_v55 = vld [vmem:[%s10338_s5 + $0x1d8] sm:$0xff] }
 0x3b2   :  { %2316 = vmatprep.subr.bf16.mxu0 %v6334_v5  ;;  %v6278_v5 = vcombine.high %v675_v62, %v679_v63  ;;  %v632_v56 = vld [vmem:[%s10338_s5 + $0x1f8] sm:$0xff] }
 0x3b3   :  { %v756_v57 = vld [vmem:[%s10338_s5 + $0x5d8] sm:$0xff] }
 0x3b4   :  { %2276 = vmatpush1.bf16.msra.mxu1 %v6205_v10  ;;  %v799_v10 = vld [vmem:[%s10338_s5 + $0x730] sm:$0xff] }
 0x3b5   :  { %2317 = vmatpush1.bf16.msra.mxu0 %v6333_v11  ;;  %2277 = vmatprep.subr.bf16.mxu1 %v6198_v12  ;;  %v6277_v11 = vcombine.low %v675_v62, %v679_v63  ;;  %v6405_v12 = vcombine.low %v803_v0, %v807_v2  ;;  %v6398_v14 = vcombine.high %v795_v9, %v799_v10  ;;  %v620_v63 = vld [vmem:[%s10338_s5 + $0x198] sm:$0xff] }
 0x3b6   :  { %2318 = vmatprep.subr.bf16.mxu0 %v6326_v13  ;;  %v6270_v13 = vcombine.high %v667_v7, %v671_v8  ;;  %v624_v0 = vld [vmem:[%s10338_s5 + $0x1b8] sm:$0xff]  ;;  %v6231_v2 = vcombine.low %v628_v55, %v632_v56 }
 0x3b8   :  { %2278 = vmatpush1.bf16.msra.mxu1 %v6197_v18  ;;  %v791_v18 = vld [vmem:[%s10338_s5 + $0x6f0] sm:$0xff] }
 0x3b9   :  { %2319 = vmatpush1.bf16.msra.mxu0 %v6325_v19  ;;  %2279 = vmatprep.subr.bf16.mxu1 %v6190_v20  ;;  %v6269_v19 = vcombine.low %v667_v7, %v671_v8  ;;  %v6397_v20 = vcombine.low %v795_v9, %v799_v10  ;;  %v6390_v22 = vcombine.high %v787_v17, %v791_v18  ;;  %v612_v7 = vld [vmem:[%s10338_s5 + $0x158] sm:$0xff] }
 0x3ba   :  { %2320 = vmatprep.subr.bf16.mxu0 %v6318_v21  ;;  %v6262_v21 = vcombine.high %v659_v15, %v663_v16  ;;  %v616_v8 = vld [vmem:[%s10338_s5 + $0x178] sm:$0xff] }
 0x3bb   :  { %v740_v10 = vld [vmem:[%s10338_s5 + $0x558] sm:$0xff] }
 0x3bc   :  { %2280 = vmatpush1.bf16.msra.mxu1 %v6189_v35  ;;  %v783_v35 = vld [vmem:[%s10338_s5 + $0x6b0] sm:$0xff] }
 0x3bd   :  { %2321 = vmatpush1.bf16.msra.mxu0 %v6317_v36  ;;  %2281 = vmatprep.subr.bf16.mxu1 %v6182_v28  ;;  %v6261_v36 = vcombine.low %v659_v15, %v663_v16  ;;  %v6389_v28 = vcombine.low %v787_v17, %v791_v18  ;;  %v6382_v38 = vcombine.high %v779_v34, %v783_v35  ;;  %v604_v16 = vld [vmem:[%s10338_s5 + $0x118] sm:$0xff] }
 0x3be   :  { %2322 = vmatprep.subr.bf16.mxu0 %v6310_v37  ;;  %v6254_v37 = vcombine.high %v651_v23, %v655_v24  ;;  %v608_v17 = vld [vmem:[%s10338_s5 + $0x138] sm:$0xff] }
 0x3bf   :  { %v736_v18 = vld [vmem:[%s10338_s5 + $0x538] sm:$0xff] }
 0x3c0   :  { %2282 = vmatpush1.bf16.msra.mxu1 %v6181_v42  ;;  %v775_v42 = vld [vmem:[%s10338_s5 + $0x670] sm:$0xff] }
 0x3c1   :  { %2323 = vmatpush1.bf16.msra.mxu0 %v6309_v43  ;;  %2283 = vmatprep.subr.bf16.mxu1 %v6174_v44  ;;  %v6253_v43 = vcombine.low %v651_v23, %v655_v24  ;;  %v6381_v44 = vcombine.low %v779_v34, %v783_v35  ;;  %v6374_v45 = vcombine.high %v771_v41, %v775_v42  ;;  %v600_v23 = vld [vmem:[%s10338_s5 + $0xf8] sm:$0xff] }
 0x3c2   :  { %2324 = vmatprep.subr.bf16.mxu0 %v6302_v1  ;;  %v6246_v1 = vcombine.high %v643_v39, %v647_v40  ;;  %v724_v24 = vld [vmem:[%s10338_s5 + $0x4d8] sm:$0xff]  ;;  %v6207_v35 = vcombine.low %v604_v16, %v608_v17 }
 0x3c3   :  { %v728_v34 = vld [vmem:[%s10338_s5 + $0x4f8] sm:$0xff] }
 0x3c4   :  { %2284 = vmatpush1.bf16.msra.mxu1 %v6173_v49  ;;  %v767_v49 = vld [vmem:[%s10338_s5 + $0x630] sm:$0xff] }
 0x3c5   :  { %2325 = vmatpush1.bf16.msra.mxu0 %v6301_v50  ;;  %2285 = vmatprep.subr.bf16.mxu1 %v6294_v51  ;;  %v6245_v50 = vcombine.low %v643_v39, %v647_v40  ;;  %v6373_v51 = vcombine.low %v771_v41, %v775_v42  ;;  %v6366_v53 = vcombine.high %v763_v48, %v767_v49  ;;  %v592_v39 = vld [vmem:[%s10338_s5 + $0xb8] sm:$0xff] }
 0x3c6   :  { %2326 = vmatprep.subr.bf16.mxu0 %v6422_v52  ;;  %v6238_v52 = vcombine.high %v635_v46, %v639_v47  ;;  %v716_v40 = vld [vmem:[%s10338_s5 + $0x498] sm:$0xff] }
 0x3c7   :  { %v720_v41 = vld [vmem:[%s10338_s5 + $0x4b8] sm:$0xff] }
 0x3c8   :  { %2286 = vmatpush2.bf16.msra.mxu1 %v6293_v58  ;;  %v760_v58 = vld [vmem:[%s10338_s5 + $0x5f8] sm:$0xff] }
 0x3c9   :  { %2327 = vmatpush2.bf16.msra.mxu0 %v6421_v59  ;;  %2287 = vmatprep.subr.bf16.mxu1 %v6286_v60  ;;  %v6237_v59 = vcombine.low %v635_v46, %v639_v47  ;;  %v6365_v60 = vcombine.low %v763_v48, %v767_v49  ;;  %v6360_v62 = vcombine.high %v756_v57, %v760_v58  ;;  %v584_v46 = vld [vmem:[%s10338_s5 + $0x78] sm:$0xff] }
 0x3ca   :  { %2328 = vmatprep.subr.bf16.mxu0 %v6414_v61  ;;  %v6232_v61 = vcombine.high %v628_v55, %v632_v56  ;;  %v708_v47 = vld [vmem:[%s10338_s5 + $0x458] sm:$0xff] }
 0x3cb   :  { %v712_v48 = vld [vmem:[%s10338_s5 + $0x478] sm:$0xff] }
 0x3cc   :  { %2288 = vmatpush2.bf16.msra.mxu1 %v6285_v3  ;;  %v748_v3 = vld [vmem:[%s10338_s5 + $0x598] sm:$0xff] }
 0x3cd   :  { %2329 = vmatpush2.bf16.msra.mxu0 %v6413_v4  ;;  %2289 = vmatprep.subr.bf16.mxu1 %v6278_v5  ;;  %v752_v4 = vld [vmem:[%s10338_s5 + $0x5b8] sm:$0xff]  ;;  %v6359_v5 = vcombine.low %v756_v57, %v760_v58 }
 0x3ce   :  { %2330 = vmatprep.subr.bf16.mxu0 %v6406_v6  ;;  %v6224_v6 = vcombine.high %v620_v63, %v624_v0  ;;  %v6352_v9 = vcombine.high %v748_v3, %v752_v4  ;;  %v576_v55 = vld [vmem:[%s10338_s5 + $0x38] sm:$0xff] }
 0x3cf   :  { %v700_v56 = vld [vmem:[%s10338_s5 + $0x418] sm:$0xff] }
 0x3d0   :  { %2290 = vmatpush2.bf16.msra.mxu1 %v6277_v11  ;;  %v744_v11 = vld [vmem:[%s10338_s5 + $0x578] sm:$0xff] }
 0x3d1   :  { %2331 = vmatpush2.bf16.msra.mxu0 %v6405_v12  ;;  %2291 = vmatprep.subr.bf16.mxu1 %v6270_v13  ;;  %v6223_v12 = vcombine.low %v620_v63, %v624_v0  ;;  %v6351_v13 = vcombine.low %v748_v3, %v752_v4  ;;  %v6344_v15 = vcombine.high %v740_v10, %v744_v11  ;;  %v704_v57 = vld [vmem:[%s10338_s5 + $0x438] sm:$0xff] }
 0x3d2   :  { %2332 = vmatprep.subr.bf16.mxu0 %v6398_v14  ;;  %v6216_v14 = vcombine.high %v612_v7, %v616_v8  ;;  %v696_v63 = vld [vmem:[%s10338_s5 + $0x3f8] sm:$0xff]  ;;  %v6303_v4 = vcombine.low %v700_v56, %v704_v57 }
 0x3d3   :  { %v820_v0 = vld [vmem:[%s10338_s5 + $0x7d8] sm:$0xff] }
 0x3d4   :  { %2292 = vmatpush2.bf16.msra.mxu1 %v6269_v19  ;;  %v6343_v19 = vcombine.low %v740_v10, %v744_v11  ;;  %v816_v10 = vld [vmem:[%s10338_s5 + $0x7b8] sm:$0xff] }
 0x3d5   :  { %2333 = vmatpush2.bf16.msra.mxu0 %v6397_v20  ;;  %2293 = vmatprep.subr.bf16.mxu1 %v6262_v21  ;;  %v6208_v20 = vcombine.high %v604_v16, %v608_v17  ;;  %v680_v16 = vld [vmem:[%s10338_s5 + $0x378] sm:$0xff] }
 0x3d6   :  { %2334 = vmatprep.subr.bf16.mxu0 %v6390_v22  ;;  %v596_v22 = vld [vmem:[%s10338_s5 + $0xd8] sm:$0xff] }
 0x3d7   :  { %v6199_v42 = vcombine.low %v596_v22, %v600_v23  ;;  %v804_v17 = vld [vmem:[%s10338_s5 + $0x758] sm:$0xff] }
 0x3d8   :  { %2294 = vmatpush2.bf16.msra.mxu1 %v6261_v36 }
 0x3d9   :  { %2335 = vmatpush2.bf16.msra.mxu0 %v6389_v28  ;;  %2295 = vmatprep.subr.bf16.mxu1 %v6254_v37  ;;  %v6200_v28 = vcombine.high %v596_v22, %v600_v23  ;;  %v6328_v37 = vcombine.high %v724_v24, %v728_v34  ;;  %v672_v22 = vld [vmem:[%s10338_s5 + $0x338] sm:$0xff] }
 0x3da   :  { %2336 = vmatprep.subr.bf16.mxu0 %v6382_v38  ;;  %v588_v38 = vld [vmem:[%s10338_s5 + $0x98] sm:$0xff] }
 0x3db   :  { %v6191_v49 = vcombine.low %v588_v38, %v592_v39  ;;  %v796_v23 = vld [vmem:[%s10338_s5 + $0x718] sm:$0xff] }
 0x3dc   :  { %2296 = vmatpush2.bf16.msra.mxu1 %v6253_v43  ;;  %v6327_v43 = vcombine.low %v724_v24, %v728_v34  ;;  %v800_v24 = vld [vmem:[%s10338_s5 + $0x738] sm:$0xff] }
 0x3dd   :  { %2337 = vmatpush2.bf16.msra.mxu0 %v6381_v44  ;;  %2297 = vmatprep.subr.bf16.mxu1 %v6246_v1  ;;  %v6192_v44 = vcombine.high %v588_v38, %v592_v39  ;;  %v6320_v1 = vcombine.high %v716_v40, %v720_v41  ;;  %v664_v38 = vld [vmem:[%s10338_s5 + $0x2f8] sm:$0xff] }
 0x3de   :  { %2338 = vmatprep.subr.bf16.mxu0 %v6374_v45  ;;  %v580_v45 = vld [vmem:[%s10338_s5 + $0x58] sm:$0xff] }
 0x3df   :  { %v6183_v58 = vcombine.low %v580_v45, %v584_v46  ;;  %v788_v39 = vld [vmem:[%s10338_s5 + $0x6d8] sm:$0xff] }
 0x3e0   :  { %2298 = vmatpush2.bf16.msra.mxu1 %v6245_v50  ;;  %v6319_v50 = vcombine.low %v716_v40, %v720_v41  ;;  %v792_v40 = vld [vmem:[%s10338_s5 + $0x6f8] sm:$0xff] }
 0x3e1   :  { %2339 = vmatpush2.bf16.msra.mxu0 %v6373_v51  ;;  %2299 = vmatprep.subr.bf16.mxu1 %v6238_v52  ;;  %v6184_v51 = vcombine.high %v580_v45, %v584_v46  ;;  %v6312_v52 = vcombine.high %v708_v47, %v712_v48  ;;  %v656_v45 = vld [vmem:[%s10338_s5 + $0x2b8] sm:$0xff] }
 0x3e2   :  { %2340 = vmatprep.subr.bf16.mxu0 %v6366_v53  ;;  %v572_v53 = vld [vmem:[%s10338_s5 + $0x18] sm:$0xff] }
 0x3e3   :  { %v6175_v3 = vcombine.low %v572_v53, %v576_v55  ;;  %v780_v46 = vld [vmem:[%s10338_s5 + $0x698] sm:$0xff] }
 0x3e4   :  { %2300 = vmatpush2.bf16.msra.mxu1 %v6237_v59  ;;  %v6311_v59 = vcombine.low %v708_v47, %v712_v48  ;;  %v784_v47 = vld [vmem:[%s10338_s5 + $0x6b8] sm:$0xff] }
 0x3e5   :  { %2341 = vmatpush2.bf16.msra.mxu0 %v6365_v60  ;;  %2351 = vmatprep.subr.bf16.mxu1 %v6232_v61  ;;  %v6176_v60 = vcombine.high %v572_v53, %v576_v55  ;;  %v6304_v61 = vcombine.high %v700_v56, %v704_v57  ;;  %v648_v53 = vld [vmem:[%s10338_s5 + $0x278] sm:$0xff]  ;;  %v8817_v57 = vld [vmem:[%s10339_s6] sm:$0xff] }
 0x3e6   :  { %2392 = vmatprep.subr.bf16.mxu0 %v6360_v62  ;;  %v692_v62 = vld [vmem:[%s10338_s5 + $0x3d8] sm:$0xff] }
 0x3e7   :  { %2302 = vmatmul.mubr.bf16.vlgmr.msra.gmra.mxu1 %v8255_v32  ;;  %v6295_v11 = vcombine.low %v692_v62, %v696_v63  ;;  %v772_v55 = vld [vmem:[%s10338_s5 + $0x658] sm:$0xff] }
 0x3e8   :  { %2343 = vmatmul.mubr.bf16.vlgmr.msra.gmra.mxu0 %v8258_v33  ;;  %2352 = vmatpush1.bf16.msra.mxu1 %v6231_v2  ;;  %v824_v2 = vld [vmem:[%s10338_s5 + $0x7f8] sm:$0xff] }
 0x3e9   :  { %2383 = vmatprep.mubr.bf16.mxu1 %v8249_v29  ;;  %2393 = vmatpush1.bf16.msra.mxu0 %v6359_v5  ;;  %v732_v29 = vld [vmem:[%s10338_s5 + $0x518] sm:$0xff]  ;;  %v6296_v5 = vcombine.high %v692_v62, %v696_v63 }
 0x3ea   :  { %2424 = vmatprep.mubr.bf16.mxu0 %v8252_v31  ;;  %2353 = vmatprep.subr.bf16.mxu1 %v6224_v6  ;;  %v6215_v31 = vcombine.low %v612_v7, %v616_v8  ;;  %v6336_v21 = vcombine.high %v732_v29, %v736_v18  ;;  %v6335_v36 = vcombine.low %v732_v29, %v736_v18  ;;  %v684_v7 = vld [vmem:[%s10338_s5 + $0x398] sm:$0xff] }
 0x3eb   :  { %2394 = vmatprep.subr.bf16.mxu0 %v6352_v9  ;;  %v6424_v6 = vcombine.high %v820_v0, %v824_v2  ;;  %v688_v8 = vld [vmem:[%s10338_s5 + $0x3b8] sm:$0xff] }
 0x3ec   :  { %2354 = vmatpush1.bf16.msra.mxu1 %v6223_v12  ;;  %v812_v9 = vld [vmem:[%s10338_s5 + $0x798] sm:$0xff]  ;;  %v6423_v12 = vcombine.low %v820_v0, %v824_v2  ;;  %v6287_v18 = vcombine.low %v684_v7, %v688_v8  ;;  %v8827_v0 = vrot.slane %v8817_v57, %v8228_v54 }
 0x3ed   :  { %2395 = vmatpush1.bf16.msra.mxu0 %v6351_v13  ;;  %2355 = vmatprep.subr.bf16.mxu1 %v6216_v14  ;;  %v6288_v13 = vcombine.high %v684_v7, %v688_v8  ;;  %v6416_v14 = vcombine.high %v812_v9, %v816_v10  ;;  %v808_v29 = vld [vmem:[%s10338_s5 + $0x778] sm:$0xff] }
 0x3ee   :  { %2396 = vmatprep.subr.bf16.mxu0 %v6344_v15  ;;  %v676_v15 = vld [vmem:[%s10338_s5 + $0x358] sm:$0xff]  ;;  %v2458_v8 = vcombine.high %v8827_v0, %v8827_v0 }
 0x3ef   :  { %v6279_v34 = vcombine.low %v676_v15, %v680_v16  ;;  %v776_v56 = vld [vmem:[%s10338_s5 + $0x678] sm:$0xff] }
 0x3f0   :  { %2356 = vmatpush1.bf16.msra.mxu1 %v6215_v31  ;;  %v6415_v31 = vcombine.low %v812_v9, %v816_v10  ;;  %v636_v62 = vld [vmem:[%s10338_s5 + $0x218] sm:$0xff] }
 0x3f1   :  { %2397 = vmatpush1.bf16.msra.mxu0 %v6343_v19  ;;  %2357 = vmatprep.subr.bf16.mxu1 %v6208_v20  ;;  %v6280_v19 = vcombine.high %v676_v15, %v680_v16  ;;  %v6408_v20 = vcombine.high %v804_v17, %v808_v29  ;;  %v640_v63 = vld [vmem:[%s10338_s5 + $0x238] sm:$0xff]  ;;  %v7029_v15 = vld [vmem:[%s10340_s7 + $0x154] ss:$28 sps:$4 sm:$0xff]   ;;  %v7036_v16 = vld [vmem:[%s10340_s7 + $0x508] ss:$28 sps:$4 sm:$0xff]  }
 0x3f2   :  { %2398 = vmatprep.subr.bf16.mxu0 %v6336_v21  ;;  %v668_v21 = vld [vmem:[%s10338_s5 + $0x318] sm:$0xff]  ;;  %v6239_v9 = vcombine.low %v636_v62, %v640_v63 }
 0x3f3   :  { %v6271_v41 = vcombine.low %v668_v21, %v672_v22  ;;  %v764_v2 = vld [vmem:[%s10338_s5 + $0x618] sm:$0xff] }
 0x3f4   :  { %2358 = vmatpush1.bf16.msra.mxu1 %v6207_v35  ;;  %v6407_v35 = vcombine.low %v804_v17, %v808_v29  ;;  %v7044_v29 = vld [vmem:[%s10340_s7 + $0x4d4] ss:$28 sps:$4 sm:$0xff]  }
 0x3f5   :  { %2399 = vmatpush1.bf16.msra.mxu0 %v6335_v36  ;;  %2359 = vmatprep.subr.bf16.mxu1 %v6200_v28  ;;  %v6272_v36 = vcombine.high %v668_v21, %v672_v22  ;;  %v6400_v28 = vcombine.high %v796_v23, %v800_v24  ;;  %v7032_v22 = vld [vmem:[%s10340_s7 + $0x11c] ss:$28 sps:$4 sm:$0xff]  }
 0x3f6   :  { %2400 = vmatprep.subr.bf16.mxu0 %v6328_v37  ;;  %v660_v37 = vld [vmem:[%s10338_s5 + $0x2d8] sm:$0xff] }
 0x3f7   :  { %v6263_v48 = vcombine.low %v660_v37, %v664_v38 }
 0x3f8   :  { %2360 = vmatpush1.bf16.msra.mxu1 %v6199_v42  ;;  %v6399_v42 = vcombine.low %v796_v23, %v800_v24  ;;  %v7050_v24 = vld [vmem:[%s10340_s7 + $0x49c] ss:$28 sps:$4 sm:$0xff]  }
 0x3f9   :  { %2401 = vmatpush1.bf16.msra.mxu0 %v6327_v43  ;;  %2361 = vmatprep.subr.bf16.mxu1 %v6192_v44  ;;  %v6264_v43 = vcombine.high %v660_v37, %v664_v38  ;;  %v6392_v44 = vcombine.high %v788_v39, %v792_v40 }
 0x3fa   :  { %2402 = vmatprep.subr.bf16.mxu0 %v6320_v1  ;;  %v652_v1 = vld [vmem:[%s10338_s5 + $0x298] sm:$0xff] }
 0x3fc   :  { %2362 = vmatpush1.bf16.msra.mxu1 %v6191_v49  ;;  %v6391_v49 = vcombine.low %v788_v39, %v792_v40  ;;  %v7035_v39 = vld [vmem:[%s10340_s7 + $0xe4] ss:$28 sps:$4 sm:$0xff]   ;;  %v7048_v40 = vld [vmem:[%s10340_s7 + $0x498] ss:$28 sps:$4 sm:$0xff]  }
 0x3fd   :  { %2403 = vmatpush1.bf16.msra.mxu0 %v6319_v50  ;;  %2363 = vmatprep.subr.bf16.mxu1 %v6184_v51  ;;  %v6256_v50 = vcombine.high %v652_v1, %v656_v45  ;;  %v6384_v51 = vcombine.high %v780_v46, %v784_v47 }
 0x3fe   :  { %2404 = vmatprep.subr.bf16.mxu0 %v6312_v52  ;;  %v644_v52 = vld [vmem:[%s10338_s5 + $0x258] sm:$0xff] }
 0x400   :  { %2364 = vmatpush1.bf16.msra.mxu1 %v6183_v58  ;;  %v6255_v58 = vcombine.low %v652_v1, %v656_v45  ;;  %v7041_v1 = vld [vmem:[%s10340_s7 + $0xac] ss:$28 sps:$4 sm:$0xff]   ;;  %v7054_v45 = vld [vmem:[%s10340_s7 + $0x460] ss:$28 sps:$4 sm:$0xff]  }
 0x401   :  { %2405 = vmatpush1.bf16.msra.mxu0 %v6311_v59  ;;  %2365 = vmatprep.subr.bf16.mxu1 %v6176_v60  ;;  %v6383_v59 = vcombine.low %v780_v46, %v784_v47  ;;  %v6248_v60 = vcombine.high %v644_v52, %v648_v53  ;;  %v7062_v46 = vld [vmem:[%s10340_s7 + $0x42c] ss:$28 sps:$4 sm:$0xff]  }
 0x402   :  { %2406 = vmatprep.subr.bf16.mxu0 %v6304_v61  ;;  %v6376_v61 = vcombine.high %v772_v55, %v776_v56  ;;  %v7039_v47 = vld [vmem:[%s10340_s7 + $0xa8] ss:$28 sps:$4 sm:$0xff]  }
 0x404   :  { %2366 = vmatpush1.bf16.msra.mxu1 %v6175_v3  ;;  %v768_v3 = vld [vmem:[%s10338_s5 + $0x638] sm:$0xff] }
 0x405   :  { %2407 = vmatpush1.bf16.msra.mxu0 %v6303_v4  ;;  %2367 = vmatprep.subr.bf16.mxu1 %v6296_v5  ;;  %v6247_v4 = vcombine.low %v644_v52, %v648_v53  ;;  %v6375_v5 = vcombine.low %v772_v55, %v776_v56  ;;  %v6368_v7 = vcombine.high %v764_v2, %v768_v3  ;;  %v7053_v52 = vld [vmem:[%s10340_s7 + $0x3c] ss:$28 sps:$4 sm:$0xff]   ;;  %v7066_v53 = vld [vmem:[%s10340_s7 + $0x3f0] ss:$28 sps:$4 sm:$0xff]  }
 0x406   :  { %2408 = vmatprep.subr.bf16.mxu0 %v6424_v6  ;;  %v6240_v6 = vcombine.high %v636_v62, %v640_v63  ;;  %v6367_v10 = vcombine.low %v764_v2, %v768_v3  ;;  %v7074_v55 = vld [vmem:[%s10340_s7 + $0x3bc] ss:$28 sps:$4 sm:$0xff]   ;;  %v7065_v62 = vld [vmem:[%s10340_s7 + $0x34c] ss:$28 sps:$4 sm:$0xff]  }
 0x407   :  { %v7051_v56 = vld [vmem:[%s10340_s7 + $0x38] ss:$28 sps:$4 sm:$0xff]   ;;  %v7078_v63 = vld [vmem:[%s10340_s7 + $0x380] ss:$28 sps:$4 sm:$0xff]   ;;  %v7086_v2 = vld [vmem:[%s10340_s7 + $0x6cc] ss:$28 sps:$4 sm:$0xff]  }
 0x408   :  { %2368 = vmatpush2.bf16.msra.mxu1 %v6295_v11  ;;  %v7026_v11 = vld [vmem:[%s10340_s7 + $0x18c] ss:$28 sps:$4 sm:$0xff]  }
 0x409   :  { %2409 = vmatpush2.bf16.msra.mxu0 %v6423_v12  ;;  %2369 = vmatprep.subr.bf16.mxu1 %v6288_v13  ;;  %v8841_v12 = vrot.slane %v2458_v8, %v8228_v54  ;;  %v7038_v13 = vld [vmem:[%s10340_s7 + $0x50c] ss:$28 sps:$4 sm:$0xff]   ;;  %v7077_v8 = vld [vmem:[%s10340_s7 + $0x2dc] ss:$28 sps:$4 sm:$0xff]  }
 0x40a   :  { %2410 = vmatprep.subr.bf16.mxu0 %v6416_v14  ;;  %v7024_v14 = vld [vmem:[%s10340_s7 + $0x188] ss:$28 sps:$4 sm:$0xff]  }
 0x40b   :  { %v2500_v17 = vpack.i.b16 %v8841_v12, %v8841_v12  ;;  %v7063_v3 = vld [vmem:[%s10340_s7 + $0x348] ss:$28 sps:$4 sm:$0xff]  }
 0x40c   :  { %2370 = vmatpush2.bf16.msra.mxu1 %v6287_v18 }
 0x40d   :  { %2411 = vmatpush2.bf16.msra.mxu0 %v6415_v31  ;;  %2371 = vmatprep.subr.bf16.mxu1 %v6280_v19  ;;  %v7027_v19 = vld [vmem:[%s10340_s7 + $0x150] ss:$28 sps:$4 sm:$0xff]  }
 0x40e   :  { %2412 = vmatprep.subr.bf16.mxu0 %v6408_v20 }
 0x410   :  { %2372 = vmatpush2.bf16.msra.mxu1 %v6279_v34 }
 0x411   :  { %2413 = vmatpush2.bf16.msra.mxu0 %v6407_v35  ;;  %2373 = vmatprep.subr.bf16.mxu1 %v6272_v36 }
 0x412   :  { %2414 = vmatprep.subr.bf16.mxu0 %v6400_v28  ;;  %v7030_v28 = vld [vmem:[%s10340_s7 + $0x118] ss:$28 sps:$4 sm:$0xff]  }
 0x414   :  { %2374 = vmatpush2.bf16.msra.mxu1 %v6271_v41 }
 0x415   :  { %2415 = vmatpush2.bf16.msra.mxu0 %v6399_v42  ;;  %2375 = vmatprep.subr.bf16.mxu1 %v6264_v43  ;;  %v7056_v42 = vld [vmem:[%s10340_s7 + $0x464] ss:$28 sps:$4 sm:$0xff]  }
 0x416   :  { %2416 = vmatprep.subr.bf16.mxu0 %v6392_v44  ;;  %v7033_v44 = vld [vmem:[%s10340_s7 + $0xe0] ss:$28 sps:$4 sm:$0xff]  }
 0x418   :  { %2376 = vmatpush2.bf16.msra.mxu1 %v6263_v48  ;;  %v7047_v48 = vld [vmem:[%s10340_s7 + $0x74] ss:$28 sps:$4 sm:$0xff]  }
 0x419   :  { %2417 = vmatpush2.bf16.msra.mxu0 %v6391_v49  ;;  %2377 = vmatprep.subr.bf16.mxu1 %v6256_v50  ;;  %v7060_v49 = vld [vmem:[%s10340_s7 + $0x428] ss:$28 sps:$4 sm:$0xff]   ;;  %v7068_v50 = vld [vmem:[%s10340_s7 + $0x3f4] ss:$28 sps:$4 sm:$0xff]  }
 0x41a   :  { %2418 = vmatprep.subr.bf16.mxu0 %v6384_v51  ;;  %v7045_v51 = vld [vmem:[%s10340_s7 + $0x70] ss:$28 sps:$4 sm:$0xff]  }
 0x41c   :  { %2378 = vmatpush2.bf16.msra.mxu1 %v6255_v58  ;;  %v7059_v58 = vld [vmem:[%s10340_s7 + $0x4] ss:$28 sps:$4 sm:$0xff]  }
 0x41d   :  { %2419 = vmatpush2.bf16.msra.mxu0 %v6383_v59  ;;  %2379 = vmatprep.subr.bf16.mxu1 %v6248_v60  ;;  %v7072_v59 = vld [vmem:[%s10340_s7 + $0x3b8] ss:$28 sps:$4 sm:$0xff]   ;;  %v7080_v60 = vld [vmem:[%s10340_s7 + $0x384] ss:$28 sps:$4 sm:$0xff]  }
 0x41e   :  { %2420 = vmatprep.subr.bf16.mxu0 %v6376_v61  ;;  %v7057_v61 = vld [vmem:[%s10340_s7] ss:$28 sps:$4 sm:$0xff]  }
 0x420   :  { %2380 = vmatpush2.bf16.msra.mxu1 %v6247_v4  ;;  %v7071_v4 = vld [vmem:[%s10340_s7 + $0x314] ss:$28 sps:$4 sm:$0xff]  }
 0x421   :  { %2421 = vmatpush2.bf16.msra.mxu0 %v6375_v5  ;;  %2381 = vmatprep.subr.bf16.mxu1 %v6240_v6  ;;  %v7084_v5 = vld [vmem:[%s10340_s7 + $0x6c8] ss:$28 sps:$4 sm:$0xff]   ;;  %v7092_v6 = vld [vmem:[%s10340_s7 + $0x694] ss:$28 sps:$4 sm:$0xff]  }
 0x422   :  { %2422 = vmatprep.subr.bf16.mxu0 %v6368_v7  ;;  %v7069_v7 = vld [vmem:[%s10340_s7 + $0x310] ss:$28 sps:$4 sm:$0xff]  }
 0x424   :  { %2382 = vmatpush2.bf16.msra.mxu1 %v6239_v9  ;;  %v7090_v9 = vld [vmem:[%s10340_s7 + $0x690] ss:$28 sps:$4 sm:$0xff]  }
 0x425   :  { %2423 = vmatpush2.bf16.msra.mxu0 %v6367_v10  ;;  %5417 = vmatprep.subr.bf16.mxu1 %v7026_v11  ;;  %v7098_v10 = vld [vmem:[%s10340_s7 + $0x65c] ss:$28 sps:$4 sm:$0xff]  }
 0x426   :  { %5458 = vmatprep.subr.bf16.mxu0 %v7038_v13  ;;  %v7075_v11 = vld [vmem:[%s10340_s7 + $0x2d8] ss:$28 sps:$4 sm:$0xff]   ;;  %v7083_v13 = vld [vmem:[%s10340_s7 + $0x2a4] ss:$28 sps:$4 sm:$0xff]  }
 0x427   :  { %2384 = vmatmul.mubr.bf16.vlgmr.msra.gmra.mxu1 %v8255_v32  ;;  %v8861_v18 = vpop.f32.mrf.mxu1  ;;  %v8863_v31 = vpop.f32.mrf.mxu0  ;;  %v7042_v32 = vld [vmem:[%s10340_s7 + $0x4d0] ss:$28 sps:$4 sm:$0xff]  }
 0x428   :  { %2425 = vmatmul.mubr.bf16.vlgmr.msra.gmra.mxu0 %v8258_v33  ;;  %5418 = vmatpush1.bf16.msra.mxu1 %v7024_v14  ;;  %v2505_v33 = vrot.slane %v2500_v17, %v7998_v27  ;;  %v7096_v14 = vld [vmem:[%s10340_s7 + $0x658] ss:$28 sps:$4 sm:$0xff]   ;;  %v7089_v17 = vld [vmem:[%s10340_s7 + $0x26c] ss:$28 sps:$4 sm:$0xff]  }
 0x429   :  { %v2141_v20 = vpop.f32.mrf.mxu1  ;;  %v2182_v21 = vpop.f32.mrf.mxu0  ;;  %5419 = vmatprep.subr.bf16.mxu1 %v7029_v15  ;;  %5459 = vmatpush1.bf16.msra.mxu0 %v7036_v16  ;;  %v7104_v15 = vld [vmem:[%s10340_s7 + $0x624] ss:$28 sps:$4 sm:$0xff]  }
 0x42a   :  { %v2183_v23 = vadd.f32 %v2182_v21, %v2141_v20  ;;  %5460 = vmatprep.subr.bf16.mxu0 %v7044_v29  ;;  %v7081_v16 = vld [vmem:[%s10340_s7 + $0x2a0] ss:$28 sps:$4 sm:$0xff]   ;;  %v7087_v20 = vld [vmem:[%s10340_s7 + $0x268] ss:$28 sps:$4 sm:$0xff]   ;;  %v2466_v21 = vrot.slane %v8827_v0, %v8228_v54  ;;  %v7093_v0 = vld [vmem:[%s10340_s7 + $0x230] ss:$28 sps:$4 sm:$0xff]  }
 0x42b   :  { %v2143_v34 = vpop.f32.mrf.mxu1  ;;  %v2184_v35 = vpop.f32.mrf.mxu0  ;;  %v7102_v29 = vld [vmem:[%s10340_s7 + $0x620] ss:$28 sps:$4 sm:$0xff]  }
 0x42c   :  { %v2434_v36 = vpack.c.bf16 %v2183_v23, %v2183_v23  ;;  %5420 = vmatpush1.bf16.msra.mxu1 %v7027_v19  ;;  %v7110_v19 = vld [vmem:[%s10340_s7 + $0x5ec] ss:$28 sps:$4 sm:$0xff]   ;;  %v7113_v23 = vld [vmem:[%s10340_s7 + $0x5b4] ss:$28 sps:$4 sm:$0xff]   ;;  %v7101_v34 = vld [vmem:[%s10340_s7 + $0x1fc] ss:$28 sps:$4 sm:$0xff]  }
 0x42d   :  { %v2144_v37 = vpop.f32.mrf.mxu1  ;;  %v2185_v38 = vpop.f32.mrf.mxu0  ;;  %5421 = vmatprep.subr.bf16.mxu1 %v7032_v22  ;;  %5461 = vmatpush1.bf16.msra.mxu0 %v7042_v32  ;;  %v7095_v22 = vld [vmem:[%s10340_s7 + $0x234] ss:$28 sps:$4 sm:$0xff]   ;;  %v7108_v32 = vld [vmem:[%s10340_s7 + $0x5e8] ss:$28 sps:$4 sm:$0xff]  }
 0x42e   :  { %v2549_v41 = vadd.bf16 %v2505_v33, %v2434_v36  ;;  %5462 = vmatprep.subr.bf16.mxu0 %v7050_v24  ;;  %v2181_v33 = vadd.f32 %v8863_v31, %v8861_v18  ;;  %v2493_v24 = vpack.i.b16 %v2466_v21, %v2466_v21  ;;  %v7111_v35 = vld [vmem:[%s10340_s7 + $0x5b0] ss:$28 sps:$4 sm:$0xff]   ;;  %v7116_v36 = vld [vmem:[%s10340_s7 + $0x57c] ss:$28 sps:$4 sm:$0xff]   ;;  %v7107_v37 = vld [vmem:[%s10340_s7 + $0x1c4] ss:$28 sps:$4 sm:$0xff]  }
 0x42f   :  { %v7099_v18 = vld [vmem:[%s10340_s7 + $0x1f8] ss:$28 sps:$4 sm:$0xff]  }
 0x430   :  { %v8892_v43 = vmax.bf16 %v7706_v25, %v2549_v41  ;;  %5422 = vmatpush1.bf16.msra.mxu1 %v7030_v28  ;;  %v2433_v31 = vpack.c.bf16 %v2181_v33, %v2181_v33  ;;  %v2498_v28 = vrot.slane %v2493_v24, %v7998_v27  ;;  %v7114_v38 = vld [vmem:[%s10340_s7 + $0x578] ss:$28 sps:$4 sm:$0xff]   ;;  %v7187_v24 = vld [vmem:[%s10340_s7 + $0xb60] ss:$28 sps:$4 sm:$0xff]  }
 0x431   :  { %5423 = vmatprep.subr.bf16.mxu1 %v7035_v39  ;;  %5463 = vmatpush1.bf16.msra.mxu0 %v7048_v40  ;;  %v7119_v39 = vld [vmem:[%s10340_s7 + $0x544] ss:$28 sps:$4 sm:$0xff]   ;;  %v7138_v33 = vld [vmem:[%s10340_s7 + $0x738] ss:$28 sps:$4 sm:$0xff]  }
 0x432   :  { %5449 = vmatprep.mubr.bf16.mxu1 %v8892_v43  ;;  %5464 = vmatprep.subr.bf16.mxu0 %v7056_v42  ;;  %v7105_v40 = vld [vmem:[%s10340_s7 + $0x1c0] ss:$28 sps:$4 sm:$0xff]   ;;  %v2548_v41 = vadd.bf16 %v2498_v28, %v2433_v31  ;;  %v2488_v42 = vcombine.high %v2466_v21, %v2466_v21  ;;  %v7146_v31 = vld [vmem:[%s10340_s7 + $0xa4c] ss:$28 sps:$4 sm:$0xff]   ;;  %v7201_v28 = vld [vmem:[%s10340_s7 + $0xaf4] ss:$28 sps:$4 sm:$0xff]  }
 0x433   :  { %v7183_v21 = vld [vmem:[%s10340_s7 + $0xb9c] ss:$28 sps:$4 sm:$0xff]  }
 0x434   :  { %5424 = vmatpush1.bf16.msra.mxu1 %v7033_v44  ;;  %v7117_v44 = vld [vmem:[%s10340_s7 + $0x540] ss:$28 sps:$4 sm:$0xff]  }
 0x435   :  { %5425 = vmatprep.subr.bf16.mxu1 %v7041_v1  ;;  %5465 = vmatpush1.bf16.msra.mxu0 %v7054_v45  ;;  %v7122_v1 = vld [vmem:[%s10340_s7 + $0x88c] ss:$28 sps:$4 sm:$0xff]   ;;  %v2490_v45 = vcombine.high %v8841_v12, %v8841_v12  ;;  %v7125_v12 = vld [vmem:[%s10340_s7 + $0x854] ss:$28 sps:$4 sm:$0xff]  }
 0x436   :  { %5466 = vmatprep.subr.bf16.mxu0 %v7062_v46  ;;  %v7171_v46 = vld [vmem:[%s10340_s7 + $0xc0c] ss:$28 sps:$4 sm:$0xff]  }
 0x438   :  { %5426 = vmatpush1.bf16.msra.mxu1 %v7039_v47  ;;  %v7120_v47 = vld [vmem:[%s10340_s7 + $0x888] ss:$28 sps:$4 sm:$0xff]  }
 0x439   :  { %5427 = vmatprep.subr.bf16.mxu1 %v7047_v48  ;;  %5467 = vmatpush1.bf16.msra.mxu0 %v7060_v49  ;;  %v9062_v48 = vmax.bf16 %v7706_v25, %v2548_v41  ;;  %v2507_v49 = vpack.i.b16 %v2488_v42, %v2488_v42  ;;  %v7147_v41 = vld [vmem:[%s10340_s7 + $0xa10] ss:$28 sps:$4 sm:$0xff]   ;;  %v7205_v42 = vld [vmem:[%s10340_s7 + $0xab8] ss:$28 sps:$4 sm:$0xff]  }
 0x43a   :  { %5468 = vmatprep.subr.bf16.mxu0 %v7068_v50  ;;  %v2514_v50 = vpack.i.b16 %v2490_v45, %v2490_v45  ;;  %v7150_v45 = vld [vmem:[%s10340_s7 + $0x9d8] ss:$28 sps:$4 sm:$0xff]  }
 0x43c   :  { %5428 = vmatpush1.bf16.msra.mxu1 %v7045_v51 }
 0x43d   :  { %5429 = vmatprep.subr.bf16.mxu1 %v7053_v52  ;;  %5469 = vmatpush1.bf16.msra.mxu0 %v7066_v53 }
 0x43e   :  { %5470 = vmatprep.subr.bf16.mxu0 %v7074_v55  ;;  %v7123_v55 = vld [vmem:[%s10340_s7 + $0x850] ss:$28 sps:$4 sm:$0xff]  }
 0x440   :  { %5430 = vmatpush1.bf16.msra.mxu1 %v7051_v56  ;;  %v2512_v56 = vrot.slane %v2507_v49, %v7998_v27  ;;  %v7219_v49 = vld [vmem:[%s10340_s7 + $0xdcc] ss:$28 sps:$4 sm:$0xff]  }
 0x441   :  { %5431 = vmatprep.subr.bf16.mxu1 %v7059_v58  ;;  %5471 = vmatpush1.bf16.msra.mxu0 %v7072_v59 }
 0x442   :  { %5472 = vmatprep.subr.bf16.mxu0 %v7080_v60  ;;  %v7128_v60 = vld [vmem:[%s10340_s7 + $0x81c] ss:$28 sps:$4 sm:$0xff]  }
 0x444   :  { %5432 = vmatpush1.bf16.msra.mxu1 %v7057_v61 }
 0x445   :  { %5433 = vmatprep.subr.bf16.mxu1 %v7065_v62  ;;  %5473 = vmatpush1.bf16.msra.mxu0 %v7078_v63  ;;  %v2519_v63 = vrot.slane %v2514_v50, %v7998_v27  ;;  %v7217_v50 = vld [vmem:[%s10340_s7 + $0xdc8] ss:$28 sps:$4 sm:$0xff]  }
 0x446   :  { %5474 = vmatprep.subr.bf16.mxu0 %v7086_v2 }
 0x448   :  { %5434 = vmatpush2.bf16.msra.mxu1 %v7063_v3 }
 0x449   :  { %5435 = vmatprep.subr.bf16.mxu1 %v7071_v4  ;;  %5475 = vmatpush2.bf16.msra.mxu0 %v7084_v5  ;;  %v7126_v5 = vld [vmem:[%s10340_s7 + $0x818] ss:$28 sps:$4 sm:$0xff]  }
 0x44a   :  { %5476 = vmatprep.subr.bf16.mxu0 %v7092_v6 }
 0x44c   :  { %5436 = vmatpush2.bf16.msra.mxu1 %v7069_v7 }
 0x44d   :  { %5437 = vmatprep.subr.bf16.mxu1 %v7077_v8  ;;  %5477 = vmatpush2.bf16.msra.mxu0 %v7090_v9  ;;  %v7131_v9 = vld [vmem:[%s10340_s7 + $0x7e4] ss:$28 sps:$4 sm:$0xff]  }
 0x44e   :  { %5478 = vmatprep.subr.bf16.mxu0 %v7098_v10 }
 0x450   :  { %5438 = vmatpush2.bf16.msra.mxu1 %v7075_v11 }
 0x451   :  { %5439 = vmatprep.subr.bf16.mxu1 %v7083_v13  ;;  %5479 = vmatpush2.bf16.msra.mxu0 %v7096_v14  ;;  %v7129_v13 = vld [vmem:[%s10340_s7 + $0x7e0] ss:$28 sps:$4 sm:$0xff]   ;;  %v7169_v14 = vld [vmem:[%s10340_s7 + $0xc08] ss:$28 sps:$4 sm:$0xff]  }
 0x452   :  { %5480 = vmatprep.subr.bf16.mxu0 %v7104_v15 }
 0x454   :  { %5440 = vmatpush2.bf16.msra.mxu1 %v7081_v16  ;;  %v7134_v16 = vld [vmem:[%s10340_s7 + $0x7ac] ss:$28 sps:$4 sm:$0xff]  }
 0x455   :  { %5441 = vmatprep.subr.bf16.mxu1 %v7089_v17  ;;  %5481 = vmatpush2.bf16.msra.mxu0 %v7102_v29  ;;  %v7177_v17 = vld [vmem:[%s10340_s7 + $0xbd4] ss:$28 sps:$4 sm:$0xff]   ;;  %v7132_v29 = vld [vmem:[%s10340_s7 + $0x7a8] ss:$28 sps:$4 sm:$0xff]  }
 0x456   :  { %5482 = vmatprep.subr.bf16.mxu0 %v7110_v19  ;;  %v7175_v19 = vld [vmem:[%s10340_s7 + $0xbd0] ss:$28 sps:$4 sm:$0xff]  }
 0x458   :  { %5442 = vmatpush2.bf16.msra.mxu1 %v7087_v20  ;;  %v7137_v20 = vld [vmem:[%s10340_s7 + $0x774] ss:$28 sps:$4 sm:$0xff]  }
 0x459   :  { %5443 = vmatprep.subr.bf16.mxu1 %v7095_v22  ;;  %5483 = vmatpush2.bf16.msra.mxu0 %v7108_v32  ;;  %v7135_v22 = vld [vmem:[%s10340_s7 + $0x770] ss:$28 sps:$4 sm:$0xff]   ;;  %v7181_v32 = vld [vmem:[%s10340_s7 + $0xb98] ss:$28 sps:$4 sm:$0xff]  }
 0x45a   :  { %5484 = vmatprep.subr.bf16.mxu0 %v7113_v23  ;;  %v7140_v23 = vld [vmem:[%s10340_s7 + $0x73c] ss:$28 sps:$4 sm:$0xff]  }
 0x45c   :  { %5444 = vmatpush2.bf16.msra.mxu1 %v7093_v0  ;;  %v7189_v0 = vld [vmem:[%s10340_s7 + $0xb64] ss:$28 sps:$4 sm:$0xff]  }
 0x45d   :  { %5445 = vmatprep.subr.bf16.mxu1 %v7101_v34  ;;  %5485 = vmatpush2.bf16.msra.mxu0 %v7111_v35  ;;  %v7143_v34 = vld [vmem:[%s10340_s7 + $0x704] ss:$28 sps:$4 sm:$0xff]   ;;  %v7195_v35 = vld [vmem:[%s10340_s7 + $0xb2c] ss:$28 sps:$4 sm:$0xff]  }
 0x45e   :  { %5486 = vmatprep.subr.bf16.mxu0 %v7116_v36  ;;  %v7141_v36 = vld [vmem:[%s10340_s7 + $0x700] ss:$28 sps:$4 sm:$0xff]  }
 0x460   :  { %5446 = vmatpush2.bf16.msra.mxu1 %v7099_v18  ;;  %v7193_v18 = vld [vmem:[%s10340_s7 + $0xb28] ss:$28 sps:$4 sm:$0xff]  }
 0x461   :  { %5447 = vmatprep.subr.bf16.mxu1 %v7107_v37  ;;  %5487 = vmatpush2.bf16.msra.mxu0 %v7114_v38  ;;  %v7144_v37 = vld [vmem:[%s10340_s7 + $0xa48] ss:$28 sps:$4 sm:$0xff]   ;;  %v7199_v38 = vld [vmem:[%s10340_s7 + $0xaf0] ss:$28 sps:$4 sm:$0xff]  }
 0x462   :  { %5488 = vmatprep.subr.bf16.mxu0 %v7119_v39  ;;  %v7149_v39 = vld [vmem:[%s10340_s7 + $0xa14] ss:$28 sps:$4 sm:$0xff]  }
 0x464   :  { %5448 = vmatpush2.bf16.msra.mxu1 %v7105_v40  ;;  %v7207_v40 = vld [vmem:[%s10340_s7 + $0xabc] ss:$28 sps:$4 sm:$0xff]  }
 0x465   :  { %5489 = vmatpush2.bf16.msra.mxu0 %v7117_v44  ;;  %5499 = vmatprep.subr.bf16.mxu1 %v7122_v1  ;;  %v7152_v44 = vld [vmem:[%s10340_s7 + $0x9dc] ss:$28 sps:$4 sm:$0xff]   ;;  %v7213_v1 = vld [vmem:[%s10340_s7 + $0xa84] ss:$28 sps:$4 sm:$0xff]  }
 0x466   :  { %5540 = vmatprep.subr.bf16.mxu0 %v7171_v46  ;;  %v7211_v46 = vld [vmem:[%s10340_s7 + $0xa80] ss:$28 sps:$4 sm:$0xff]  }
 0x467   :  { %v2221_v51 = vpop.f32.mrf.mxu1  ;;  %v2262_v52 = vpop.f32.mrf.mxu0  ;;  %5450 = vmatmul.mubr.bf16.vlgmr.msra.gmra.mxu1 %v9062_v48 }
 0x468   :  { %v2263_v53 = vadd.f32 %v2262_v52, %v2221_v51  ;;  %5500 = vmatpush1.bf16.msra.mxu1 %v7120_v47  ;;  %v7155_v47 = vld [vmem:[%s10340_s7 + $0x9a4] ss:$28 sps:$4 sm:$0xff]   ;;  %v7158_v51 = vld [vmem:[%s10340_s7 + $0x96c] ss:$28 sps:$4 sm:$0xff]   ;;  %v7225_v52 = vld [vmem:[%s10340_s7 + $0xd94] ss:$28 sps:$4 sm:$0xff]  }
 0x469   :  { %v2223_v58 = vpop.f32.mrf.mxu1  ;;  %v2264_v59 = vpop.f32.mrf.mxu0  ;;  %5501 = vmatprep.subr.bf16.mxu1 %v7125_v12  ;;  %v7153_v12 = vld [vmem:[%s10340_s7 + $0x9a0] ss:$28 sps:$4 sm:$0xff]  }
 0x46a   :  { %v2435_v61 = vpack.c.bf16 %v2263_v53, %v2263_v53  ;;  %v2265_v62 = vadd.f32 %v2264_v59, %v2223_v58  ;;  %v7156_v53 = vld [vmem:[%s10340_s7 + $0x968] ss:$28 sps:$4 sm:$0xff]   ;;  %v7231_v58 = vld [vmem:[%s10340_s7 + $0xd5c] ss:$28 sps:$4 sm:$0xff]   ;;  %v2443_v59 = vcombine.high %v8817_v57, %v8817_v57 }
 0x46b   :  { %v2225_v2 = vpop.f32.mrf.mxu1  ;;  %v2266_v3 = vpop.f32.mrf.mxu0  ;;  %v7237_v57 = vld [vmem:[%s10340_s7 + $0xd24] ss:$28 sps:$4 sm:$0xff]  }
 0x46c   :  { %v2436_v4 = vpack.c.bf16 %v2265_v62, %v2265_v62  ;;  %5502 = vmatpush1.bf16.msra.mxu1 %v7123_v55  ;;  %v2550_v6 = vadd.bf16 %v2512_v56, %v2435_v61  ;;  %v7223_v55 = vld [vmem:[%s10340_s7 + $0xd90] ss:$28 sps:$4 sm:$0xff]   ;;  %v7229_v61 = vld [vmem:[%s10340_s7 + $0xd58] ss:$28 sps:$4 sm:$0xff]   ;;  %v7235_v3 = vld [vmem:[%s10340_s7 + $0xd20] ss:$28 sps:$4 sm:$0xff]  }
 0x46d   :  { %v2226_v7 = vpop.f32.mrf.mxu1  ;;  %v2267_v8 = vpop.f32.mrf.mxu0  ;;  %5503 = vmatprep.subr.bf16.mxu1 %v7128_v60  ;;  %v7161_v56 = vld [vmem:[%s10340_s7 + $0x934] ss:$28 sps:$4 sm:$0xff]   ;;  %v7165_v62 = vld [vmem:[%s10340_s7 + $0x8fc] ss:$28 sps:$4 sm:$0xff]  }
 0x46e   :  { %v2551_v10 = vadd.bf16 %v2519_v63, %v2436_v4  ;;  %v9092_v15 = vmax.bf16 %v7706_v25, %v2550_v6  ;;  %v7159_v60 = vld [vmem:[%s10340_s7 + $0x930] ss:$28 sps:$4 sm:$0xff]   ;;  %v2457_v63 = vrot.slane %v2443_v59, %v8228_v54  ;;  %v7163_v2 = vld [vmem:[%s10340_s7 + $0x8f8] ss:$28 sps:$4 sm:$0xff]   ;;  %v7168_v4 = vld [vmem:[%s10340_s7 + $0x8c4] ss:$28 sps:$4 sm:$0xff]  }
 0x46f   :  { %v7166_v7 = vld [vmem:[%s10340_s7 + $0x8c0] ss:$28 sps:$4 sm:$0xff]   ;;  %v7241_v8 = vld [vmem:[%s10340_s7 + $0xce8] ss:$28 sps:$4 sm:$0xff]  }
 0x470   :  { %v9083_v11 = vmax.bf16 %v7706_v25, %v2551_v10  ;;  %5504 = vmatpush1.bf16.msra.mxu1 %v7126_v5  ;;  %v7243_v5 = vld [vmem:[%s10340_s7 + $0xcec] ss:$28 sps:$4 sm:$0xff]   ;;  %v2459_v6 = vcombine.high %v2457_v63, %v2457_v63  ;;  %v7249_v10 = vld [vmem:[%s10340_s7 + $0xcb4] ss:$28 sps:$4 sm:$0xff]  }
 0x471   :  { %5505 = vmatprep.subr.bf16.mxu1 %v7131_v9  ;;  %v7174_v9 = vld [vmem:[%s10340_s7 + $0x194] ss:$28 sps:$4 sm:$0xff]   ;;  %v7216_v59 = vld [vmem:[%s10340_s7 + $0xc] ss:$28 sps:$4 sm:$0xff]  }
 0x472   :  { %5490 = vmatprep.mubr.bf16.mxu0 %v9083_v11 }
 0x473   :  { %5491 = vmatmul.mubr.bf16.vlgmr.msra.gmra.mxu0 %v9092_v15 }
 0x474   :  { %5506 = vmatpush1.bf16.msra.mxu1 %v7129_v13  ;;  %5541 = vmatpush1.bf16.msra.mxu0 %v7169_v14  ;;  %v9250_v13 = vrot.slane %v2457_v63, %v8228_v54  ;;  %v9253_v14 = vrot.slane %v2459_v6, %v8228_v54  ;;  %v7226_v63 = vld [vmem:[%s10340_s7 + $0x318] ss:$28 sps:$4 sm:$0xff]  }
 0x475   :  { %5507 = vmatprep.subr.bf16.mxu1 %v7134_v16  ;;  %5542 = vmatprep.subr.bf16.mxu0 %v7177_v17  ;;  %v7247_v16 = vld [vmem:[%s10340_s7 + $0xcb0] ss:$28 sps:$4 sm:$0xff]   ;;  %v7255_v17 = vld [vmem:[%s10340_s7 + $0xc7c] ss:$28 sps:$4 sm:$0xff]  }
 0x476   :  { %v2528_v54 = vpack.i.b16 %v9253_v14, %v9253_v14  ;;  %v7246_v6 = vld [vmem:[%s10340_s7 + $0x274] ss:$28 sps:$4 sm:$0xff]  }
 0x478   :  { %5508 = vmatpush1.bf16.msra.mxu1 %v7132_v29  ;;  %5543 = vmatpush1.bf16.msra.mxu0 %v7175_v19  ;;  %v2521_v29 = vpack.i.b16 %v9250_v13, %v9250_v13 }
 0x479   :  { %5509 = vmatprep.subr.bf16.mxu1 %v7137_v20  ;;  %5544 = vmatprep.subr.bf16.mxu0 %v7183_v21  ;;  %v7253_v21 = vld [vmem:[%s10340_s7 + $0xc78] ss:$28 sps:$4 sm:$0xff]  }
 0x47c   :  { %5510 = vmatpush1.bf16.msra.mxu1 %v7135_v22  ;;  %5545 = vmatpush1.bf16.msra.mxu0 %v7181_v32 }
 0x47d   :  { %5511 = vmatprep.subr.bf16.mxu1 %v7140_v23  ;;  %5546 = vmatprep.subr.bf16.mxu0 %v7189_v0  ;;  %v7261_v23 = vld [vmem:[%s10340_s7 + $0xc44] ss:$28 sps:$4 sm:$0xff]   ;;  %v2526_v0 = vrot.slane %v2521_v29, %v7998_v27 }
 0x47e   :  { %v7258_v29 = vld [vmem:[%s10340_s7 + $0x204] ss:$28 sps:$4 sm:$0xff]  }
 0x480   :  { %5512 = vmatpush1.bf16.msra.mxu1 %v7138_v33  ;;  %5547 = vmatpush1.bf16.msra.mxu0 %v7187_v24 }
 0x481   :  { %5513 = vmatprep.subr.bf16.mxu1 %v7143_v34  ;;  %5548 = vmatprep.subr.bf16.mxu0 %v7195_v35  ;;  %v2533_v35 = vrot.slane %v2528_v54, %v7998_v27 }
 0x484   :  { %5514 = vmatpush1.bf16.msra.mxu1 %v7141_v36  ;;  %5549 = vmatpush1.bf16.msra.mxu0 %v7193_v18 }
 0x485   :  { %5515 = vmatprep.subr.bf16.mxu1 %v7146_v31  ;;  %5550 = vmatprep.subr.bf16.mxu0 %v7201_v28  ;;  %v7259_v31 = vld [vmem:[%s10340_s7 + $0xc40] ss:$28 sps:$4 sm:$0xff]  }
 0x488   :  { %5516 = vmatpush2.bf16.msra.mxu1 %v7144_v37  ;;  %5551 = vmatpush1.bf16.msra.mxu0 %v7199_v38  ;;  %v7267_v38 = vld [vmem:[%s10340_s7 + $0x514] ss:$28 sps:$4 sm:$0xff]  }
 0x489   :  { %5517 = vmatprep.subr.bf16.mxu1 %v7149_v39  ;;  %5552 = vmatprep.subr.bf16.mxu0 %v7207_v40 }
 0x48c   :  { %5518 = vmatpush2.bf16.msra.mxu1 %v7147_v41  ;;  %5553 = vmatpush1.bf16.msra.mxu0 %v7205_v42 }
 0x48d   :  { %5519 = vmatprep.subr.bf16.mxu1 %v7152_v44  ;;  %5554 = vmatprep.subr.bf16.mxu0 %v7213_v1  ;;  %v7172_v44 = vld [vmem:[%s10340_s7 + $0x190] ss:$28 sps:$4 sm:$0xff]  }
 0x490   :  { %5520 = vmatpush2.bf16.msra.mxu1 %v7150_v45  ;;  %5555 = vmatpush1.bf16.msra.mxu0 %v7211_v46  ;;  %v7180_v45 = vld [vmem:[%s10340_s7 + $0x15c] ss:$28 sps:$4 sm:$0xff]  }
 0x491   :  { %5521 = vmatprep.subr.bf16.mxu1 %v7155_v47  ;;  %5556 = vmatprep.subr.bf16.mxu0 %v7219_v49  ;;  %v7178_v46 = vld [vmem:[%s10340_s7 + $0x158] ss:$28 sps:$4 sm:$0xff]   ;;  %v7186_v47 = vld [vmem:[%s10340_s7 + $0x124] ss:$28 sps:$4 sm:$0xff]  }
 0x492   :  { %v7184_v49 = vld [vmem:[%s10340_s7 + $0x120] ss:$28 sps:$4 sm:$0xff]  }
 0x494   :  { %5522 = vmatpush2.bf16.msra.mxu1 %v7153_v12  ;;  %5557 = vmatpush2.bf16.msra.mxu0 %v7217_v50  ;;  %v7192_v12 = vld [vmem:[%s10340_s7 + $0xec] ss:$28 sps:$4 sm:$0xff]  }
 0x495   :  { %5523 = vmatprep.subr.bf16.mxu1 %v7158_v51  ;;  %5558 = vmatprep.subr.bf16.mxu0 %v7225_v52  ;;  %v7190_v50 = vld [vmem:[%s10340_s7 + $0xe8] ss:$28 sps:$4 sm:$0xff]   ;;  %v7198_v51 = vld [vmem:[%s10340_s7 + $0xb4] ss:$28 sps:$4 sm:$0xff]  }
 0x496   :  { %v7196_v52 = vld [vmem:[%s10340_s7 + $0xb0] ss:$28 sps:$4 sm:$0xff]  }
 0x498   :  { %5524 = vmatpush2.bf16.msra.mxu1 %v7156_v53  ;;  %5559 = vmatpush2.bf16.msra.mxu0 %v7223_v55  ;;  %v7204_v53 = vld [vmem:[%s10340_s7 + $0x7c] ss:$28 sps:$4 sm:$0xff]  }
 0x499   :  { %5525 = vmatprep.subr.bf16.mxu1 %v7161_v56  ;;  %5560 = vmatprep.subr.bf16.mxu0 %v7231_v58  ;;  %v7202_v55 = vld [vmem:[%s10340_s7 + $0x78] ss:$28 sps:$4 sm:$0xff]   ;;  %v7210_v56 = vld [vmem:[%s10340_s7 + $0x44] ss:$28 sps:$4 sm:$0xff]  }
 0x49a   :  { %v7208_v58 = vld [vmem:[%s10340_s7 + $0x40] ss:$28 sps:$4 sm:$0xff]  }
 0x49c   :  { %5526 = vmatpush2.bf16.msra.mxu1 %v7159_v60  ;;  %5561 = vmatpush2.bf16.msra.mxu0 %v7229_v61  ;;  %v7214_v60 = vld [vmem:[%s10340_s7 + $0x8] ss:$28 sps:$4 sm:$0xff]   ;;  %v7222_v61 = vld [vmem:[%s10340_s7 + $0x354] ss:$28 sps:$4 sm:$0xff]  }
 0x49d   :  { %5527 = vmatprep.subr.bf16.mxu1 %v7165_v62  ;;  %5562 = vmatprep.subr.bf16.mxu0 %v7237_v57  ;;  %v7220_v62 = vld [vmem:[%s10340_s7 + $0x350] ss:$28 sps:$4 sm:$0xff]   ;;  %v7228_v57 = vld [vmem:[%s10340_s7 + $0x31c] ss:$28 sps:$4 sm:$0xff]  }
 0x4a0   :  { %5528 = vmatpush2.bf16.msra.mxu1 %v7163_v2  ;;  %5563 = vmatpush2.bf16.msra.mxu0 %v7235_v3  ;;  %v7234_v2 = vld [vmem:[%s10340_s7 + $0x2e4] ss:$28 sps:$4 sm:$0xff]  }
 0x4a1   :  { %5529 = vmatprep.subr.bf16.mxu1 %v7168_v4  ;;  %5564 = vmatprep.subr.bf16.mxu0 %v7243_v5  ;;  %v7232_v3 = vld [vmem:[%s10340_s7 + $0x2e0] ss:$28 sps:$4 sm:$0xff]   ;;  %v7240_v4 = vld [vmem:[%s10340_s7 + $0x2ac] ss:$28 sps:$4 sm:$0xff]  }
 0x4a2   :  { %v7238_v5 = vld [vmem:[%s10340_s7 + $0x2a8] ss:$28 sps:$4 sm:$0xff]  }
 0x4a4   :  { %5530 = vmatpush2.bf16.msra.mxu1 %v7166_v7  ;;  %5565 = vmatpush2.bf16.msra.mxu0 %v7241_v8  ;;  %v7244_v7 = vld [vmem:[%s10340_s7 + $0x270] ss:$28 sps:$4 sm:$0xff]   ;;  %v7252_v8 = vld [vmem:[%s10340_s7 + $0x23c] ss:$28 sps:$4 sm:$0xff]  }
 0x4a5   :  { %5581 = vmatprep.subr.bf16.mxu1 %v7174_v9  ;;  %5566 = vmatprep.subr.bf16.mxu0 %v7249_v10  ;;  %v2489_v9 = vcombine.high %v9250_v13, %v9250_v13  ;;  %v2491_v10 = vcombine.high %v9253_v14, %v9253_v14  ;;  %v7256_v14 = vld [vmem:[%s10340_s7 + $0x200] ss:$28 sps:$4 sm:$0xff]  }
 0x4a7   :  { %v2303_v19 = vpop.f32.mrf.mxu1  ;;  %v2542_v54 = vpack.i.b16 %v2491_v10, %v2491_v10  ;;  %v7307_v10 = vld [vmem:[%s10340_s7 + $0x388] ss:$28 sps:$4 sm:$0xff]  }
 0x4a8   :  { %v2344_v20 = vpop.f32.mrf.mxu0  ;;  %5567 = vmatpush2.bf16.msra.mxu0 %v7247_v16  ;;  %v7250_v16 = vld [vmem:[%s10340_s7 + $0x238] ss:$28 sps:$4 sm:$0xff]  }
 0x4a9   :  { %v2345_v22 = vadd.f32 %v2344_v20, %v2303_v19  ;;  %v2305_v32 = vpop.f32.mrf.mxu1  ;;  %5568 = vmatprep.subr.bf16.mxu0 %v7255_v17  ;;  %v2535_v17 = vpack.i.b16 %v2489_v9, %v2489_v9  ;;  %v7312_v9 = vld [vmem:[%s10340_s7 + $0x70c] ss:$28 sps:$4 sm:$0xff]  }
 0x4aa   :  { %v2346_v33 = vpop.f32.mrf.mxu0 }
 0x4ab   :  { %v2437_v24 = vpack.c.bf16 %v2345_v22, %v2345_v22  ;;  %v2347_v34 = vadd.f32 %v2346_v33, %v2305_v32  ;;  %v2307_v36 = vpop.f32.mrf.mxu1  ;;  %v2540_v22 = vrot.slane %v2535_v17, %v7998_v27  ;;  %v7315_v17 = vld [vmem:[%s10340_s7 + $0x6d4] ss:$28 sps:$4 sm:$0xff]  }
 0x4ac   :  { %v2348_v18 = vpop.f32.mrf.mxu0  ;;  %5569 = vmatpush2.bf16.msra.mxu0 %v7253_v21 }
 0x4ad   :  { %v2438_v28 = vpack.c.bf16 %v2347_v34, %v2347_v34  ;;  %v2308_v37 = vpop.f32.mrf.mxu1  ;;  %5570 = vmatprep.subr.bf16.mxu0 %v7261_v23  ;;  %v2552_v39 = vadd.bf16 %v2526_v0, %v2437_v24  ;;  %v7264_v23 = vld [vmem:[%s10340_s7 + $0x1cc] ss:$28 sps:$4 sm:$0xff]   ;;  %v2547_v24 = vrot.slane %v2542_v54, %v7998_v27 }
 0x4ae   :  { %v2349_v40 = vpop.f32.mrf.mxu0  ;;  %v7316_v54 = vld [vmem:[%s10340_s7 + $0xa50] ss:$28 sps:$4 sm:$0xff]  }
 0x4af   :  { %v2553_v41 = vadd.bf16 %v2533_v35, %v2438_v28  ;;  %v9286_v1 = vmax.bf16 %v7706_v25, %v2552_v39 }
 0x4b0   :  { %5571 = vmatpush2.bf16.msra.mxu0 %v7259_v31  ;;  %v7262_v31 = vld [vmem:[%s10340_s7 + $0x1c8] ss:$28 sps:$4 sm:$0xff]  }
 0x4b1   :  { %v9280_v42 = vmax.bf16 %v7706_v25, %v2553_v41  ;;  %5622 = vmatprep.subr.bf16.mxu0 %v7267_v38  ;;  %v7270_v38 = vld [vmem:[%s10340_s7 + $0x894] ss:$28 sps:$4 sm:$0xff]  }
 0x4b2   :  { %v7265_v41 = vld [vmem:[%s10340_s7 + $0x510] ss:$28 sps:$4 sm:$0xff]  }
 0x4b3   :  { %5531 = vmatprep.mubr.bf16.mxu1 %v9280_v42 }
 0x4b4   :  { %5532 = vmatmul.mubr.bf16.vlgmr.msra.gmra.mxu1 %v9286_v1 }
 0x4b5   :  { %5582 = vmatpush1.bf16.msra.mxu1 %v7172_v44  ;;  %5613 = vmatprep.mubr.bf16.mxu1 %v8892_v43  ;;  %v7268_v44 = vld [vmem:[%s10340_s7 + $0x890] ss:$28 sps:$4 sm:$0xff]  }
 0x4b6   :  { %5583 = vmatprep.subr.bf16.mxu1 %v7180_v45 }
 0x4b9   :  { %5584 = vmatpush1.bf16.msra.mxu1 %v7178_v46  ;;  %v7273_v46 = vld [vmem:[%s10340_s7 + $0x4dc] ss:$28 sps:$4 sm:$0xff]  }
 0x4ba   :  { %5585 = vmatprep.subr.bf16.mxu1 %v7186_v47  ;;  %v7276_v47 = vld [vmem:[%s10340_s7 + $0x85c] ss:$28 sps:$4 sm:$0xff]  }
 0x4bd   :  { %5586 = vmatpush1.bf16.msra.mxu1 %v7184_v49  ;;  %v7274_v49 = vld [vmem:[%s10340_s7 + $0x858] ss:$28 sps:$4 sm:$0xff]  }
 0x4be   :  { %5587 = vmatprep.subr.bf16.mxu1 %v7192_v12  ;;  %v7279_v12 = vld [vmem:[%s10340_s7 + $0x4a4] ss:$28 sps:$4 sm:$0xff]  }
 0x4c1   :  { %5588 = vmatpush1.bf16.msra.mxu1 %v7190_v50  ;;  %v7282_v50 = vld [vmem:[%s10340_s7 + $0x824] ss:$28 sps:$4 sm:$0xff]  }
 0x4c2   :  { %5589 = vmatprep.subr.bf16.mxu1 %v7198_v51  ;;  %v7277_v51 = vld [vmem:[%s10340_s7 + $0x4a0] ss:$28 sps:$4 sm:$0xff]  }
 0x4c5   :  { %5590 = vmatpush1.bf16.msra.mxu1 %v7196_v52  ;;  %v7280_v52 = vld [vmem:[%s10340_s7 + $0x820] ss:$28 sps:$4 sm:$0xff]  }
 0x4c6   :  { %5591 = vmatprep.subr.bf16.mxu1 %v7204_v53  ;;  %v7285_v53 = vld [vmem:[%s10340_s7 + $0x46c] ss:$28 sps:$4 sm:$0xff]  }
 0x4c9   :  { %5592 = vmatpush1.bf16.msra.mxu1 %v7202_v55  ;;  %v7288_v55 = vld [vmem:[%s10340_s7 + $0x7ec] ss:$28 sps:$4 sm:$0xff]  }
 0x4ca   :  { %5593 = vmatprep.subr.bf16.mxu1 %v7210_v56  ;;  %v7283_v56 = vld [vmem:[%s10340_s7 + $0x468] ss:$28 sps:$4 sm:$0xff]  }
 0x4cd   :  { %5594 = vmatpush1.bf16.msra.mxu1 %v7208_v58  ;;  %v7286_v58 = vld [vmem:[%s10340_s7 + $0x7e8] ss:$28 sps:$4 sm:$0xff]  }
 0x4ce   :  { %5595 = vmatprep.subr.bf16.mxu1 %v7216_v59  ;;  %v7291_v59 = vld [vmem:[%s10340_s7 + $0x434] ss:$28 sps:$4 sm:$0xff]  }
 0x4d1   :  { %5596 = vmatpush1.bf16.msra.mxu1 %v7214_v60  ;;  %v7294_v60 = vld [vmem:[%s10340_s7 + $0x7b4] ss:$28 sps:$4 sm:$0xff]  }
 0x4d2   :  { %5597 = vmatprep.subr.bf16.mxu1 %v7222_v61  ;;  %v7289_v61 = vld [vmem:[%s10340_s7 + $0x430] ss:$28 sps:$4 sm:$0xff]  }
 0x4d5   :  { %5598 = vmatpush2.bf16.msra.mxu1 %v7220_v62  ;;  %v7292_v62 = vld [vmem:[%s10340_s7 + $0x7b0] ss:$28 sps:$4 sm:$0xff]  }
 0x4d6   :  { %5599 = vmatprep.subr.bf16.mxu1 %v7228_v57  ;;  %v7297_v57 = vld [vmem:[%s10340_s7 + $0x3fc] ss:$28 sps:$4 sm:$0xff]  }
 0x4d9   :  { %5600 = vmatpush2.bf16.msra.mxu1 %v7226_v63  ;;  %v7300_v63 = vld [vmem:[%s10340_s7 + $0x77c] ss:$28 sps:$4 sm:$0xff]  }
 0x4da   :  { %5601 = vmatprep.subr.bf16.mxu1 %v7234_v2  ;;  %v7295_v2 = vld [vmem:[%s10340_s7 + $0x3f8] ss:$28 sps:$4 sm:$0xff]  }
 0x4dd   :  { %5602 = vmatpush2.bf16.msra.mxu1 %v7232_v3  ;;  %v7298_v3 = vld [vmem:[%s10340_s7 + $0x778] ss:$28 sps:$4 sm:$0xff]  }
 0x4de   :  { %5603 = vmatprep.subr.bf16.mxu1 %v7240_v4  ;;  %v7303_v4 = vld [vmem:[%s10340_s7 + $0x3c4] ss:$28 sps:$4 sm:$0xff]  }
 0x4e1   :  { %5604 = vmatpush2.bf16.msra.mxu1 %v7238_v5  ;;  %v7306_v5 = vld [vmem:[%s10340_s7 + $0x744] ss:$28 sps:$4 sm:$0xff]  }
 0x4e2   :  { %5605 = vmatprep.subr.bf16.mxu1 %v7246_v6  ;;  %v7301_v6 = vld [vmem:[%s10340_s7 + $0x3c0] ss:$28 sps:$4 sm:$0xff]  }
 0x4e5   :  { %5606 = vmatpush2.bf16.msra.mxu1 %v7244_v7  ;;  %v7304_v7 = vld [vmem:[%s10340_s7 + $0x740] ss:$28 sps:$4 sm:$0xff]  }
 0x4e6   :  { %5607 = vmatprep.subr.bf16.mxu1 %v7252_v8  ;;  %v7309_v8 = vld [vmem:[%s10340_s7 + $0x38c] ss:$28 sps:$4 sm:$0xff]  }
 0x4e7   :  { %v2385_v19 = vpop.f32.mrf.mxu1 }
 0x4e8   :  { %v2426_v20 = vpop.f32.mrf.mxu0 }
 0x4e9   :  { %v2427_v21 = vadd.f32 %v2426_v20, %v2385_v19  ;;  %5608 = vmatpush2.bf16.msra.mxu1 %v7250_v16  ;;  %v2387_v13 = vpop.f32.mrf.mxu1  ;;  %v7310_v16 = vld [vmem:[%s10340_s7 + $0x708] ss:$28 sps:$4 sm:$0xff]   ;;  %v7313_v19 = vld [vmem:[%s10340_s7 + $0x6d0] ss:$28 sps:$4 sm:$0xff]   ;;  %v7321_v20 = vld [vmem:[%s10340_s7 + $0x69c] ss:$28 sps:$4 sm:$0xff]  }
 0x4ea   :  { %v2428_v32 = vpop.f32.mrf.mxu0  ;;  %5609 = vmatprep.subr.bf16.mxu1 %v7258_v29  ;;  %v7318_v29 = vld [vmem:[%s10340_s7 + $0xa54] ss:$28 sps:$4 sm:$0xff]  }
 0x4eb   :  { %v2439_v0 = vpack.c.bf16 %v2427_v21, %v2427_v21  ;;  %v2429_v33 = vadd.f32 %v2428_v32, %v2387_v13  ;;  %v2389_v34 = vpop.f32.mrf.mxu1  ;;  %v7324_v21 = vld [vmem:[%s10340_s7 + $0xa1c] ss:$28 sps:$4 sm:$0xff]   ;;  %v7330_v32 = vld [vmem:[%s10340_s7 + $0x9e4] ss:$28 sps:$4 sm:$0xff]  }
 0x4ec   :  { %v2430_v35 = vpop.f32.mrf.mxu0  ;;  %v7319_v13 = vld [vmem:[%s10340_s7 + $0x698] ss:$28 sps:$4 sm:$0xff]   ;;  %v7331_v34 = vld [vmem:[%s10340_s7 + $0x628] ss:$28 sps:$4 sm:$0xff]  }
 0x4ed   :  { %v2440_v36 = vpack.c.bf16 %v2429_v33, %v2429_v33  ;;  %5610 = vmatpush2.bf16.msra.mxu1 %v7256_v14  ;;  %v2390_v18 = vpop.f32.mrf.mxu1  ;;  %v2554_v28 = vadd.bf16 %v2540_v22, %v2439_v0  ;;  %v7322_v14 = vld [vmem:[%s10340_s7 + $0xa18] ss:$28 sps:$4 sm:$0xff]   ;;  %v7327_v22 = vld [vmem:[%s10340_s7 + $0x664] ss:$28 sps:$4 sm:$0xff]   ;;  %v7333_v33 = vld [vmem:[%s10340_s7 + $0x62c] ss:$28 sps:$4 sm:$0xff]  }
 0x4ee   :  { %v2431_v37 = vpop.f32.mrf.mxu0  ;;  %5611 = vmatprep.subr.bf16.mxu1 %v7264_v23  ;;  %v7325_v23 = vld [vmem:[%s10340_s7 + $0x660] ss:$28 sps:$4 sm:$0xff]   ;;  %v7334_v35 = vld [vmem:[%s10340_s7 + $0x9a8] ss:$28 sps:$4 sm:$0xff]   ;;  %v7342_v18 = vld [vmem:[%s10340_s7 + $0x974] ss:$28 sps:$4 sm:$0xff]  }
 0x4ef   :  { %v2555_v39 = vadd.bf16 %v2547_v24, %v2440_v36  ;;  %v9400_v45 = vmax.bf16 %v7706_v25, %v2554_v28  ;;  %v7328_v0 = vld [vmem:[%s10340_s7 + $0x9e0] ss:$28 sps:$4 sm:$0xff]   ;;  %v7336_v24 = vld [vmem:[%s10340_s7 + $0x9ac] ss:$28 sps:$4 sm:$0xff]   ;;  %v7339_v36 = vld [vmem:[%s10340_s7 + $0x5f4] ss:$28 sps:$4 sm:$0xff]  }
 0x4f0   :  { %v7340_v28 = vld [vmem:[%s10340_s7 + $0x970] ss:$28 sps:$4 sm:$0xff]   ;;  %v7345_v37 = vld [vmem:[%s10340_s7 + $0x5bc] ss:$28 sps:$4 sm:$0xff]  }
 0x4f1   :  { %v9391_v40 = vmax.bf16 %v7706_v25, %v2555_v39  ;;  %5612 = vmatpush2.bf16.msra.mxu1 %v7262_v31  ;;  %v7271_v25 = vld [vmem:[%s10340_s7 + $0x4d8] ss:$28 sps:$4 sm:$0xff]   ;;  %v7337_v31 = vld [vmem:[%s10340_s7 + $0x5f0] ss:$28 sps:$4 sm:$0xff]  }
 0x4f2   :  { %5663 = vmatprep.subr.bf16.mxu1 %v7270_v38  ;;  %v7348_v38 = vld [vmem:[%s10340_s7 + $0x93c] ss:$28 sps:$4 sm:$0xff]  }
 0x4f3   :  { %5572 = vmatprep.mubr.bf16.mxu0 %v9391_v40  ;;  %v7343_v39 = vld [vmem:[%s10340_s7 + $0x5b8] ss:$28 sps:$4 sm:$0xff]  }
 0x4f4   :  { %5614 = vmatmul.mubr.bf16.vlgmr.msra.gmra.mxu1 %v9062_v48  ;;  %5573 = vmatmul.mubr.bf16.vlgmr.msra.gmra.mxu0 %v9400_v45 }
 0x4f5   :  { %5623 = vmatpush1.bf16.msra.mxu0 %v7265_v41  ;;  %5664 = vmatpush1.bf16.msra.mxu1 %v7268_v44  ;;  %v7346_v41 = vld [vmem:[%s10340_s7 + $0x938] ss:$28 sps:$4 sm:$0xff]   ;;  %v7351_v44 = vld [vmem:[%s10340_s7 + $0x584] ss:$28 sps:$4 sm:$0xff]  }
 0x4f6   :  { %5695 = vmatprep.mubr.bf16.mxu1 %v9280_v42  ;;  %5654 = vmatprep.mubr.bf16.mxu0 %v9083_v11 }
 0x4f7   :  { %5624 = vmatprep.subr.bf16.mxu0 %v7273_v46  ;;  %5665 = vmatprep.subr.bf16.mxu1 %v7276_v47  ;;  %v7354_v46 = vld [vmem:[%s10340_s7 + $0x904] ss:$28 sps:$4 sm:$0xff]  }
 0x4f9   :  { %5625 = vmatpush1.bf16.msra.mxu0 %v7271_v25  ;;  %5666 = vmatpush1.bf16.msra.mxu1 %v7274_v49  ;;  %v7349_v49 = vld [vmem:[%s10340_s7 + $0x580] ss:$28 sps:$4 sm:$0xff]  }
 0x4fa   :  { %5626 = vmatprep.subr.bf16.mxu0 %v7279_v12  ;;  %5667 = vmatprep.subr.bf16.mxu1 %v7282_v50  ;;  %v7352_v12 = vld [vmem:[%s10340_s7 + $0x900] ss:$28 sps:$4 sm:$0xff]   ;;  %v7357_v50 = vld [vmem:[%s10340_s7 + $0x54c] ss:$28 sps:$4 sm:$0xff]  }
 0x4fd   :  { %5627 = vmatpush1.bf16.msra.mxu0 %v7277_v51  ;;  %5668 = vmatpush1.bf16.msra.mxu1 %v7280_v52  ;;  %v7360_v51 = vld [vmem:[%s10340_s7 + $0x8cc] ss:$28 sps:$4 sm:$0xff]   ;;  %v3076_v52 = vld [vmem:[%s10341_s8] sm:$0x7f] }
 0x4fe   :  { %5628 = vmatprep.subr.bf16.mxu0 %v7285_v53  ;;  %5669 = vmatprep.subr.bf16.mxu1 %v7288_v55 }
 0x501   :  { %5629 = vmatpush1.bf16.msra.mxu0 %v7283_v56  ;;  %5670 = vmatpush1.bf16.msra.mxu1 %v7286_v58  ;;  %v7355_v56 = vld [vmem:[%s10340_s7 + $0x548] ss:$28 sps:$4 sm:$0xff]  }
 0x502   :  { %5630 = vmatprep.subr.bf16.mxu0 %v7291_v59  ;;  %5671 = vmatprep.subr.bf16.mxu1 %v7294_v60  ;;  %v7358_v58 = vld [vmem:[%s10340_s7 + $0x8c8] ss:$28 sps:$4 sm:$0xff]   ;;  %v3081_v59 = vrot.slane %v3076_v52, %v7998_v27  ;;  %v7363_v60 = vld [vmem:[%s10340_s7 + $0xc14] ss:$28 sps:$4 sm:$0xff]  }
 0x505   :  { %5631 = vmatpush1.bf16.msra.mxu0 %v7289_v61  ;;  %5672 = vmatpush1.bf16.msra.mxu1 %v7292_v62  ;;  %v7366_v61 = vld [vmem:[%s10340_s7 + $0x19c] ss:$28 sps:$4 sm:$0xff]   ;;  %v3085_v62 = vrot.slane %v3076_v52, %v166_v30  ;;  %v7372_v30 = vld [vmem:[%s10340_s7 + $0x164] ss:$28 sps:$4 sm:$0xff]  }
 0x506   :  { %5632 = vmatprep.subr.bf16.mxu0 %v7297_v57  ;;  %5673 = vmatprep.subr.bf16.mxu1 %v7300_v63  ;;  %v7361_v57 = vld [vmem:[%s10340_s7 + $0xc10] ss:$28 sps:$4 sm:$0xff]   ;;  %v7364_v63 = vld [vmem:[%s10340_s7 + $0x198] ss:$28 sps:$4 sm:$0xff]   ;;  %v7423_v52 = vld [vmem:[%s10340_s7 + $0xd64] ss:$28 sps:$4 sm:$0xff]  }
 0x509   :  { %5633 = vmatpush1.bf16.msra.mxu0 %v7295_v2  ;;  %5674 = vmatpush1.bf16.msra.mxu1 %v7298_v3  ;;  %v7369_v3 = vld [vmem:[%s10340_s7 + $0xbdc] ss:$28 sps:$4 sm:$0xff]  }
 0x50a   :  { %5634 = vmatprep.subr.bf16.mxu0 %v7303_v4  ;;  %5675 = vmatprep.subr.bf16.mxu1 %v7306_v5 }
 0x50d   :  { %5635 = vmatpush1.bf16.msra.mxu0 %v7301_v6  ;;  %5676 = vmatpush1.bf16.msra.mxu1 %v7304_v7  ;;  %v7367_v7 = vld [vmem:[%s10340_s7 + $0xbd8] ss:$28 sps:$4 sm:$0xff]  }
 0x50e   :  { %5636 = vmatprep.subr.bf16.mxu0 %v7309_v8  ;;  %5677 = vmatprep.subr.bf16.mxu1 %v7312_v9  ;;  %v7370_v9 = vld [vmem:[%s10340_s7 + $0x160] ss:$28 sps:$4 sm:$0xff]  }
 0x511   :  { %5637 = vmatpush1.bf16.msra.mxu0 %v7307_v10  ;;  %5678 = vmatpush1.bf16.msra.mxu1 %v7310_v16  ;;  %v7375_v10 = vld [vmem:[%s10340_s7 + $0xba4] ss:$28 sps:$4 sm:$0xff]  }
 0x512   :  { %5638 = vmatprep.subr.bf16.mxu0 %v7315_v17  ;;  %5679 = vmatprep.subr.bf16.mxu1 %v7318_v29  ;;  %v7378_v17 = vld [vmem:[%s10340_s7 + $0x12c] ss:$28 sps:$4 sm:$0xff]  }
 0x515   :  { %5639 = vmatpush2.bf16.msra.mxu0 %v7313_v19  ;;  %5680 = vmatpush2.bf16.msra.mxu1 %v7316_v54  ;;  %v7373_v19 = vld [vmem:[%s10340_s7 + $0xba0] ss:$28 sps:$4 sm:$0xff]   ;;  %v7376_v54 = vld [vmem:[%s10340_s7 + $0x128] ss:$28 sps:$4 sm:$0xff]  }
 0x516   :  { %5640 = vmatprep.subr.bf16.mxu0 %v7321_v20  ;;  %5681 = vmatprep.subr.bf16.mxu1 %v7324_v21  ;;  %v7381_v20 = vld [vmem:[%s10340_s7 + $0xb6c] ss:$28 sps:$4 sm:$0xff]   ;;  %v7384_v21 = vld [vmem:[%s10340_s7 + $0xf4] ss:$28 sps:$4 sm:$0xff]  }
 0x519   :  { %5641 = vmatpush2.bf16.msra.mxu0 %v7319_v13  ;;  %5682 = vmatpush2.bf16.msra.mxu1 %v7322_v14  ;;  %v7379_v13 = vld [vmem:[%s10340_s7 + $0xb68] ss:$28 sps:$4 sm:$0xff]   ;;  %v7382_v14 = vld [vmem:[%s10340_s7 + $0xf0] ss:$28 sps:$4 sm:$0xff]  }
 0x51a   :  { %5642 = vmatprep.subr.bf16.mxu0 %v7327_v22  ;;  %5683 = vmatprep.subr.bf16.mxu1 %v7330_v32  ;;  %v7387_v22 = vld [vmem:[%s10340_s7 + $0xb34] ss:$28 sps:$4 sm:$0xff]   ;;  %v7390_v32 = vld [vmem:[%s10340_s7 + $0xbc] ss:$28 sps:$4 sm:$0xff]  }
 0x51d   :  { %5643 = vmatpush2.bf16.msra.mxu0 %v7325_v23  ;;  %5684 = vmatpush2.bf16.msra.mxu1 %v7328_v0  ;;  %v7385_v23 = vld [vmem:[%s10340_s7 + $0xb30] ss:$28 sps:$4 sm:$0xff]   ;;  %v7388_v0 = vld [vmem:[%s10340_s7 + $0xb8] ss:$28 sps:$4 sm:$0xff]  }
 0x51e   :  { %5644 = vmatprep.subr.bf16.mxu0 %v7333_v33  ;;  %5685 = vmatprep.subr.bf16.mxu1 %v7336_v24  ;;  %v7393_v33 = vld [vmem:[%s10340_s7 + $0xafc] ss:$28 sps:$4 sm:$0xff]   ;;  %v7396_v24 = vld [vmem:[%s10340_s7 + $0x84] ss:$28 sps:$4 sm:$0xff]  }
 0x521   :  { %5645 = vmatpush2.bf16.msra.mxu0 %v7331_v34  ;;  %5686 = vmatpush2.bf16.msra.mxu1 %v7334_v35  ;;  %v7391_v34 = vld [vmem:[%s10340_s7 + $0xaf8] ss:$28 sps:$4 sm:$0xff]   ;;  %v7394_v35 = vld [vmem:[%s10340_s7 + $0x80] ss:$28 sps:$4 sm:$0xff]  }
 0x522   :  { %5646 = vmatprep.subr.bf16.mxu0 %v7339_v36  ;;  %5687 = vmatprep.subr.bf16.mxu1 %v7342_v18  ;;  %v7399_v36 = vld [vmem:[%s10340_s7 + $0xac4] ss:$28 sps:$4 sm:$0xff]   ;;  %v7402_v18 = vld [vmem:[%s10340_s7 + $0x4c] ss:$28 sps:$4 sm:$0xff]  }
 0x525   :  { %5647 = vmatpush2.bf16.msra.mxu0 %v7337_v31  ;;  %5688 = vmatpush2.bf16.msra.mxu1 %v7340_v28  ;;  %v7397_v31 = vld [vmem:[%s10340_s7 + $0xac0] ss:$28 sps:$4 sm:$0xff]   ;;  %v7400_v28 = vld [vmem:[%s10340_s7 + $0x48] ss:$28 sps:$4 sm:$0xff]  }
 0x526   :  { %5648 = vmatprep.subr.bf16.mxu0 %v7345_v37  ;;  %5689 = vmatprep.subr.bf16.mxu1 %v7348_v38  ;;  %v7405_v37 = vld [vmem:[%s10340_s7 + $0xa8c] ss:$28 sps:$4 sm:$0xff]   ;;  %v7408_v38 = vld [vmem:[%s10340_s7 + $0x14] ss:$28 sps:$4 sm:$0xff]  }
 0x527   :  { %v5451_v47 = vpop.f32.mrf.mxu1 }
 0x528   :  { %v5452_v27 = vadd.f32 %v5451_v47, %v3081_v59  ;;  %v7409_v47 = vld [vmem:[%s10340_s7 + $0xdd0] ss:$28 sps:$4 sm:$0xff]  }
 0x529   :  { %5649 = vmatpush2.bf16.msra.mxu0 %v7343_v39  ;;  %5690 = vmatpush2.bf16.msra.mxu1 %v7346_v41  ;;  %v5453_v25 = vpop.f32.mrf.mxu1  ;;  %v7403_v39 = vld [vmem:[%s10340_s7 + $0xa88] ss:$28 sps:$4 sm:$0xff]   ;;  %v7406_v41 = vld [vmem:[%s10340_s7 + $0x10] ss:$28 sps:$4 sm:$0xff]  }
 0x52a   :  { %5650 = vmatprep.subr.bf16.mxu0 %v7351_v44  ;;  %5691 = vmatprep.subr.bf16.mxu1 %v7354_v46  ;;  %v5454_v4 = vadd.f32 %v5453_v25, %v3085_v62  ;;  %v7411_v44 = vld [vmem:[%s10340_s7 + $0xdd4] ss:$28 sps:$4 sm:$0xff]   ;;  %v7414_v46 = vld [vmem:[%s10340_s7 + $0x35c] ss:$28 sps:$4 sm:$0xff]  }
 0x52b   :  { %v5455_v53 = vpop.f32.mrf.mxu1  ;;  %v7412_v25 = vld [vmem:[%s10340_s7 + $0x358] ss:$28 sps:$4 sm:$0xff]  }
 0x52c   :  { %v7426_v53 = vld [vmem:[%s10340_s7 + $0x2ec] ss:$28 sps:$4 sm:$0xff]   ;;  %v7432_v59 = vld [vmem:[%s10340_s7 + $0x2b4] ss:$28 sps:$4 sm:$0xff]  }
 0x52d   :  { %5651 = vmatpush2.bf16.msra.mxu0 %v7349_v49  ;;  %5692 = vmatpush2.bf16.msra.mxu1 %v7352_v12  ;;  %v5456_v55 = vpop.f32.mrf.mxu1  ;;  %v7417_v49 = vld [vmem:[%s10340_s7 + $0xd9c] ss:$28 sps:$4 sm:$0xff]   ;;  %v7420_v12 = vld [vmem:[%s10340_s7 + $0x324] ss:$28 sps:$4 sm:$0xff]   ;;  %v7435_v62 = vld [vmem:[%s10340_s7 + $0xcf4] ss:$28 sps:$4 sm:$0xff]  }
 0x52e   :  { %5652 = vmatprep.subr.bf16.mxu0 %v7357_v50  ;;  %5693 = vmatprep.subr.bf16.mxu1 %v7360_v51  ;;  %v7415_v50 = vld [vmem:[%s10340_s7 + $0xd98] ss:$28 sps:$4 sm:$0xff]   ;;  %v7418_v51 = vld [vmem:[%s10340_s7 + $0x320] ss:$28 sps:$4 sm:$0xff]  }
 0x52f   :  { %v7421_v55 = vld [vmem:[%s10340_s7 + $0xd60] ss:$28 sps:$4 sm:$0xff]  }
 0x531   :  { %5653 = vmatpush2.bf16.msra.mxu0 %v7355_v56  ;;  %5694 = vmatpush2.bf16.msra.mxu1 %v7358_v58  ;;  %v7424_v56 = vld [vmem:[%s10340_s7 + $0x2e8] ss:$28 sps:$4 sm:$0xff]  }
 0x532   :  { %5704 = vmatprep.subr.bf16.mxu0 %v7363_v60  ;;  %5745 = vmatprep.subr.bf16.mxu1 %v7366_v61  ;;  %v7429_v58 = vld [vmem:[%s10340_s7 + $0xd2c] ss:$28 sps:$4 sm:$0xff]  }
 0x533   :  { %v5492_v2 = vpop.f32.mrf.mxu0  ;;  %v7427_v60 = vld [vmem:[%s10340_s7 + $0xd28] ss:$28 sps:$4 sm:$0xff]   ;;  %v7430_v61 = vld [vmem:[%s10340_s7 + $0x2b0] ss:$28 sps:$4 sm:$0xff]  }
 0x534   :  { %5655 = vmatmul.mubr.bf16.vlgmr.msra.gmra.mxu0 %v9092_v15  ;;  %5696 = vmatmul.mubr.bf16.vlgmr.msra.gmra.mxu1 %v9286_v1  ;;  %v9613_v5 = vadd.f32 %v5492_v2, %v5452_v27  ;;  %v7433_v27 = vld [vmem:[%s10340_s7 + $0xcf0] ss:$28 sps:$4 sm:$0xff]   ;;  %v7441_v2 = vld [vmem:[%s10340_s7 + $0xcbc] ss:$28 sps:$4 sm:$0xff]  }
 0x535   :  { %5705 = vmatpush1.bf16.msra.mxu0 %v7361_v57  ;;  %5736 = vmatprep.mubr.bf16.mxu0 %v9391_v40  ;;  %v5494_v6 = vpop.f32.mrf.mxu0  ;;  %v7438_v57 = vld [vmem:[%s10340_s7 + $0x27c] ss:$28 sps:$4 sm:$0xff]  }
 0x536   :  { %5746 = vmatpush1.bf16.msra.mxu1 %v7364_v63  ;;  %5777 = vmatprep.mubr.bf16.mxu1 %v8892_v43  ;;  %v9620_v8 = vadd.f32 %v5494_v6, %v5454_v4  ;;  %v7436_v63 = vld [vmem:[%s10340_s7 + $0x278] ss:$28 sps:$4 sm:$0xff]   ;;  %v7442_v4 = vld [vmem:[%s10340_s7 + $0x240] ss:$28 sps:$4 sm:$0xff]  }
 0x537   :  { %5706 = vmatprep.subr.bf16.mxu0 %v7369_v3  ;;  %5747 = vmatprep.subr.bf16.mxu1 %v7372_v30  ;;  %v5496_v16 = vpop.f32.mrf.mxu0  ;;  %v7444_v3 = vld [vmem:[%s10340_s7 + $0x244] ss:$28 sps:$4 sm:$0xff]   ;;  %v7439_v30 = vld [vmem:[%s10340_s7 + $0xcb8] ss:$28 sps:$4 sm:$0xff]  }
 0x538   :  { %v7447_v6 = vld [vmem:[%s10340_s7 + $0xc84] ss:$28 sps:$4 sm:$0xff]   ;;  %v7453_v16 = vld [vmem:[%s10340_s7 + $0xc4c] ss:$28 sps:$4 sm:$0xff]  }
 0x539   :  { %5707 = vmatpush1.bf16.msra.mxu0 %v7367_v7  ;;  %v5497_v29 = vpop.f32.mrf.mxu0  ;;  %v7450_v7 = vld [vmem:[%s10340_s7 + $0x20c] ss:$28 sps:$4 sm:$0xff]  }
 0x53a   :  { %5748 = vmatpush1.bf16.msra.mxu1 %v7370_v9  ;;  %5708 = vmatprep.subr.bf16.mxu0 %v7375_v10  ;;  %v7445_v9 = vld [vmem:[%s10340_s7 + $0xc80] ss:$28 sps:$4 sm:$0xff]   ;;  %v7448_v10 = vld [vmem:[%s10340_s7 + $0x208] ss:$28 sps:$4 sm:$0xff]  }
 0x53b   :  { %5749 = vmatprep.subr.bf16.mxu1 %v7378_v17  ;;  %v7456_v17 = vld [vmem:[%s10340_s7 + $0x1d4] ss:$28 sps:$4 sm:$0xff]   ;;  %v7451_v29 = vld [vmem:[%s10340_s7 + $0xc48] ss:$28 sps:$4 sm:$0xff]  }
 0x53d   :  { %5709 = vmatpush1.bf16.msra.mxu0 %v7373_v19  ;;  %v7454_v19 = vld [vmem:[%s10340_s7 + $0x1d0] ss:$28 sps:$4 sm:$0xff]  }
 0x53e   :  { %5750 = vmatpush1.bf16.msra.mxu1 %v7376_v54  ;;  %5710 = vmatprep.subr.bf16.mxu0 %v7381_v20  ;;  %v7459_v54 = vld [vmem:[%s10340_s7 + $0x51c] ss:$28 sps:$4 sm:$0xff]  }
 0x53f   :  { %5751 = vmatprep.subr.bf16.mxu1 %v7384_v21  ;;  %v7462_v20 = vld [vmem:[%s10340_s7 + $0x89c] ss:$28 sps:$4 sm:$0xff]  }
 0x540   :  { %v7457_v21 = vld [vmem:[%s10340_s7 + $0x518] ss:$28 sps:$4 sm:$0xff]  }
 0x541   :  { %5711 = vmatpush1.bf16.msra.mxu0 %v7379_v13  ;;  %v7460_v13 = vld [vmem:[%s10340_s7 + $0x898] ss:$28 sps:$4 sm:$0xff]  }
 0x542   :  { %5752 = vmatpush1.bf16.msra.mxu1 %v7382_v14  ;;  %5712 = vmatprep.subr.bf16.mxu0 %v7387_v22  ;;  %v7465_v14 = vld [vmem:[%s10340_s7 + $0x4e4] ss:$28 sps:$4 sm:$0xff]  }
 0x543   :  { %5753 = vmatprep.subr.bf16.mxu1 %v7390_v32  ;;  %v7468_v32 = vld [vmem:[%s10340_s7 + $0x864] ss:$28 sps:$4 sm:$0xff]  }
 0x545   :  { %5713 = vmatpush1.bf16.msra.mxu0 %v7385_v23  ;;  %v7463_v23 = vld [vmem:[%s10340_s7 + $0x4e0] ss:$28 sps:$4 sm:$0xff]  }
 0x546   :  { %5754 = vmatpush1.bf16.msra.mxu1 %v7388_v0  ;;  %5714 = vmatprep.subr.bf16.mxu0 %v7393_v33  ;;  %v7466_v33 = vld [vmem:[%s10340_s7 + $0x860] ss:$28 sps:$4 sm:$0xff]  }
 0x547   :  { %5755 = vmatprep.subr.bf16.mxu1 %v7396_v24  ;;  %v7471_v24 = vld [vmem:[%s10340_s7 + $0x4ac] ss:$28 sps:$4 sm:$0xff]  }
 0x549   :  { %5715 = vmatpush1.bf16.msra.mxu0 %v7391_v34  ;;  %v7474_v34 = vld [vmem:[%s10340_s7 + $0x82c] ss:$28 sps:$4 sm:$0xff]  }
 0x54a   :  { %5756 = vmatpush1.bf16.msra.mxu1 %v7394_v35  ;;  %5716 = vmatprep.subr.bf16.mxu0 %v7399_v36  ;;  %v7469_v36 = vld [vmem:[%s10340_s7 + $0x4a8] ss:$28 sps:$4 sm:$0xff]  }
 0x54b   :  { %5757 = vmatprep.subr.bf16.mxu1 %v7402_v18 }
 0x54d   :  { %5717 = vmatpush1.bf16.msra.mxu0 %v7397_v31  ;;  %v7472_v31 = vld [vmem:[%s10340_s7 + $0x828] ss:$28 sps:$4 sm:$0xff]  }
 0x54e   :  { %5758 = vmatpush1.bf16.msra.mxu1 %v7400_v28  ;;  %5718 = vmatprep.subr.bf16.mxu0 %v7405_v37  ;;  %v7477_v28 = vld [vmem:[%s10340_s7 + $0x474] ss:$28 sps:$4 sm:$0xff]  }
 0x54f   :  { %5759 = vmatprep.subr.bf16.mxu1 %v7408_v38  ;;  %v7480_v37 = vld [vmem:[%s10340_s7 + $0x7f4] ss:$28 sps:$4 sm:$0xff]  }
 0x550   :  { %v7475_v38 = vld [vmem:[%s10340_s7 + $0x470] ss:$28 sps:$4 sm:$0xff]  }
 0x551   :  { %5719 = vmatpush1.bf16.msra.mxu0 %v7403_v39  ;;  %v7478_v39 = vld [vmem:[%s10340_s7 + $0x7f0] ss:$28 sps:$4 sm:$0xff]  }
 0x552   :  { %5760 = vmatpush1.bf16.msra.mxu1 %v7406_v41  ;;  %5720 = vmatprep.subr.bf16.mxu0 %v7411_v44  ;;  %v7483_v41 = vld [vmem:[%s10340_s7 + $0x43c] ss:$28 sps:$4 sm:$0xff]  }
 0x553   :  { %5761 = vmatprep.subr.bf16.mxu1 %v7414_v46  ;;  %v7486_v44 = vld [vmem:[%s10340_s7 + $0x7bc] ss:$28 sps:$4 sm:$0xff]  }
 0x554   :  { %v7481_v46 = vld [vmem:[%s10340_s7 + $0x438] ss:$28 sps:$4 sm:$0xff]  }
 0x555   :  { %5721 = vmatpush2.bf16.msra.mxu0 %v7409_v47  ;;  %v7484_v47 = vld [vmem:[%s10340_s7 + $0x7b8] ss:$28 sps:$4 sm:$0xff]  }
 0x556   :  { %5762 = vmatpush2.bf16.msra.mxu1 %v7412_v25  ;;  %5722 = vmatprep.subr.bf16.mxu0 %v7417_v49  ;;  %v7489_v25 = vld [vmem:[%s10340_s7 + $0x404] ss:$28 sps:$4 sm:$0xff]  }
 0x557   :  { %5763 = vmatprep.subr.bf16.mxu1 %v7420_v12  ;;  %v7492_v49 = vld [vmem:[%s10340_s7 + $0x784] ss:$28 sps:$4 sm:$0xff]  }
 0x558   :  { %v7487_v12 = vld [vmem:[%s10340_s7 + $0x400] ss:$28 sps:$4 sm:$0xff]  }
 0x559   :  { %5723 = vmatpush2.bf16.msra.mxu0 %v7415_v50  ;;  %v7490_v50 = vld [vmem:[%s10340_s7 + $0x780] ss:$28 sps:$4 sm:$0xff]  }
 0x55a   :  { %5764 = vmatpush2.bf16.msra.mxu1 %v7418_v51  ;;  %5724 = vmatprep.subr.bf16.mxu0 %v7423_v52  ;;  %v7495_v51 = vld [vmem:[%s10340_s7 + $0x3cc] ss:$28 sps:$4 sm:$0xff]  }
 0x55b   :  { %5765 = vmatprep.subr.bf16.mxu1 %v7426_v53  ;;  %v7498_v52 = vld [vmem:[%s10340_s7 + $0x74c] ss:$28 sps:$4 sm:$0xff]  }
 0x55c   :  { %v7493_v53 = vld [vmem:[%s10340_s7 + $0x3c8] ss:$28 sps:$4 sm:$0xff]  }
 0x55d   :  { %5725 = vmatpush2.bf16.msra.mxu0 %v7421_v55  ;;  %v7496_v55 = vld [vmem:[%s10340_s7 + $0x748] ss:$28 sps:$4 sm:$0xff]  }
 0x55e   :  { %5766 = vmatpush2.bf16.msra.mxu1 %v7424_v56  ;;  %5726 = vmatprep.subr.bf16.mxu0 %v7429_v58  ;;  %v7501_v56 = vld [vmem:[%s10340_s7 + $0x394] ss:$28 sps:$4 sm:$0xff]  }
 0x55f   :  { %5767 = vmatprep.subr.bf16.mxu1 %v7432_v59  ;;  %v7504_v58 = vld [vmem:[%s10340_s7 + $0x714] ss:$28 sps:$4 sm:$0xff]  }
 0x560   :  { %v7499_v59 = vld [vmem:[%s10340_s7 + $0x390] ss:$28 sps:$4 sm:$0xff]  }
 0x561   :  { %5727 = vmatpush2.bf16.msra.mxu0 %v7427_v60  ;;  %v7502_v60 = vld [vmem:[%s10340_s7 + $0x710] ss:$28 sps:$4 sm:$0xff]  }
 0x562   :  { %5768 = vmatpush2.bf16.msra.mxu1 %v7430_v61  ;;  %5728 = vmatprep.subr.bf16.mxu0 %v7435_v62  ;;  %v7507_v61 = vld [vmem:[%s10340_s7 + $0x6dc] ss:$28 sps:$4 sm:$0xff]  }
 0x563   :  { %5769 = vmatprep.subr.bf16.mxu1 %v7438_v57  ;;  %v7510_v62 = vld [vmem:[%s10340_s7 + $0xa5c] ss:$28 sps:$4 sm:$0xff]  }
 0x564   :  { %v7505_v57 = vld [vmem:[%s10340_s7 + $0x6d8] ss:$28 sps:$4 sm:$0xff]  }
 0x565   :  { %5729 = vmatpush2.bf16.msra.mxu0 %v7433_v27  ;;  %v7508_v27 = vld [vmem:[%s10340_s7 + $0xa58] ss:$28 sps:$4 sm:$0xff]  }
 0x566   :  { %5770 = vmatpush2.bf16.msra.mxu1 %v7436_v63  ;;  %5730 = vmatprep.subr.bf16.mxu0 %v7441_v2  ;;  %v7513_v63 = vld [vmem:[%s10340_s7 + $0x6a4] ss:$28 sps:$4 sm:$0xff]  }
 0x567   :  { %5771 = vmatprep.subr.bf16.mxu1 %v7444_v3  ;;  %v7516_v2 = vld [vmem:[%s10340_s7 + $0xa24] ss:$28 sps:$4 sm:$0xff]  }
 0x568   :  { %v7511_v3 = vld [vmem:[%s10340_s7 + $0x6a0] ss:$28 sps:$4 sm:$0xff]  }
 0x569   :  { %5731 = vmatpush2.bf16.msra.mxu0 %v7439_v30  ;;  %v7514_v30 = vld [vmem:[%s10340_s7 + $0xa20] ss:$28 sps:$4 sm:$0xff]  }
 0x56a   :  { %5772 = vmatpush2.bf16.msra.mxu1 %v7442_v4  ;;  %5732 = vmatprep.subr.bf16.mxu0 %v7447_v6  ;;  %v7519_v4 = vld [vmem:[%s10340_s7 + $0x66c] ss:$28 sps:$4 sm:$0xff]  }
 0x56b   :  { %5773 = vmatprep.subr.bf16.mxu1 %v7450_v7  ;;  %v7522_v6 = vld [vmem:[%s10340_s7 + $0x9ec] ss:$28 sps:$4 sm:$0xff]  }
 0x56c   :  { %v7517_v7 = vld [vmem:[%s10340_s7 + $0x668] ss:$28 sps:$4 sm:$0xff]  }
 0x56d   :  { %5733 = vmatpush2.bf16.msra.mxu0 %v7445_v9  ;;  %v7520_v9 = vld [vmem:[%s10340_s7 + $0x9e8] ss:$28 sps:$4 sm:$0xff]  }
 0x56e   :  { %5774 = vmatpush2.bf16.msra.mxu1 %v7448_v10  ;;  %5734 = vmatprep.subr.bf16.mxu0 %v7453_v16  ;;  %v7525_v10 = vld [vmem:[%s10340_s7 + $0x634] ss:$28 sps:$4 sm:$0xff]  }
 0x56f   :  { %5775 = vmatprep.subr.bf16.mxu1 %v7456_v17  ;;  %v7528_v16 = vld [vmem:[%s10340_s7 + $0x9b4] ss:$28 sps:$4 sm:$0xff]  }
 0x570   :  { %v7523_v17 = vld [vmem:[%s10340_s7 + $0x630] ss:$28 sps:$4 sm:$0xff]  }
 0x571   :  { %5735 = vmatpush2.bf16.msra.mxu0 %v7451_v29  ;;  %v7526_v29 = vld [vmem:[%s10340_s7 + $0x9b0] ss:$28 sps:$4 sm:$0xff]  }
 0x572   :  { %5776 = vmatpush2.bf16.msra.mxu1 %v7454_v19  ;;  %5786 = vmatprep.subr.bf16.mxu0 %v7459_v54  ;;  %v7531_v19 = vld [vmem:[%s10340_s7 + $0x5fc] ss:$28 sps:$4 sm:$0xff]  }
 0x573   :  { %5827 = vmatprep.subr.bf16.mxu1 %v7462_v20  ;;  %v7534_v54 = vld [vmem:[%s10340_s7 + $0x97c] ss:$28 sps:$4 sm:$0xff]  }
 0x574   :  { %5737 = vmatmul.mubr.bf16.vlgmr.msra.gmra.mxu0 %v9400_v45  ;;  %v9809_v22 = vpop.f32.mrf.mxu1  ;;  %v7529_v20 = vld [vmem:[%s10340_s7 + $0x5f8] ss:$28 sps:$4 sm:$0xff]  }
 0x575   :  { %5778 = vmatmul.mubr.bf16.vlgmr.msra.gmra.mxu1 %v9062_v48  ;;  %5787 = vmatpush1.bf16.msra.mxu0 %v7457_v21  ;;  %v7532_v21 = vld [vmem:[%s10340_s7 + $0x978] ss:$28 sps:$4 sm:$0xff]  }
 0x576   :  { %5818 = vmatprep.mubr.bf16.mxu0 %v9083_v11  ;;  %5828 = vmatpush1.bf16.msra.mxu1 %v7460_v13  ;;  %v9819_v0 = vpop.f32.mrf.mxu1  ;;  %v7537_v13 = vld [vmem:[%s10340_s7 + $0x5c4] ss:$28 sps:$4 sm:$0xff]  }
 0x577   :  { %5859 = vmatprep.mubr.bf16.mxu1 %v9280_v42  ;;  %5788 = vmatprep.subr.bf16.mxu0 %v7465_v14  ;;  %v7540_v14 = vld [vmem:[%s10340_s7 + $0x944] ss:$28 sps:$4 sm:$0xff]  }
 0x578   :  { %5829 = vmatprep.subr.bf16.mxu1 %v7468_v32  ;;  %v5537_v35 = vpop.f32.mrf.mxu1  ;;  %v7535_v32 = vld [vmem:[%s10340_s7 + $0x5c0] ss:$28 sps:$4 sm:$0xff]  }
 0x579   :  { %5789 = vmatpush1.bf16.msra.mxu0 %v7463_v23  ;;  %v7538_v23 = vld [vmem:[%s10340_s7 + $0x940] ss:$28 sps:$4 sm:$0xff]   ;;  %v7544_v35 = vld [vmem:[%s10340_s7 + $0x908] ss:$28 sps:$4 sm:$0xff]  }
 0x57a   :  { %5830 = vmatpush1.bf16.msra.mxu1 %v7466_v33  ;;  %v5538_v18 = vpop.f32.mrf.mxu1  ;;  %5790 = vmatprep.subr.bf16.mxu0 %v7471_v24  ;;  %v7543_v33 = vld [vmem:[%s10340_s7 + $0x58c] ss:$28 sps:$4 sm:$0xff]  }
 0x57b   :  { %5831 = vmatprep.subr.bf16.mxu1 %v7474_v34  ;;  %v7546_v24 = vld [vmem:[%s10340_s7 + $0x90c] ss:$28 sps:$4 sm:$0xff]   ;;  %v7552_v18 = vld [vmem:[%s10340_s7 + $0x8d4] ss:$28 sps:$4 sm:$0xff]  }
 0x57c   :  { %v7541_v34 = vld [vmem:[%s10340_s7 + $0x588] ss:$28 sps:$4 sm:$0xff]  }
 0x57d   :  { %5791 = vmatpush1.bf16.msra.mxu0 %v7469_v36  ;;  %v7549_v36 = vld [vmem:[%s10340_s7 + $0x554] ss:$28 sps:$4 sm:$0xff]  }
 0x57e   :  { %5832 = vmatpush1.bf16.msra.mxu1 %v7472_v31  ;;  %5792 = vmatprep.subr.bf16.mxu0 %v7477_v28  ;;  %v7547_v31 = vld [vmem:[%s10340_s7 + $0x550] ss:$28 sps:$4 sm:$0xff]  }
 0x57f   :  { %5833 = vmatprep.subr.bf16.mxu1 %v7480_v37  ;;  %v7550_v28 = vld [vmem:[%s10340_s7 + $0x8d0] ss:$28 sps:$4 sm:$0xff]   ;;  %v7555_v37 = vld [vmem:[%s10340_s7 + $0xc1c] ss:$28 sps:$4 sm:$0xff]  }
 0x581   :  { %5793 = vmatpush1.bf16.msra.mxu0 %v7475_v38  ;;  %v7556_v38 = vld [vmem:[%s10340_s7 + $0x360] ss:$28 sps:$4 sm:$0xff]  }
 0x582   :  { %5834 = vmatpush1.bf16.msra.mxu1 %v7478_v39  ;;  %5794 = vmatprep.subr.bf16.mxu0 %v7483_v41  ;;  %v7553_v39 = vld [vmem:[%s10340_s7 + $0xc18] ss:$28 sps:$4 sm:$0xff]   ;;  %v7557_v41 = vld [vmem:[%s10340_s7 + $0x1a0] ss:$28 sps:$4 sm:$0xff]  }
 0x583   :  { %5835 = vmatprep.subr.bf16.mxu1 %v7486_v44  ;;  %v5534_v44 = vadd.f32 %v9809_v22, %v9613_v5  ;;  %v7558_v22 = vld [vmem:[%s10340_s7 + $0xbe0] ss:$28 sps:$4 sm:$0xff]  }
 0x585   :  { %5795 = vmatpush1.bf16.msra.mxu0 %v7481_v46  ;;  %v7560_v46 = vld [vmem:[%s10340_s7 + $0xbe4] ss:$28 sps:$4 sm:$0xff]  }
 0x586   :  { %5836 = vmatpush1.bf16.msra.mxu1 %v7484_v47  ;;  %5796 = vmatprep.subr.bf16.mxu0 %v7489_v25 }
 0x587   :  { %5837 = vmatprep.subr.bf16.mxu1 %v7492_v49  ;;  %v7561_v49 = vld [vmem:[%s10340_s7 + $0x328] ss:$28 sps:$4 sm:$0xff]  }
 0x589   :  { %5797 = vmatpush1.bf16.msra.mxu0 %v7487_v12  ;;  %v5536_v12 = vadd.f32 %v9819_v0, %v9620_v8  ;;  %v7565_v8 = vld [vmem:[%s10340_s7 + $0xbac] ss:$28 sps:$4 sm:$0xff]  }
 0x58a   :  { %5838 = vmatpush1.bf16.msra.mxu1 %v7490_v50  ;;  %5798 = vmatprep.subr.bf16.mxu0 %v7495_v51 }
 0x58b   :  { %5839 = vmatprep.subr.bf16.mxu1 %v7498_v52  ;;  %v7562_v52 = vld [vmem:[%s10340_s7 + $0x168] ss:$28 sps:$4 sm:$0xff]  }
 0x58d   :  { %5799 = vmatpush1.bf16.msra.mxu0 %v7493_v53 }
 0x58e   :  { %5840 = vmatpush1.bf16.msra.mxu1 %v7496_v55  ;;  %5800 = vmatprep.subr.bf16.mxu0 %v7501_v56  ;;  %v7566_v55 = vld [vmem:[%s10340_s7 + $0x2f0] ss:$28 sps:$4 sm:$0xff]  }
 0x58f   :  { %5841 = vmatprep.subr.bf16.mxu1 %v7504_v58 }
 0x591   :  { %5801 = vmatpush1.bf16.msra.mxu0 %v7499_v59 }
 0x592   :  { %5842 = vmatpush1.bf16.msra.mxu1 %v7502_v60  ;;  %5802 = vmatprep.subr.bf16.mxu0 %v7507_v61  ;;  %v7563_v60 = vld [vmem:[%s10340_s7 + $0xba8] ss:$28 sps:$4 sm:$0xff]  }
 0x593   :  { %5843 = vmatprep.subr.bf16.mxu1 %v7510_v62 }
 0x595   :  { %5803 = vmatpush2.bf16.msra.mxu0 %v7505_v57  ;;  %v7570_v57 = vld [vmem:[%s10340_s7 + $0xb74] ss:$28 sps:$4 sm:$0xff]  }
 0x596   :  { %5844 = vmatpush2.bf16.msra.mxu1 %v7508_v27  ;;  %5804 = vmatprep.subr.bf16.mxu0 %v7513_v63  ;;  %v7571_v27 = vld [vmem:[%s10340_s7 + $0x2b8] ss:$28 sps:$4 sm:$0xff]   ;;  %v7568_v63 = vld [vmem:[%s10340_s7 + $0xb70] ss:$28 sps:$4 sm:$0xff]  }
 0x597   :  { %5845 = vmatprep.subr.bf16.mxu1 %v7516_v2  ;;  %v7572_v2 = vld [vmem:[%s10340_s7 + $0xf8] ss:$28 sps:$4 sm:$0xff]  }
 0x599   :  { %5805 = vmatpush2.bf16.msra.mxu0 %v7511_v3  ;;  %v7575_v3 = vld [vmem:[%s10340_s7 + $0xb3c] ss:$28 sps:$4 sm:$0xff]  }
 0x59a   :  { %5846 = vmatpush2.bf16.msra.mxu1 %v7514_v30  ;;  %5806 = vmatprep.subr.bf16.mxu0 %v7519_v4  ;;  %v7576_v30 = vld [vmem:[%s10340_s7 + $0x280] ss:$28 sps:$4 sm:$0xff]   ;;  %v7573_v4 = vld [vmem:[%s10340_s7 + $0xb38] ss:$28 sps:$4 sm:$0xff]  }
 0x59b   :  { %5847 = vmatprep.subr.bf16.mxu1 %v7522_v6  ;;  %v7577_v6 = vld [vmem:[%s10340_s7 + $0xc0] ss:$28 sps:$4 sm:$0xff]  }
 0x59d   :  { %5807 = vmatpush2.bf16.msra.mxu0 %v7517_v7  ;;  %v7580_v7 = vld [vmem:[%s10340_s7 + $0xb04] ss:$28 sps:$4 sm:$0xff]  }
 0x59e   :  { %5848 = vmatpush2.bf16.msra.mxu1 %v7520_v9  ;;  %5808 = vmatprep.subr.bf16.mxu0 %v7525_v10  ;;  %v7581_v9 = vld [vmem:[%s10340_s7 + $0x248] ss:$28 sps:$4 sm:$0xff]   ;;  %v7578_v10 = vld [vmem:[%s10340_s7 + $0xb00] ss:$28 sps:$4 sm:$0xff]  }
 0x59f   :  { %5849 = vmatprep.subr.bf16.mxu1 %v7528_v16 }
 0x5a1   :  { %5809 = vmatpush2.bf16.msra.mxu0 %v7523_v17  ;;  %v7582_v17 = vld [vmem:[%s10340_s7 + $0x88] ss:$28 sps:$4 sm:$0xff]  }
 0x5a2   :  { %5850 = vmatpush2.bf16.msra.mxu1 %v7526_v29  ;;  %5810 = vmatprep.subr.bf16.mxu0 %v7531_v19  ;;  %v7585_v29 = vld [vmem:[%s10340_s7 + $0xacc] ss:$28 sps:$4 sm:$0xff]  }
 0x5a3   :  { %5851 = vmatprep.subr.bf16.mxu1 %v7534_v54  ;;  %v7586_v54 = vld [vmem:[%s10340_s7 + $0x210] ss:$28 sps:$4 sm:$0xff]  }
 0x5a5   :  { %5811 = vmatpush2.bf16.msra.mxu0 %v7529_v20 }
 0x5a6   :  { %5852 = vmatpush2.bf16.msra.mxu1 %v7532_v21  ;;  %5812 = vmatprep.subr.bf16.mxu0 %v7537_v13 }
 0x5a7   :  { %5853 = vmatprep.subr.bf16.mxu1 %v7540_v14  ;;  %v7583_v14 = vld [vmem:[%s10340_s7 + $0xac8] ss:$28 sps:$4 sm:$0xff]  }
 0x5a9   :  { %5813 = vmatpush2.bf16.msra.mxu0 %v7535_v32  ;;  %v7587_v32 = vld [vmem:[%s10340_s7 + $0x50] ss:$28 sps:$4 sm:$0xff]  }
 0x5aa   :  { %5854 = vmatpush2.bf16.msra.mxu1 %v7538_v23  ;;  %5814 = vmatprep.subr.bf16.mxu0 %v7543_v33  ;;  %v7590_v23 = vld [vmem:[%s10340_s7 + $0xa94] ss:$28 sps:$4 sm:$0xff]  }
 0x5ab   :  { %5855 = vmatprep.subr.bf16.mxu1 %v7546_v24  ;;  %v7591_v24 = vld [vmem:[%s10340_s7 + $0x1d8] ss:$28 sps:$4 sm:$0xff]  }
 0x5ad   :  { %5815 = vmatpush2.bf16.msra.mxu0 %v7541_v34  ;;  %v7588_v34 = vld [vmem:[%s10340_s7 + $0xa90] ss:$28 sps:$4 sm:$0xff]  }
 0x5ae   :  { %5856 = vmatpush2.bf16.msra.mxu1 %v7544_v35  ;;  %5816 = vmatprep.subr.bf16.mxu0 %v7549_v36  ;;  %v7592_v35 = vld [vmem:[%s10340_s7 + $0x18] ss:$28 sps:$4 sm:$0xff]  }
 0x5af   :  { %5857 = vmatprep.subr.bf16.mxu1 %v7552_v18  ;;  %v7595_v36 = vld [vmem:[%s10340_s7 + $0xddc] ss:$28 sps:$4 sm:$0xff]  }
 0x5b0   :  { %v7596_v18 = vld [vmem:[%s10340_s7 + $0x6e0] ss:$28 sps:$4 sm:$0xff]  }
 0x5b1   :  { %5817 = vmatpush2.bf16.msra.mxu0 %v7547_v31  ;;  %v7593_v31 = vld [vmem:[%s10340_s7 + $0xdd8] ss:$28 sps:$4 sm:$0xff]  }
 0x5b2   :  { %5858 = vmatpush2.bf16.msra.mxu1 %v7550_v28  ;;  %5868 = vmatprep.subr.bf16.mxu0 %v7555_v37  ;;  %v7597_v28 = vld [vmem:[%s10340_s7 + $0x520] ss:$28 sps:$4 sm:$0xff]  }
 0x5b3   :  { %6873 = vmatprep.subr.bf16.mxu1 %v7556_v38  ;;  %v7600_v37 = vld [vmem:[%s10340_s7 + $0xda4] ss:$28 sps:$4 sm:$0xff]  }
 0x5b4   :  { %v10010_v47 = vpop.f32.mrf.mxu1  ;;  %5819 = vmatmul.mubr.bf16.vlgmr.msra.gmra.mxu0 %v9092_v15  ;;  %v5574_v25 = vpop.f32.mrf.mxu0  ;;  %v7601_v38 = vld [vmem:[%s10340_s7 + $0x6a8] ss:$28 sps:$4 sm:$0xff]  }
 0x5b5   :  { %5860 = vmatmul.mubr.bf16.vlgmr.msra.gmra.mxu1 %v9286_v1  ;;  %v5575_v5 = vadd.f32 %v5574_v25, %v5534_v44  ;;  %5869 = vmatpush1.bf16.msra.mxu0 %v7553_v39  ;;  %v7598_v39 = vld [vmem:[%s10340_s7 + $0xda0] ss:$28 sps:$4 sm:$0xff]   ;;  %v7605_v44 = vld [vmem:[%s10340_s7 + $0xd6c] ss:$28 sps:$4 sm:$0xff]   ;;  %v7610_v25 = vld [vmem:[%s10340_s7 + $0xd34] ss:$28 sps:$4 sm:$0xff]  }
 0x5b6   :  { %5900 = vmatprep.mubr.bf16.mxu0 %v9391_v40  ;;  %6874 = vmatpush3.bf16.msra.mxu1 %v7557_v41  ;;  %v10023_v50 = vpop.f32.mrf.mxu1  ;;  %v5576_v51 = vpop.f32.mrf.mxu0  ;;  %v7602_v41 = vld [vmem:[%s10340_s7 + $0x4e8] ss:$28 sps:$4 sm:$0xff]  }
 0x5b7   :  { %v6069_v0 = vmul.f32 0.5, %v5575_v5  ;;  %5941 = vmatprep.mubr.bf16.mxu1 %v8892_v43  ;;  %v5577_v53 = vadd.f32 %v5576_v51, %v5536_v12  ;;  %5870 = vmatprep.subr.bf16.mxu0 %v7560_v46  ;;  %v7567_v43 = vld [vmem:[%s10340_s7 + $0x130] ss:$28 sps:$4 sm:$0xff]   ;;  %v7603_v46 = vld [vmem:[%s10340_s7 + $0xd68] ss:$28 sps:$4 sm:$0xff]  }
 0x5b8   :  { %v5619_v56 = vpop.f32.mrf.mxu1  ;;  %6875 = vmatprep.subr.bf16.mxu1 %v7561_v49  ;;  %v5578_v58 = vpop.f32.mrf.mxu0  ;;  %v7611_v49 = vld [vmem:[%s10340_s7 + $0x638] ss:$28 sps:$4 sm:$0xff]   ;;  %v7608_v12 = vld [vmem:[%s10340_s7 + $0xd30] ss:$28 sps:$4 sm:$0xff]   ;;  %v7616_v51 = vld [vmem:[%s10340_s7 + $0x600] ss:$28 sps:$4 sm:$0xff]  }
 0x5b9   :  { %7665 = vtanh.f32 %v6069_v0  ;;  %v6070_v59 = vmul.f32 0.5, %v5577_v53  ;;  %5871 = vmatpush1.bf16.msra.mxu0 %v7558_v22  ;;  %v7612_v5 = vld [vmem:[%s10340_s7 + $0x478] ss:$28 sps:$4 sm:$0xff]   ;;  %v7620_v0 = vld [vmem:[%s10340_s7 + $0xcc4] ss:$28 sps:$4 sm:$0xff]  }
 0x5ba   :  { %6876 = vmatpush3.bf16.msra.mxu1 %v7562_v52  ;;  %v5620_v61 = vpop.f32.mrf.mxu1  ;;  %v5579_v62 = vpop.f32.mrf.mxu0  ;;  %5872 = vmatprep.subr.bf16.mxu0 %v7565_v8  ;;  %v7615_v22 = vld [vmem:[%s10340_s7 + $0xcfc] ss:$28 sps:$4 sm:$0xff]   ;;  %v7621_v53 = vld [vmem:[%s10340_s7 + $0x5c8] ss:$28 sps:$4 sm:$0xff]  }
 0x5bb   :  { %7667 = vtanh.f32 %v6070_v59  ;;  %6877 = vmatprep.subr.bf16.mxu1 %v7566_v55  ;;  %v7613_v52 = vld [vmem:[%s10340_s7 + $0xcf8] ss:$28 sps:$4 sm:$0xff]   ;;  %v7617_v8 = vld [vmem:[%s10340_s7 + $0x440] ss:$28 sps:$4 sm:$0xff]   ;;  %v7622_v56 = vld [vmem:[%s10340_s7 + $0x408] ss:$28 sps:$4 sm:$0xff]  }
 0x5bc   :  { %v7618_v55 = vld [vmem:[%s10340_s7 + $0xcc0] ss:$28 sps:$4 sm:$0xff]   ;;  %v7625_v58 = vld [vmem:[%s10340_s7 + $0xc8c] ss:$28 sps:$4 sm:$0xff]   ;;  %v7630_v62 = vld [vmem:[%s10340_s7 + $0xc54] ss:$28 sps:$4 sm:$0xff]  }
 0x5bd   :  { %5873 = vmatpush1.bf16.msra.mxu0 %v7563_v60  ;;  %v7626_v59 = vld [vmem:[%s10340_s7 + $0x590] ss:$28 sps:$4 sm:$0xff]   ;;  %v7623_v60 = vld [vmem:[%s10340_s7 + $0xc88] ss:$28 sps:$4 sm:$0xff]  }
 0x5be   :  { %6878 = vmatpush3.bf16.msra.mxu1 %v7567_v43  ;;  %5874 = vmatprep.subr.bf16.mxu0 %v7570_v57  ;;  %v7627_v61 = vld [vmem:[%s10340_s7 + $0x3d0] ss:$28 sps:$4 sm:$0xff]   ;;  %v7631_v43 = vld [vmem:[%s10340_s7 + $0x558] ss:$28 sps:$4 sm:$0xff]  }
 0x5bf   :  { %6879 = vmatprep.subr.bf16.mxu1 %v7571_v27  ;;  %v7628_v57 = vld [vmem:[%s10340_s7 + $0xc50] ss:$28 sps:$4 sm:$0xff]   ;;  %v7632_v27 = vld [vmem:[%s10340_s7 + $0x398] ss:$28 sps:$4 sm:$0xff]  }
 0x5c1   :  { %5875 = vmatpush1.bf16.msra.mxu0 %v7568_v63  ;;  %v7633_v63 = vld [vmem:[%s10340_s7 + $0xa60] ss:$28 sps:$4 sm:$0xff]  }
 0x5c2   :  { %6880 = vmatpush3.bf16.msra.mxu1 %v7572_v2  ;;  %5876 = vmatprep.subr.bf16.mxu0 %v7575_v3  ;;  %v7634_v2 = vld [vmem:[%s10340_s7 + $0xde0] ss:$28 sps:$4 sm:$0xff]  }
 0x5c3   :  { %6881 = vmatprep.subr.bf16.mxu1 %v7576_v30  ;;  %v7635_v3 = vld [vmem:[%s10340_s7 + $0x8a0] ss:$28 sps:$4 sm:$0xff]  }
 0x5c4   :  { %v7636_v30 = vld [vmem:[%s10340_s7 + $0xc20] ss:$28 sps:$4 sm:$0xff]  }
 0x5c5   :  { %5877 = vmatpush1.bf16.msra.mxu0 %v7573_v4  ;;  %v7637_v4 = vld [vmem:[%s10340_s7 + $0xa28] ss:$28 sps:$4 sm:$0xff]  }
 0x5c6   :  { %v7666_v16 = vpop.eup %7665  ;;  %6882 = vmatpush3.bf16.msra.mxu1 %v7577_v6  ;;  %5878 = vmatprep.subr.bf16.mxu0 %v7580_v7 }
 0x5c7   :  { %v6083_v19 = vmul.f32 0.5, %v7666_v16  ;;  %6883 = vmatprep.subr.bf16.mxu1 %v7581_v9  ;;  %v7638_v9 = vld [vmem:[%s10340_s7 + $0xda8] ss:$28 sps:$4 sm:$0xff]  }
 0x5c8   :  { %v7668_v20 = vpop.eup %7667 }
 0x5c9   :  { %v6090_v21 = vadd.f32 0.5, %v6083_v19  ;;  %v6084_v13 = vmul.f32 0.5, %v7668_v20  ;;  %5879 = vmatpush1.bf16.msra.mxu0 %v7578_v10  ;;  %v7639_v10 = vld [vmem:[%s10340_s7 + $0x868] ss:$28 sps:$4 sm:$0xff]   ;;  %v7643_v20 = vld [vmem:[%s10340_s7 + $0x830] ss:$28 sps:$4 sm:$0xff]  }
 0x5ca   :  { %6884 = vmatpush3.bf16.msra.mxu1 %v7582_v17  ;;  %5880 = vmatprep.subr.bf16.mxu0 %v7585_v29  ;;  %v7640_v29 = vld [vmem:[%s10340_s7 + $0xbe8] ss:$28 sps:$4 sm:$0xff]  }
 0x5cb   :  { %6097 = vst [vmem:[#allocation2] sm:$0xff] %v6090_v21  ;;  %v6091_v33 = vadd.f32 0.5, %v6084_v13  ;;  %6885 = vmatprep.subr.bf16.mxu1 %v7586_v54 }
 0x5cd   :  { %6098 = vst [vmem:[#allocation2 + $0x8] sm:$0xff] %v6091_v33  ;;  %5881 = vmatpush1.bf16.msra.mxu0 %v7583_v14  ;;  %v7645_v14 = vld [vmem:[%s10340_s7 + $0x9b8] ss:$28 sps:$4 sm:$0xff]  }
 0x5ce   :  { %6886 = vmatpush3.bf16.msra.mxu1 %v7587_v32  ;;  %5882 = vmatprep.subr.bf16.mxu0 %v7590_v23  ;;  %v7646_v32 = vld [vmem:[%s10340_s7 + $0xd38] ss:$28 sps:$4 sm:$0xff]  }
 0x5cf   :  { %6887 = vmatprep.subr.bf16.mxu1 %v7591_v24  ;;  %v7647_v23 = vld [vmem:[%s10340_s7 + $0x7f8] ss:$28 sps:$4 sm:$0xff]   ;;  %v7649_v24 = vld [vmem:[%s10340_s7 + $0x980] ss:$28 sps:$4 sm:$0xff]  }
 0x5d0   :  { %v7648_v33 = vld [vmem:[%s10340_s7 + $0xb78] ss:$28 sps:$4 sm:$0xff]  }
 0x5d1   :  { %5883 = vmatpush1.bf16.msra.mxu0 %v7588_v34  ;;  %v7650_v34 = vld [vmem:[%s10340_s7 + $0xd00] ss:$28 sps:$4 sm:$0xff]  }
 0x5d2   :  { %6888 = vmatpush3.bf16.msra.mxu1 %v7592_v35  ;;  %5884 = vmatprep.subr.bf16.mxu0 %v7595_v36  ;;  %v7651_v35 = vld [vmem:[%s10340_s7 + $0x7c0] ss:$28 sps:$4 sm:$0xff]  }
 0x5d3   :  { %6895 = vmatprep.subr.bf16.mxu1 %v7596_v18  ;;  %v7652_v36 = vld [vmem:[%s10340_s7 + $0xb40] ss:$28 sps:$4 sm:$0xff]   ;;  %v7653_v18 = vld [vmem:[%s10340_s7 + $0x948] ss:$28 sps:$4 sm:$0xff]  }
 0x5d5   :  { %5942 = vmatmul.mubr.bf16.vlgmr.msra.gmra.mxu1 %v9062_v48  ;;  %5885 = vmatpush2.bf16.msra.mxu0 %v7593_v31  ;;  %v7606_v48 = vld [vmem:[%s10340_s7 + $0x670] ss:$28 sps:$4 sm:$0xff]   ;;  %v7654_v31 = vld [vmem:[%s10340_s7 + $0xcc8] ss:$28 sps:$4 sm:$0xff]  }
 0x5d6   :  { %6896 = vmatpush3.bf16.msra.mxu1 %v7597_v28  ;;  %5981 = vmatprep.mubr.bf16.mxu1 %v9083_v11  ;;  %v7607_v11 = vld [vmem:[%s10340_s7 + $0x4b0] ss:$28 sps:$4 sm:$0xff]   ;;  %v7655_v28 = vld [vmem:[%s10340_s7 + $0x788] ss:$28 sps:$4 sm:$0xff]  }
 0x5d7   :  { %5886 = vmatprep.subr.bf16.mxu0 %v7600_v37  ;;  %6897 = vmatprep.subr.bf16.mxu1 %v7601_v38  ;;  %v7656_v37 = vld [vmem:[%s10340_s7 + $0xb08] ss:$28 sps:$4 sm:$0xff]   ;;  %v7657_v38 = vld [vmem:[%s10340_s7 + $0x910] ss:$28 sps:$4 sm:$0xff]  }
 0x5d9   :  { %5887 = vmatpush2.bf16.msra.mxu0 %v7598_v39  ;;  %v7658_v39 = vld [vmem:[%s10340_s7 + $0xc90] ss:$28 sps:$4 sm:$0xff]  }
 0x5da   :  { %6898 = vmatpush3.bf16.msra.mxu1 %v7602_v41  ;;  %5888 = vmatprep.subr.bf16.mxu0 %v7605_v44  ;;  %v7659_v41 = vld [vmem:[%s10340_s7 + $0x750] ss:$28 sps:$4 sm:$0xff]  }
 0x5db   :  { %6899 = vmatprep.subr.bf16.mxu1 %v7606_v48  ;;  %v7660_v44 = vld [vmem:[%s10340_s7 + $0xad0] ss:$28 sps:$4 sm:$0xff]   ;;  %v7661_v48 = vld [vmem:[%s10340_s7 + $0x8d8] ss:$28 sps:$4 sm:$0xff]  }
 0x5dd   :  { %5889 = vmatpush2.bf16.msra.mxu0 %v7603_v46  ;;  %v7662_v46 = vld [vmem:[%s10340_s7 + $0xc58] ss:$28 sps:$4 sm:$0xff]  }
 0x5de   :  { %6900 = vmatpush3.bf16.msra.mxu1 %v7607_v11  ;;  %5890 = vmatprep.subr.bf16.mxu0 %v7610_v25  ;;  %v7663_v11 = vld [vmem:[%s10340_s7 + $0x718] ss:$28 sps:$4 sm:$0xff]  }
 0x5df   :  { %6901 = vmatprep.subr.bf16.mxu1 %v7611_v49  ;;  %v7664_v25 = vld [vmem:[%s10340_s7 + $0xa98] ss:$28 sps:$4 sm:$0xff]   ;;  %v3088_v49 = vsub.s32 2, %v7995_v26 }
 0x5e1   :  { %5891 = vmatpush2.bf16.msra.mxu0 %v7608_v12  ;;  %v3092_v12 = vsub.s32 3, %v7995_v26 }
 0x5e2   :  { %6902 = vmatpush3.bf16.msra.mxu1 %v7612_v5  ;;  %5892 = vmatprep.subr.bf16.mxu0 %v7615_v22  ;;  %v10314_v5 = vld [vmem:[%s10341_s8] sm:$0x7f] }
 0x5e3   :  { %6903 = vmatprep.subr.bf16.mxu1 %v7616_v51  ;;  %v3089_v22 = vrot.slane %v10314_v5, %v3088_v49  ;;  %v3093_v51 = vrot.slane %v10314_v5, %v3092_v12 }
 0x5e5   :  { %5893 = vmatpush2.bf16.msra.mxu0 %v7613_v52  ;;  %v5616_v52 = vadd.f32 %v10010_v47, %v3089_v22 }
 0x5e6   :  { %6904 = vmatpush3.bf16.msra.mxu1 %v7617_v8  ;;  %5894 = vmatprep.subr.bf16.mxu0 %v7620_v0  ;;  %v5618_v8 = vadd.f32 %v10023_v50, %v3093_v51 }
 0x5e7   :  { %6905 = vmatprep.subr.bf16.mxu1 %v7621_v53 }
 0x5e9   :  { %5895 = vmatpush2.bf16.msra.mxu0 %v7618_v55 }
 0x5ea   :  { %6906 = vmatpush3.bf16.msra.mxu1 %v7622_v56  ;;  %5896 = vmatprep.subr.bf16.mxu0 %v7625_v58 }
 0x5eb   :  { %6907 = vmatprep.subr.bf16.mxu1 %v7626_v59 }
 0x5ed   :  { %5897 = vmatpush2.bf16.msra.mxu0 %v7623_v60 }
 0x5ee   :  { %6908 = vmatpush3.bf16.msra.mxu1 %v7627_v61  ;;  %5898 = vmatprep.subr.bf16.mxu0 %v7630_v62 }
 0x5ef   :  { %6909 = vmatprep.subr.bf16.mxu1 %v7631_v43 }
 0x5f1   :  { %5899 = vmatpush2.bf16.msra.mxu0 %v7628_v57 }
 0x5f2   :  { %6910 = vmatpush3.bf16.msra.mxu1 %v7632_v27  ;;  %6917 = vmatprep.subr.bf16.mxu0 %v7633_v63 }
 0x5f3   :  { %6939 = vmatprep.subr.bf16.mxu1 %v7634_v2 }
 0x5f4   :  { %v10214_v6 = vpop.f32.mrf.mxu0  ;;  %v10216_v7 = vpop.f32.mrf.mxu1  ;;  %5901 = vmatmul.mubr.bf16.vlgmr.msra.gmra.mxu0 %v9400_v45 }
 0x5f5   :  { %5982 = vmatmul.mubr.bf16.vlgmr.msra.gmra.mxu1 %v9092_v15  ;;  %6918 = vmatpush3.bf16.msra.mxu0 %v7635_v3  ;;  %v7641_v15 = vld [vmem:[%s10340_s7 + $0x9f0] ss:$28 sps:$4 sm:$0xff]  }
 0x5f6   :  { %6021 = vmatprep.mubr.bf16.mxu0 %v9280_v42  ;;  %6940 = vmatpush3.bf16.msra.mxu1 %v7636_v30  ;;  %v10227_v16 = vpop.f32.mrf.mxu0  ;;  %v10229_v17 = vpop.f32.mrf.mxu1  ;;  %v7642_v42 = vld [vmem:[%s10340_s7 + $0xd70] ss:$28 sps:$4 sm:$0xff]  }
 0x5f7   :  { %6061 = vmatprep.mubr.bf16.mxu1 %v9391_v40  ;;  %6919 = vmatprep.subr.bf16.mxu0 %v7637_v4  ;;  %v7644_v40 = vld [vmem:[%s10340_s7 + $0xbb0] ss:$28 sps:$4 sm:$0xff]   ;;  %s7707_s7 = smov [#allocation2]  }
 0x5f8   :  { %v5660_v19 = vpop.f32.mrf.mxu0  ;;  %v5701_v54 = vpop.f32.mrf.mxu1  ;;  %6941 = vmatprep.subr.bf16.mxu1 %v7638_v9  ;;  %s6111_s8 = sshll.u32 %s7707_s7, 4  ;;  %s6112_s8 = int_to_ptr.vmem [resolvable:$true] %s6111_s8 }
 0x5f9   :  { %6920 = vmatpush3.bf16.msra.mxu0 %v7639_v10  ;;  %s7682_s24 = scalar_lea.vmem %s6112_s8, 896  ;;  %p7687_p1 = scmp.lt.s32.totalorder %s6112_s8, %s6112_s8 }
 0x5fa   :  { %6942 = vmatpush3.bf16.msra.mxu1 %v7640_v29  ;;  %v5661_v21 = vpop.f32.mrf.mxu0  ;;  %v5702_v13 = vpop.f32.mrf.mxu1  ;;  %6921 = vmatprep.subr.bf16.mxu0 %v7641_v15  ;;  %p7683_p0 = scmp.ne.s32.totalorder %s6112_s8, %s7682_s24  ;;  %p7688_p2 = scmp.lt.s32.totalorder %s7682_s24, %s7682_s24 }
 0x5fb   :  { %6943 = vmatprep.subr.bf16.mxu1 %v7642_v42  ;;  %v3096_v13 = vsub.s32 4, %v7995_v26 }
 0x5fc   :  { %p7689_p3 = por %p7688_p2, %p7687_p1 }
 0x5fd   :  { %6922 = vmatpush3.bf16.msra.mxu0 %v7643_v20 }
 0x5fe   :  { %6944 = vmatpush3.bf16.msra.mxu1 %v7644_v40  ;;  %6923 = vmatprep.subr.bf16.mxu0 %v7645_v14  ;;  %v3100_v40 = vsub.s32 5, %v7995_v26  ;;  %v3097_v14 = vrot.slane %v10314_v5, %v3096_v13  ;;  %p7690_p4 = pnand %p7689_p3, %p7683_p0 }
 0x5ff   :  { %6945 = vmatprep.subr.bf16.mxu1 %v7646_v32 }
 0x600   :  { %v3101_v32 = vrot.slane %v10314_v5, %v3100_v40 }
 0x601   :  { %6924 = vmatpush3.bf16.msra.mxu0 %v7647_v23 }
 0x602   :  { %6946 = vmatpush3.bf16.msra.mxu1 %v7648_v33  ;;  %6925 = vmatprep.subr.bf16.mxu0 %v7649_v24 }
 0x603   :  { %6947 = vmatprep.subr.bf16.mxu1 %v7650_v34 }
 0x605   :  { %6926 = vmatpush3.bf16.msra.mxu0 %v7651_v35 }
 0x606   :  { %6948 = vmatpush3.bf16.msra.mxu1 %v7652_v36  ;;  %6927 = vmatprep.subr.bf16.mxu0 %v7653_v18 }
 0x607   :  { %6949 = vmatprep.subr.bf16.mxu1 %v7654_v31 }
 0x609   :  { %6928 = vmatpush3.bf16.msra.mxu0 %v7655_v28 }
 0x60a   :  { %6950 = vmatpush3.bf16.msra.mxu1 %v7656_v37  ;;  %6929 = vmatprep.subr.bf16.mxu0 %v7657_v38 }
 0x60b   :  { %6951 = vmatprep.subr.bf16.mxu1 %v7658_v39 }
 0x60d   :  { %6930 = vmatpush3.bf16.msra.mxu0 %v7659_v41 }
 0x60e   :  { %6952 = vmatpush3.bf16.msra.mxu1 %v7660_v44  ;;  %6931 = vmatprep.subr.bf16.mxu0 %v7661_v48 }
 0x60f   :  { %6953 = vmatprep.subr.bf16.mxu1 %v7662_v46 }
 0x611   :  { %6932 = vmatpush3.bf16.msra.mxu0 %v7663_v11 }
 0x612   :  { %6954 = vmatpush3.bf16.msra.mxu1 %v7664_v25 }
 0x614   :  { %6022 = vmatmul.mubr.bf16.vlgmr.msra.gmra.mxu0 %v9286_v1  ;;  %v5657_v1 = vadd.f32 %v10214_v6, %v5616_v52 }
 0x615   :  { %6062 = vmatmul.mubr.bf16.vlgmr.msra.gmra.mxu1 %v9400_v45  ;;  %v5659_v45 = vadd.f32 %v10227_v16, %v5618_v8 }
 0x616   :  { %v5698_v0 = vadd.f32 %v10216_v7, %v5657_v1  ;;  %v3104_v1 = vsub.s32 6, %v7995_v26 }
 0x617   :  { %v5700_v55 = vadd.f32 %v10229_v17, %v5659_v45 }
 0x618   :  { %v3105_v45 = vrot.slane %v10314_v5, %v3104_v1 }
 0x634   :  { %v5738_v53 = vpop.f32.mrf.mxu0 }
 0x635   :  { %v5739_v56 = vadd.f32 %v5738_v53, %v5698_v0  ;;  %v5779_v58 = vpop.f32.mrf.mxu1 }
 0x636   :  { %v5740_v59 = vpop.f32.mrf.mxu0  ;;  %v5780_v23 = vadd.f32 %v5779_v58, %v3097_v14 }
 0x637   :  { %v6071_v60 = vmul.f32 0.5, %v5739_v56  ;;  %v5741_v61 = vadd.f32 %v5740_v59, %v5700_v55  ;;  %v5781_v62 = vpop.f32.mrf.mxu1 }
 0x638   :  { %v5742_v43 = vpop.f32.mrf.mxu0  ;;  %v5782_v33 = vadd.f32 %v5781_v62, %v3101_v32 }
 0x639   :  { %7669 = vtanh.f32 %v6071_v60  ;;  %v6072_v47 = vmul.f32 0.5, %v5741_v61  ;;  %v5783_v57 = vpop.f32.mrf.mxu1 }
 0x63a   :  { %v5743_v50 = vpop.f32.mrf.mxu0 }
 0x63b   :  { %7671 = vtanh.f32 %v6072_v47  ;;  %v5784_v27 = vpop.f32.mrf.mxu1 }
 0x646   :  { %v7670_v63 = vpop.eup %7669 }
 0x647   :  { %v6085_v2 = vmul.f32 0.5, %v7670_v63 }
 0x648   :  { %v7672_v3 = vpop.eup %7671 }
 0x649   :  { %v6092_v30 = vadd.f32 0.5, %v6085_v2  ;;  %v6086_v4 = vmul.f32 0.5, %v7672_v3 }
 0x64b   :  { %6099 = vst [vmem:[#allocation2 + $0x10] sm:$0xff] %v6092_v30  ;;  %v6093_v6 = vadd.f32 0.5, %v6086_v4 }
 0x64d   :  { %6100 = vst [vmem:[#allocation2 + $0x18] sm:$0xff] %v6093_v6 }
 0x674   :  { %v5820_v7 = vpop.f32.mrf.mxu0 }
 0x675   :  { %v5861_v9 = vpop.f32.mrf.mxu1  ;;  %v5821_v24 = vadd.f32 %v5820_v7, %v5780_v23 }
 0x676   :  { %v5822_v10 = vpop.f32.mrf.mxu0 }
 0x677   :  { %v5863_v16 = vpop.f32.mrf.mxu1  ;;  %v5823_v34 = vadd.f32 %v5822_v10, %v5782_v33  ;;  %v5862_v35 = vadd.f32 %v5861_v9, %v5821_v24 }
 0x678   :  { %v5824_v17 = vpop.f32.mrf.mxu0 }
 0x679   :  { %v5865_v29 = vpop.f32.mrf.mxu1  ;;  %v5864_v18 = vadd.f32 %v5863_v16, %v5823_v34 }
 0x67a   :  { %v5825_v15 = vpop.f32.mrf.mxu0 }
 0x67b   :  { %v5866_v42 = vpop.f32.mrf.mxu1 }
 0x695   :  { %v6889_v19 = vpop.f32.mrf.mxu1 }
 0x697   :  { %v6890_v54 = vpop.f32.mrf.mxu1 }
 0x698   :  { %v6891_v0 = vadd.f32 %v6890_v54, %v6889_v19 }
 0x699   :  { %v6892_v20 = vpop.f32.mrf.mxu1 }
 0x69a   :  { %v5944_v56 = vadd.f32 %v6891_v0, %v3105_v45 }
 0x69b   :  { %v6893_v21 = vpop.f32.mrf.mxu1 }
 0x6b4   :  { %v5902_v36 = vpop.f32.mrf.mxu0 }
 0x6b5   :  { %v5903_v31 = vadd.f32 %v5902_v36, %v5862_v35  ;;  %v6911_v28 = vpop.f32.mrf.mxu1 }
 0x6b6   :  { %v5904_v37 = vpop.f32.mrf.mxu0 }
 0x6b7   :  { %v6073_v38 = vmul.f32 0.5, %v5903_v31  ;;  %v5905_v39 = vadd.f32 %v5904_v37, %v5864_v18  ;;  %v6912_v41 = vpop.f32.mrf.mxu1 }
 0x6b8   :  { %v5906_v44 = vpop.f32.mrf.mxu0  ;;  %v6913_v53 = vadd.f32 %v6912_v41, %v6911_v28 }
 0x6b9   :  { %7673 = vtanh.f32 %v6073_v38  ;;  %v6074_v48 = vmul.f32 0.5, %v5905_v39  ;;  %v6914_v46 = vpop.f32.mrf.mxu1 }
 0x6ba   :  { %v5907_v11 = vpop.f32.mrf.mxu0  ;;  %v5984_v60 = vadd.f32 %v6913_v53, %v5944_v56 }
 0x6bb   :  { %7675 = vtanh.f32 %v6074_v48  ;;  %v6915_v25 = vpop.f32.mrf.mxu1 }
 0x6c6   :  { %v7674_v49 = vpop.eup %7673 }
 0x6c7   :  { %v6087_v12 = vmul.f32 0.5, %v7674_v49 }
 0x6c8   :  { %v7676_v22 = vpop.eup %7675 }
 0x6c9   :  { %v6094_v51 = vadd.f32 0.5, %v6087_v12  ;;  %v6088_v52 = vmul.f32 0.5, %v7676_v22 }
 0x6cb   :  { %6101 = vst [vmem:[#allocation2 + $0x20] sm:$0xff] %v6094_v51  ;;  %v6095_v8 = vadd.f32 0.5, %v6088_v52 }
 0x6cd   :  { %6102 = vst [vmem:[#allocation2 + $0x28] sm:$0xff] %v6095_v8 }
 0x6d4   :  { %v6933_v55 = vpop.f32.mrf.mxu0 }
 0x6d5   :  { %v6955_v58 = vpop.f32.mrf.mxu1 }
 0x6d6   :  { %v6934_v59 = vpop.f32.mrf.mxu0 }
 0x6d7   :  { %v6935_v61 = vadd.f32 %v6934_v59, %v6933_v55  ;;  %v6956_v62 = vpop.f32.mrf.mxu1 }
 0x6d8   :  { %v6936_v43 = vpop.f32.mrf.mxu0  ;;  %v6957_v57 = vadd.f32 %v6956_v62, %v6955_v58 }
 0x6d9   :  { %v6024_v47 = vadd.f32 %v6935_v61, %v5984_v60  ;;  %v6958_v50 = vpop.f32.mrf.mxu1 }
 0x6da   :  { %v6937_v27 = vpop.f32.mrf.mxu0 }
 0x6db   :  { %v6064_v63 = vadd.f32 %v6957_v57, %v6024_v47  ;;  %v6959_v2 = vpop.f32.mrf.mxu1 }
 0x6dd   :  { %v6075_v26 = vmul.f32 0.5, %v6064_v63 }
 0x6df   :  { %7677 = vtanh.f32 %v6075_v26 }
 0x6ec   :  { %v7678_v3 = vpop.eup %7677 }
 0x6ed   :  { %v6089_v5 = vmul.f32 0.5, %v7678_v3 }
 0x6ef   :  { %v6096_v30 = vadd.f32 0.5, %v6089_v5 }
 0x6f1   :  { %6104 = vst.msk [vmem:[#allocation2 + $0x30] sm:$0xff] %vm6103_vm7, %v6096_v30 }
 0x6f2   :  { %7693 = shalt.err (!%p7690_p4)
}
 0x6f3   :  { %6114 = dma.vmem_to_hbm [thread:$0]  %s6112_s8, 896, %s10342_s9, [#allocation3]  }
 0x6f4   :  { %7702 = dma.done.wait [#allocation3], 896  }
 0x6f5   :  { %7703 = vsyncadd [#allocation3], 4294966400 }
 0x6f6   :  { %6122 = vsyncpa [#allocation3], 1 }

</bundles_post_ra>
